<compile_context>
chip_gen: v7x
topology: tpu7x:2x2x1
jax: 0.10.0
libtpu: 0.0.40
codegen_flags: <defaults>
</compile_context>

<pallas_src>
import jax
import jax.numpy as jnp
from jax.experimental import pallas as pl
from jax.experimental.pallas import tpu as pltpu

D = 512            # feature width hard-coded by the module
BN_EPS = 1e-5
N_LAYERS = 4       # Lin->BN->ReLU, Lin->BN->ReLU, Lin, Lin->BN->ReLU (head)
VEC_ROWS = 8       # sublane-padded vector table rows: [bias, gamma, beta, 0...]


# ---------------------------------------------------------------------------
# Kernel
# ---------------------------------------------------------------------------

def _fused_kernel(xt_ref, xi_ref, w_ref, vec_ref, out_ref):
    """grid=(2,): program 0 = txt branch (log-var head), 1 = img branch (+residual).

    All four layers of the selected branch run inside this one grid step with a
    statically unrolled loop:
      l = 0, 1 : Linear -> BatchNorm -> ReLU   (bias elided: cancelled by BN)
      l = 2    : Linear (+bias)                (no BN / ReLU)
      l = 3    : Linear -> BatchNorm -> ReLU   (head; bias elided)
    """
    is_img = pl.program_id(0) == 1

    # Branch input select (both (B, D) tiles are already in VMEM, 16 KiB each).
    h = jnp.where(is_img, xi_ref[...], xt_ref[...])            # (B, D) f32
    inv_n = jnp.float32(1.0 / h.shape[0])

    for l in range(N_LAYERS):                                  # statically unrolled
        y = jnp.dot(h.astype(jnp.bfloat16), w_ref[0, l],
                    preferred_element_type=jnp.float32)        # (B, D) f32 on MXU
        vl = vec_ref[0, l]                                     # (VEC_ROWS, D) f32
        if l == 2:
            # Plain Linear: only a bias add on this layer.
            h = y + vl[0:1]
        else:
            gamma = vl[1:2]
            beta = vl[2:3]
            # Training-mode BatchNorm1d: centered two-pass stats, biased var.
            mean = jnp.sum(y, axis=0, keepdims=True) * inv_n
            c = y - mean
            var = jnp.sum(c * c, axis=0, keepdims=True) * inv_n
            scale = gamma * jax.lax.rsqrt(var + BN_EPS)        # EUP rsqrt
            h = jnp.maximum(c * scale + beta, 0.0)             # fused affine + ReLU

    @pl.when(jnp.logical_not(is_img))
    def _():
        out_ref[0] = h.astype(out_ref.dtype)

    @pl.when(is_img)
    def _():
        out_ref[0] = (h + xi_ref[...]).astype(out_ref.dtype)   # residual add


# ---------------------------------------------------------------------------
# Wrapper
# ---------------------------------------------------------------------------

def asym_prob_adaptor_bnn_forward(xfT, xfI, weights, vecs):
    """xfT, xfI: (B, D) f32.
    weights: (2, N_LAYERS, D, D) bf16, already transposed so y = h @ W[b, l].
    vecs:    (2, N_LAYERS, VEC_ROWS, D) f32, rows = [bias, gamma, beta, 0...].
    Returns (txt_mu, txt_log_var, img_mu)."""
    B = xfT.shape[0]
    xfT = xfT.astype(jnp.float32)
    xfI = xfI.astype(jnp.float32)

    out = pl.pallas_call(
        _fused_kernel,
        out_shape=jax.ShapeDtypeStruct((2, B, D), jnp.float32),
        grid=(2,),
        in_specs=[
            pl.BlockSpec((B, D), lambda b: (0, 0)),                        # xfT
            pl.BlockSpec((B, D), lambda b: (0, 0)),                        # xfI
            pl.BlockSpec((1, N_LAYERS, D, D), lambda b: (b, 0, 0, 0)),     # weights
            pl.BlockSpec((1, N_LAYERS, VEC_ROWS, D), lambda b: (b, 0, 0, 0)),  # vecs
        ],
        out_specs=pl.BlockSpec((1, B, D), lambda b: (b, 0, 0)),
        compiler_params=pltpu.CompilerParams(
            dimension_semantics=("parallel",)),
    )(xfT, xfI, weights, vecs)

    txt_mu = xfT                        # identity pass-through
    txt_log_var = out[0]
    img_mu = out[1]
    return txt_mu, txt_log_var, img_mu


# ---------------------------------------------------------------------------
# Deterministic parameter construction (synthetic init, mirrors module shapes)
# ---------------------------------------------------------------------------

def _kaiming_normal(key, out_f, in_f):
    std = jnp.sqrt(2.0 / in_f)                        # fan_in, gain sqrt(2)
    return std * jax.random.normal(key, (out_f, in_f), dtype=jnp.float32)


def _linear_init(key, out_f, in_f):
    kw, kb = jax.random.split(key)
    bound = 1.0 / jnp.sqrt(in_f)
    W = jax.random.uniform(kw, (out_f, in_f), jnp.float32, -bound, bound)
    b = jax.random.uniform(kb, (out_f,), jnp.float32, -bound, bound)
    return W, b


def _bbb_sample(sample_key, init_key):
    """BBBLinear: W_mu ~ kaiming_normal, W_log_var=-3, b_mu=0, b_log_var=-3;
    sample W = W_mu + exp(log_var)*eps once per forward."""
    kW, kb = jax.random.split(sample_key)
    W_mu = _kaiming_normal(init_key, D, D)
    W = W_mu + jnp.exp(jnp.float32(-3.0)) * jax.random.normal(kW, (D, D), jnp.float32)
    b = jnp.exp(jnp.float32(-3.0)) * jax.random.normal(kb, (D,), jnp.float32)
    return W, b


def _bn_unit():
    return jnp.ones((D,), jnp.float32), jnp.zeros((D,), jnp.float32)


def make_txt_layers(key):
    ks = jax.random.split(key, 4)
    layers = []
    for i in range(4):
        W, b = _linear_init(ks[i], D, D)
        gamma, beta = _bn_unit()
        if i != 2:                      # bias exactly cancelled by following BN
            b = jnp.zeros((D,), jnp.float32)
        layers.append(dict(W=W, b=b, gamma=gamma, beta=beta))
    return layers


def make_img_layers(init_key, sample_key):
    ik = jax.random.split(init_key, 4)
    sk = jax.random.split(sample_key, 3)
    layers = []
    for i in range(3):                  # BBBLinear trunk
        W, b = _bbb_sample(sk[i], ik[i])
        gamma, beta = _bn_unit()
        if i != 2:
            b = jnp.zeros((D,), jnp.float32)
        layers.append(dict(W=W, b=b, gamma=gamma, beta=beta))
    W, b = _linear_init(ik[3], D, D)    # img_mu head (plain Linear, bias elided by BN)
    gamma, beta = _bn_unit()
    layers.append(dict(W=W, b=jnp.zeros((D,), jnp.float32), gamma=gamma, beta=beta))
    return layers


def _pack_branch(layers):
    w_stack = jnp.stack([l["W"].T for l in layers], axis=0)      # (4, D, D), y = h @ Wt
    vec = jnp.zeros((N_LAYERS, VEC_ROWS, D), jnp.float32)
    for i, l in enumerate(layers):
        vec = vec.at[i, 0].set(l["b"])
        vec = vec.at[i, 1].set(l["gamma"])
        vec = vec.at[i, 2].set(l["beta"])
    return w_stack, vec


def pack_params(txt_layers, img_layers):
    wt, vt = _pack_branch(txt_layers)
    wi, vi = _pack_branch(img_layers)
    weights = jnp.stack([wt, wi], axis=0).astype(jnp.bfloat16)   # (2, 4, D, D) bf16
    vecs = jnp.stack([vt, vi], axis=0)                           # (2, 4, 8, D) f32
    return weights, vecs


# TODO(synk): loss() / kl_divergence() are training-only scalar reductions and
# are not part of the forward path; not implemented here.


if __name__ == "__main__":
    B = 8
    root = jax.random.PRNGKey(0)
    k_xT, k_xI, k_txt, k_img_init, k_img_sample = jax.random.split(root, 5)

    xfT = jax.random.normal(k_xT, (B, D), jnp.float32)
    xfI = jax.random.normal(k_xI, (B, D), jnp.float32)

    weights, vecs = pack_params(make_txt_layers(k_txt),
                                make_img_layers(k_img_init, k_img_sample))

    fwd = jax.jit(asym_prob_adaptor_bnn_forward)
    txt_mu, txt_log_var, img_mu = fwd(xfT, xfI, weights, vecs)
    jax.block_until_ready((txt_mu, txt_log_var, img_mu))

    assert txt_mu.shape == (B, D)
    assert txt_log_var.shape == (B, D)
    assert img_mu.shape == (B, D)
    assert bool(jnp.all(jnp.isfinite(txt_log_var)))
    assert bool(jnp.all(txt_log_var >= 0.0))        # head ends in ReLU
    assert bool(jnp.all(jnp.isfinite(img_mu)))
    print("KERNEL_OK")
</pallas_src>

<mosaic_0001>
module attributes {stable_mosaic.version = 11 : i64} {
  func.func @_fused_kernel(%arg0: i32, %arg1: memref<8x512xf32, #tpu.memory_space<vmem>>, %arg2: memref<8x512xf32, #tpu.memory_space<vmem>>, %arg3: memref<1x4x512x512xbf16, #tpu.memory_space<vmem>>, %arg4: memref<1x4x8x512xf32, #tpu.memory_space<vmem>>, %arg5: memref<1x8x512xf32, #tpu.memory_space<vmem>>) attributes {dimension_semantics = [#tpu.dimension_semantics<parallel>], iteration_bounds = array<i64: 2>, scalar_prefetch = 0 : i64, scratch_operands = 0 : i64, tpu.core_type = #tpu.core_type<tc>, window_params = [{pipeline_mode = #tpu.pipeline_mode<synchronous>, transform_indices = @transform_0, window_bounds = array<i64: 8, 512>}, {pipeline_mode = #tpu.pipeline_mode<synchronous>, transform_indices = @transform_1, window_bounds = array<i64: 8, 512>}, {transform_indices = @transform_2, window_bounds = array<i64: 1, 4, 512, 512>}, {transform_indices = @transform_3, window_bounds = array<i64: 1, 4, 8, 512>}, {transform_indices = @transform_4, window_bounds = array<i64: 1, 8, 512>}]} {
    %c1_i32 = arith.constant 1 : i32
    %0 = arith.cmpi eq, %arg0, %c1_i32 : i32
    %c0 = arith.constant 0 : index
    %c0_0 = arith.constant 0 : index
    %1 = vector.load %arg2[%c0, %c0_0] : memref<8x512xf32, #tpu.memory_space<vmem>>, vector<8x512xf32>
    %c0_1 = arith.constant 0 : index
    %c0_2 = arith.constant 0 : index
    %2 = vector.load %arg1[%c0_1, %c0_2] : memref<8x512xf32, #tpu.memory_space<vmem>>, vector<8x512xf32>
    %3 = arith.select %0, %1, %2 : vector<8x512xf32>
    %4 = arith.truncf %3 : vector<8x512xf32> to vector<8x512xbf16>
    %c0_3 = arith.constant 0 : index
    %c0_4 = arith.constant 0 : index
    %c0_5 = arith.constant 0 : index
    %c0_6 = arith.constant 0 : index
    %5 = vector.load %arg3[%c0_3, %c0_4, %c0_5, %c0_6] : memref<1x4x512x512xbf16, #tpu.memory_space<vmem>>, vector<1x1x512x512xbf16>
    %6 = vector.shape_cast %5 : vector<1x1x512x512xbf16> to vector<512x512xbf16>
    %cst = arith.constant dense<0.000000e+00> : vector<8x512xf32>
    %7 = tpu.matmul %4, %6, %cst {dimension_numbers = #tpu.dot_dimension_numbers<[1], [0], [0], [1], [0, 0, 1, 1], [], []>} : vector<8x512xbf16>, vector<512x512xbf16>, vector<8x512xf32> -> vector<8x512xf32>
    %c0_7 = arith.constant 0 : index
    %c0_8 = arith.constant 0 : index
    %c0_9 = arith.constant 0 : index
    %c0_10 = arith.constant 0 : index
    %8 = vector.load %arg4[%c0_7, %c0_8, %c0_9, %c0_10] : memref<1x4x8x512xf32, #tpu.memory_space<vmem>>, vector<1x1x8x512xf32>
    %9 = vector.shape_cast %8 : vector<1x1x8x512xf32> to vector<8x512xf32>
    %10 = vector.extract_strided_slice %9 {offsets = [1, 0], sizes = [1, 512], strides = [1, 1]} : vector<8x512xf32> to vector<1x512xf32>
    %11 = vector.extract_strided_slice %9 {offsets = [2, 0], sizes = [1, 512], strides = [1, 1]} : vector<8x512xf32> to vector<1x512xf32>
    %cst_11 = arith.constant dense<0.000000e+00> : vector<512xf32>
    %12 = vector.multi_reduction <add>, %7, %cst_11 [0] : vector<8x512xf32> to vector<512xf32>
    %13 = vector.shape_cast %12 : vector<512xf32> to vector<1x512xf32>
    %cst_12 = arith.constant 1.250000e-01 : f32
    %14 = vector.broadcast %cst_12 : f32 to vector<1x512xf32>
    %15 = arith.mulf %13, %14 : vector<1x512xf32>
    %16 = vector.broadcast %15 : vector<1x512xf32> to vector<8x512xf32>
    %17 = arith.subf %7, %16 : vector<8x512xf32>
    %18 = arith.mulf %17, %17 : vector<8x512xf32>
    %cst_13 = arith.constant dense<0.000000e+00> : vector<512xf32>
    %19 = vector.multi_reduction <add>, %18, %cst_13 [0] : vector<8x512xf32> to vector<512xf32>
    %20 = vector.shape_cast %19 : vector<512xf32> to vector<1x512xf32>
    %cst_14 = arith.constant 1.250000e-01 : f32
    %21 = vector.broadcast %cst_14 : f32 to vector<1x512xf32>
    %22 = arith.mulf %20, %21 : vector<1x512xf32>
    %cst_15 = arith.constant 9.99999974E-6 : f32
    %23 = vector.broadcast %cst_15 : f32 to vector<1x512xf32>
    %24 = arith.addf %22, %23 : vector<1x512xf32>
    %25 = math.rsqrt %24 : vector<1x512xf32>
    %26 = arith.mulf %10, %25 : vector<1x512xf32>
    %27 = vector.broadcast %26 : vector<1x512xf32> to vector<8x512xf32>
    %28 = arith.mulf %17, %27 : vector<8x512xf32>
    %29 = vector.broadcast %11 : vector<1x512xf32> to vector<8x512xf32>
    %30 = arith.addf %28, %29 : vector<8x512xf32>
    %cst_16 = arith.constant 0.000000e+00 : f32
    %31 = vector.broadcast %cst_16 : f32 to vector<8x512xf32>
    %32 = arith.maximumf %30, %31 : vector<8x512xf32>
    %33 = arith.truncf %32 : vector<8x512xf32> to vector<8x512xbf16>
    %c0_17 = arith.constant 0 : index
    %c1 = arith.constant 1 : index
    %c0_18 = arith.constant 0 : index
    %c0_19 = arith.constant 0 : index
    %34 = vector.load %arg3[%c0_17, %c1, %c0_18, %c0_19] : memref<1x4x512x512xbf16, #tpu.memory_space<vmem>>, vector<1x1x512x512xbf16>
    %35 = vector.shape_cast %34 : vector<1x1x512x512xbf16> to vector<512x512xbf16>
    %cst_20 = arith.constant dense<0.000000e+00> : vector<8x512xf32>
    %36 = tpu.matmul %33, %35, %cst_20 {dimension_numbers = #tpu.dot_dimension_numbers<[1], [0], [0], [1], [0, 0, 1, 1], [], []>} : vector<8x512xbf16>, vector<512x512xbf16>, vector<8x512xf32> -> vector<8x512xf32>
    %c0_21 = arith.constant 0 : index
    %c1_22 = arith.constant 1 : index
    %c0_23 = arith.constant 0 : index
    %c0_24 = arith.constant 0 : index
    %37 = vector.load %arg4[%c0_21, %c1_22, %c0_23, %c0_24] : memref<1x4x8x512xf32, #tpu.memory_space<vmem>>, vector<1x1x8x512xf32>
    %38 = vector.shape_cast %37 : vector<1x1x8x512xf32> to vector<8x512xf32>
    %39 = vector.extract_strided_slice %38 {offsets = [1, 0], sizes = [1, 512], strides = [1, 1]} : vector<8x512xf32> to vector<1x512xf32>
    %40 = vector.extract_strided_slice %38 {offsets = [2, 0], sizes = [1, 512], strides = [1, 1]} : vector<8x512xf32> to vector<1x512xf32>
    %cst_25 = arith.constant dense<0.000000e+00> : vector<512xf32>
    %41 = vector.multi_reduction <add>, %36, %cst_25 [0] : vector<8x512xf32> to vector<512xf32>
    %42 = vector.shape_cast %41 : vector<512xf32> to vector<1x512xf32>
    %cst_26 = arith.constant 1.250000e-01 : f32
    %43 = vector.broadcast %cst_26 : f32 to vector<1x512xf32>
    %44 = arith.mulf %42, %43 : vector<1x512xf32>
    %45 = vector.broadcast %44 : vector<1x512xf32> to vector<8x512xf32>
    %46 = arith.subf %36, %45 : vector<8x512xf32>
    %47 = arith.mulf %46, %46 : vector<8x512xf32>
    %cst_27 = arith.constant dense<0.000000e+00> : vector<512xf32>
    %48 = vector.multi_reduction <add>, %47, %cst_27 [0] : vector<8x512xf32> to vector<512xf32>
    %49 = vector.shape_cast %48 : vector<512xf32> to vector<1x512xf32>
    %cst_28 = arith.constant 1.250000e-01 : f32
    %50 = vector.broadcast %cst_28 : f32 to vector<1x512xf32>
    %51 = arith.mulf %49, %50 : vector<1x512xf32>
    %cst_29 = arith.constant 9.99999974E-6 : f32
    %52 = vector.broadcast %cst_29 : f32 to vector<1x512xf32>
    %53 = arith.addf %51, %52 : vector<1x512xf32>
    %54 = math.rsqrt %53 : vector<1x512xf32>
    %55 = arith.mulf %39, %54 : vector<1x512xf32>
    %56 = vector.broadcast %55 : vector<1x512xf32> to vector<8x512xf32>
    %57 = arith.mulf %46, %56 : vector<8x512xf32>
    %58 = vector.broadcast %40 : vector<1x512xf32> to vector<8x512xf32>
    %59 = arith.addf %57, %58 : vector<8x512xf32>
    %cst_30 = arith.constant 0.000000e+00 : f32
    %60 = vector.broadcast %cst_30 : f32 to vector<8x512xf32>
    %61 = arith.maximumf %59, %60 : vector<8x512xf32>
    %62 = arith.truncf %61 : vector<8x512xf32> to vector<8x512xbf16>
    %c0_31 = arith.constant 0 : index
    %c2 = arith.constant 2 : index
    %c0_32 = arith.constant 0 : index
    %c0_33 = arith.constant 0 : index
    %63 = vector.load %arg3[%c0_31, %c2, %c0_32, %c0_33] : memref<1x4x512x512xbf16, #tpu.memory_space<vmem>>, vector<1x1x512x512xbf16>
    %64 = vector.shape_cast %63 : vector<1x1x512x512xbf16> to vector<512x512xbf16>
    %cst_34 = arith.constant dense<0.000000e+00> : vector<8x512xf32>
    %65 = tpu.matmul %62, %64, %cst_34 {dimension_numbers = #tpu.dot_dimension_numbers<[1], [0], [0], [1], [0, 0, 1, 1], [], []>} : vector<8x512xbf16>, vector<512x512xbf16>, vector<8x512xf32> -> vector<8x512xf32>
    %c0_35 = arith.constant 0 : index
    %c2_36 = arith.constant 2 : index
    %c0_37 = arith.constant 0 : index
    %c0_38 = arith.constant 0 : index
    %66 = vector.load %arg4[%c0_35, %c2_36, %c0_37, %c0_38] : memref<1x4x8x512xf32, #tpu.memory_space<vmem>>, vector<1x1x8x512xf32>
    %67 = vector.shape_cast %66 : vector<1x1x8x512xf32> to vector<8x512xf32>
    %68 = vector.extract_strided_slice %67 {offsets = [0, 0], sizes = [1, 512], strides = [1, 1]} : vector<8x512xf32> to vector<1x512xf32>
    %69 = vector.broadcast %68 : vector<1x512xf32> to vector<8x512xf32>
    %70 = arith.addf %65, %69 : vector<8x512xf32>
    %71 = arith.truncf %70 : vector<8x512xf32> to vector<8x512xbf16>
    %c0_39 = arith.constant 0 : index
    %c3 = arith.constant 3 : index
    %c0_40 = arith.constant 0 : index
    %c0_41 = arith.constant 0 : index
    %72 = vector.load %arg3[%c0_39, %c3, %c0_40, %c0_41] : memref<1x4x512x512xbf16, #tpu.memory_space<vmem>>, vector<1x1x512x512xbf16>
    %73 = vector.shape_cast %72 : vector<1x1x512x512xbf16> to vector<512x512xbf16>
    %cst_42 = arith.constant dense<0.000000e+00> : vector<8x512xf32>
    %74 = tpu.matmul %71, %73, %cst_42 {dimension_numbers = #tpu.dot_dimension_numbers<[1], [0], [0], [1], [0, 0, 1, 1], [], []>} : vector<8x512xbf16>, vector<512x512xbf16>, vector<8x512xf32> -> vector<8x512xf32>
    %c0_43 = arith.constant 0 : index
    %c3_44 = arith.constant 3 : index
    %c0_45 = arith.constant 0 : index
    %c0_46 = arith.constant 0 : index
    %75 = vector.load %arg4[%c0_43, %c3_44, %c0_45, %c0_46] : memref<1x4x8x512xf32, #tpu.memory_space<vmem>>, vector<1x1x8x512xf32>
    %76 = vector.shape_cast %75 : vector<1x1x8x512xf32> to vector<8x512xf32>
    %77 = vector.extract_strided_slice %76 {offsets = [1, 0], sizes = [1, 512], strides = [1, 1]} : vector<8x512xf32> to vector<1x512xf32>
    %78 = vector.extract_strided_slice %76 {offsets = [2, 0], sizes = [1, 512], strides = [1, 1]} : vector<8x512xf32> to vector<1x512xf32>
    %cst_47 = arith.constant dense<0.000000e+00> : vector<512xf32>
    %79 = vector.multi_reduction <add>, %74, %cst_47 [0] : vector<8x512xf32> to vector<512xf32>
    %80 = vector.shape_cast %79 : vector<512xf32> to vector<1x512xf32>
    %cst_48 = arith.constant 1.250000e-01 : f32
    %81 = vector.broadcast %cst_48 : f32 to vector<1x512xf32>
    %82 = arith.mulf %80, %81 : vector<1x512xf32>
    %83 = vector.broadcast %82 : vector<1x512xf32> to vector<8x512xf32>
    %84 = arith.subf %74, %83 : vector<8x512xf32>
    %85 = arith.mulf %84, %84 : vector<8x512xf32>
    %cst_49 = arith.constant dense<0.000000e+00> : vector<512xf32>
    %86 = vector.multi_reduction <add>, %85, %cst_49 [0] : vector<8x512xf32> to vector<512xf32>
    %87 = vector.shape_cast %86 : vector<512xf32> to vector<1x512xf32>
    %cst_50 = arith.constant 1.250000e-01 : f32
    %88 = vector.broadcast %cst_50 : f32 to vector<1x512xf32>
    %89 = arith.mulf %87, %88 : vector<1x512xf32>
    %cst_51 = arith.constant 9.99999974E-6 : f32
    %90 = vector.broadcast %cst_51 : f32 to vector<1x512xf32>
    %91 = arith.addf %89, %90 : vector<1x512xf32>
    %92 = math.rsqrt %91 : vector<1x512xf32>
    %93 = arith.mulf %77, %92 : vector<1x512xf32>
    %94 = vector.broadcast %93 : vector<1x512xf32> to vector<8x512xf32>
    %95 = arith.mulf %84, %94 : vector<8x512xf32>
    %96 = vector.broadcast %78 : vector<1x512xf32> to vector<8x512xf32>
    %97 = arith.addf %95, %96 : vector<8x512xf32>
    %cst_52 = arith.constant 0.000000e+00 : f32
    %98 = vector.broadcast %cst_52 : f32 to vector<8x512xf32>
    %99 = arith.maximumf %97, %98 : vector<8x512xf32>
    %true = arith.constant true
    %100 = arith.xori %0, %true : i1
    %101 = arith.extui %100 : i1 to i32
    %c0_i32 = arith.constant 0 : i32
    %102 = arith.cmpi ne, %101, %c0_i32 : i32
    scf.if %102 {
      %c0_54 = arith.constant 0 : index
      %c0_55 = arith.constant 0 : index
      %c0_56 = arith.constant 0 : index
      %105 = vector.load %arg5[%c0_54, %c0_55, %c0_56] : memref<1x8x512xf32, #tpu.memory_space<vmem>>, vector<1x8x512xf32>
      %106 = vector.shape_cast %105 : vector<1x8x512xf32> to vector<8x512xf32>
      %107 = vector.shape_cast %99 : vector<8x512xf32> to vector<1x8x512xf32>
      tpu.vector_store %arg5[%c0_54, %c0_55, %c0_56], %107 {strides = array<i32>} : memref<1x8x512xf32, #tpu.memory_space<vmem>>, vector<1x8x512xf32>,
    } else {
    }
    %103 = arith.extui %0 : i1 to i32
    %c0_i32_53 = arith.constant 0 : i32
    %104 = arith.cmpi ne, %103, %c0_i32_53 : i32
    scf.if %104 {
      %c0_54 = arith.constant 0 : index
      %c0_55 = arith.constant 0 : index
      %105 = vector.load %arg2[%c0_54, %c0_55] : memref<8x512xf32, #tpu.memory_space<vmem>>, vector<8x512xf32>
      %106 = arith.addf %99, %105 : vector<8x512xf32>
      %c0_56 = arith.constant 0 : index
      %c0_57 = arith.constant 0 : index
      %c0_58 = arith.constant 0 : index
      %107 = vector.load %arg5[%c0_56, %c0_57, %c0_58] : memref<1x8x512xf32, #tpu.memory_space<vmem>>, vector<1x8x512xf32>
      %108 = vector.shape_cast %107 : vector<1x8x512xf32> to vector<8x512xf32>
      %109 = vector.shape_cast %106 : vector<8x512xf32> to vector<1x8x512xf32>
      tpu.vector_store %arg5[%c0_56, %c0_57, %c0_58], %109 {strides = array<i32>} : memref<1x8x512xf32, #tpu.memory_space<vmem>>, vector<1x8x512xf32>,
    } else {
    }
    return
  }
  func.func @transform_0(%arg0: i32) -> (i32, i32) {
    %c0_i32 = arith.constant 0 : i32
    %c0_i32_0 = arith.constant 0 : i32
    %c0_i32_1 = arith.constant 0 : i32
    return %c0_i32, %c0_i32_0 : i32, i32
  }
  func.func @transform_1(%arg0: i32) -> (i32, i32) {
    %c0_i32 = arith.constant 0 : i32
    %c0_i32_0 = arith.constant 0 : i32
    %c0_i32_1 = arith.constant 0 : i32
    return %c0_i32, %c0_i32_0 : i32, i32
  }
  func.func @transform_2(%arg0: i32) -> (i32, i32, i32, i32) {
    %c0_i32 = arith.constant 0 : i32
    %c0_i32_0 = arith.constant 0 : i32
    %c0_i32_1 = arith.constant 0 : i32
    %c0_i32_2 = arith.constant 0 : i32
    return %arg0, %c0_i32, %c0_i32_0, %c0_i32_1 : i32, i32, i32, i32
  }
  func.func @transform_3(%arg0: i32) -> (i32, i32, i32, i32) {
    %c0_i32 = arith.constant 0 : i32
    %c0_i32_0 = arith.constant 0 : i32
    %c0_i32_1 = arith.constant 0 : i32
    %c0_i32_2 = arith.constant 0 : i32
    return %arg0, %c0_i32, %c0_i32_0, %c0_i32_1 : i32, i32, i32, i32
  }
  func.func @transform_4(%arg0: i32) -> (i32, i32, i32) {
    %c0_i32 = arith.constant 0 : i32
    %c0_i32_0 = arith.constant 0 : i32
    %c0_i32_1 = arith.constant 0 : i32
    return %arg0, %c0_i32, %c0_i32_0 : i32, i32, i32
  }
}

</mosaic_0001>

<bundles_post_ra>
// kernel: asym_prob_adaptor_bnn_forward.1
= control target key start
LH: loop header
LB: loop body
LE: loop exit
PB: predicated region body
PF: predicated region fallthrough
CT: control target
= control target key end

     0   :  { %9 = vsyncpa [#allocation3], 0  ;;  %s7450_s0 = inlined_call_operand.hbm [shape: f32[8,512], index: 0, kind: input, shape index: {}]   ;;  %s7451_s1 = inlined_call_operand.hbm [shape: f32[8,512], index: 1, kind: input, shape index: {}]   ;;  %s7452_s2 = inlined_call_operand.hbm [shape: bf16[2,4,512,512], index: 2, kind: input, shape index: {}]   ;;  %s7453_s3 = inlined_call_operand.hbm [shape: f32[2,4,8,512], index: 3, kind: input, shape index: {}]   ;;  %s7454_s4 = inlined_call_operand.vmem [shape: f32[2,8,512], index: 4, kind: output, shape index: {}]  }
   0x1   :  { %10 = vsyncpa [#allocation5], 0  ;;  %s6588_s15 = smov 0   ;;  %s6590_s16 = smov 0  }
   0x2   :  { %s6592_s17 = smov 0   ;;  %s6594_s18 = smov 0  }
   0x3 LB: > { %s6607_s19 = sadd.s32 4294967295, %s6553_s18   ;;  %s6610_s20 = sadd.s32 1, %s6553_s18   ;;  %s6553_s18 = sphi %s6594_s18, %s7484_s18   ;;  %s6549_s17 = sphi %s6592_s17, %s7483_s17   ;;  %s6545_s16 = sphi %s6590_s16, %s7482_s16   ;;  %s6541_s15 = sphi %s6588_s15, %s7481_s15  }
   0x4   : > { %s62_s21 = ssub.s32 %s6553_s18, %s6610_s20  ;;  %s65_s22 = sadd.s32 1, %s6549_s17 }
   0x5   : > { %p63_p0 = scmp.eq.s32.totalorder %s62_s21, 0  ;;  %p72_p1 = scmp.ne.s32.totalorder %s6549_s17, %s6545_s16 }
   0x6   : > { %p73_p2 = scmp.eq.s32.totalorder %s6553_s18, 0  ;;  %p78_p3 = scmp.ne.s32.totalorder %s6545_s16, %s6541_s15 }
   0x7   : > { %s6620_s23 = scalar_select %p63_p0, %s6549_s17, %s65_s22  }
   0x8   : > { %p6622_p4 = por %p73_p2, %p72_p1  ;;  %p7455_p5 = scmp.eq.s32.totalorder %s6607_s19, 0 }
   0x9   : > { %p4566_p6 = scmp.ge.s32.totalorder %s6553_s18, 1  ;;  %p141_p7 = scmp.lt.s32.totalorder %s6553_s18, 3 }
   0xa   : > { %p6631_p8 = por %p7455_p5, %p78_p3  ;;  %s6555_s27 = smov [#allocation2]  }
   0xb   : > { %p6635_p9 = pnand %p4566_p6, %p141_p7  ;;  %s154_s28 = sshll.u32 %s6555_s27, 4  ;;  %s155_s28 = int_to_ptr.vmem [resolvable:$true] %s154_s28 }
   0xc   : > { %s7463_s25 = scalar_select %p6631_p8, 1, 0 }
   0xd   : > { %s7464_s26 = scalar_select %p6635_p9, 1, 0 }
   0xe   : > { %p5546_p10 = pneg %p6635_p9  ;;  %p5562_p11 = scmp.lt.s32.totalorder %s6553_s18, 2 }
   0xf   : > { %s176_s29 = sand.u32 1, %s6553_s18   ;;  %s178_s6 = sand.u32 1, %s6549_s17  }
  0x10   : > { %p6645_p12 = pnand %p5546_p10, %p7455_p5  ;;  %p6651_p13 = pnand %p5562_p11, %p6622_p4 }
  0x11   : > { %s4570_s7 = sshll.u32 %s178_s6, 12  ;;  %s6395_s10 = scalar_lea.hbm %s7450_s0, 512 }
  0x12   : > { %s7466_s5 = scalar_select %p6651_p13, 1, 0 }
  0x13   : > { %p6396_p0 = scmp.ne.s32.totalorder %s7450_s0, %s6395_s10  ;;  %p7459_p1 = pneg %p6645_p12 }
  0x14   : > { %p6402_p4 = scmp.lt.u32.totalorder %s6395_s10, %s7450_s0 }
  0x15   : > { %p6398_p2 = pnand %p7459_p1, %p6396_p0 }
  0x17   : > { %p6399_p3 = pneg %p6398_p2 }
  0x19   : > { %p6404_p6 = pnand %p6402_p4, %p6399_p3 }
  0x1b   : > { %6407 = shalt.err (!%p6404_p6)
}
  0x1c   : > { %s6408_s15 = scalar_lea.vmem %s155_s28, 512  ;;  %p6416_p5 = scmp.lt.s32.totalorder %s155_s28, %s155_s28 }
  0x1d   : > { %p6409_p7 = scmp.ne.s32.totalorder %s155_s28, %s6408_s15  ;;  %p6417_p8 = scmp.lt.s32.totalorder %s6408_s15, %s6408_s15 }
  0x1f   : > { %p6411_p10 = pnand %p6409_p7, %p7459_p1  ;;  %p6418_p9 = por %p6417_p8, %p6416_p5 }
  0x21   : > { %p6412_p11 = pneg %p6411_p10 }
  0x23   : > { %p6419_p13 = pnand %p6418_p9, %p6412_p11 }
  0x25   : > { %6422 = shalt.err (!%p6419_p13)
}
  0x26   : > { %5549 = dma.hbm_to_vmem [thread:$0]  (!%p6645_p12), %s7450_s0, 512, %s155_s28, [#allocation3]  }
  0x27   : > { %s5495_s24 = sshll.u32 %s6553_s18, 16  ;;  %s180_s27 = scalar_lea.vmem [#allocation6], %s4570_s7 }
  0x28   : > { %s187_s8 = sshll.u32 %s180_s27, 4  ;;  %s6684_s11 = scalar_lea.hbm %s7452_s2, %s5495_s24  ;;  %s6686_s8 = int_to_ptr.vmem [resolvable:$true] %s187_s8 }
  0x29   : > { %s6688_s12 = scalar_lea.sflag [#allocation3], %s176_s29  ;;  %s6423_s13 = scalar_lea.hbm %s6684_s11, 65536 }
  0x2a   : > { %p6424_p5 = scmp.ne.s32.totalorder %s6684_s11, %s6423_s13  ;;  %p7467_p8 = scmp.ne.s32.totalorder %s7466_s5, 0 }
  0x2b   : > { %s6428_s14 = scalar_lea.hbm %s7452_s2, 131072  ;;  %p6429_p2 = scmp.lt.u32.totalorder %s6684_s11, %s7452_s2 }
  0x2c   : > { %p7460_p9 = pneg %p7467_p8  ;;  %p6430_p3 = scmp.lt.u32.totalorder %s6428_s14, %s6423_s13 }
  0x2d   : > { %p6432_p6 = scmp.lt.u32.totalorder %s6423_s13, %s6684_s11 }
  0x2e   : > { %p6426_p13 = pnand %p7460_p9, %p6424_p5  ;;  %p6431_p4 = por %p6430_p3, %p6429_p2 }
  0x30   : > { %p6427_p0 = pneg %p6426_p13  ;;  %p6433_p7 = por %p6432_p6, %p6431_p4 }
  0x32   : > { %p6434_p10 = pnand %p6433_p7, %p6427_p0 }
  0x34   : > { %6437 = shalt.err (!%p6434_p10)
}
  0x35   : > { %s6438_s29 = scalar_lea.vmem %s6686_s8, 65536  ;;  %s6556_s22 = smov [#allocation6]  }
  0x36   : > { %p6439_p11 = scmp.ne.s32.totalorder %s6686_s8, %s6438_s29  ;;  %s6443_s24 = sshll.u32 %s6556_s22, 4  ;;  %s6444_s24 = int_to_ptr.vmem [resolvable:$false] %s6443_s24 }
  0x37   : > { %s6445_s27 = scalar_lea.vmem %s6444_s24, 131072  ;;  %p6446_p1 = scmp.lt.s32.totalorder %s6686_s8, %s6444_s24 }
  0x38   : > { %p6441_p5 = pnand %p6439_p11, %p7460_p9  ;;  %p6447_p2 = scmp.lt.s32.totalorder %s6445_s27, %s6438_s29 }
  0x3a   : > { %p6442_p13 = pneg %p6441_p5  ;;  %p6448_p3 = por %p6447_p2, %p6446_p1 }
  0x3c   : > { %p6449_p4 = pnand %p6448_p3, %p6442_p13 }
  0x3e   : > { %6452 = shalt.err (!%p6449_p4)
}
  0x3f   : > { %s6557_s9 = smov 256   ;;  %s6558_s10 = smov 16  }
  0x40   : > { %5556 = dma.hbm_to_vmem [thread:$0]  (!%p7467_p8), %s6684_s11, 65536, %s6686_s8, %s6688_s12, %s6557_s9, %s6557_s9, %s6558_s10  }
  0x41   : > { %s4573_s13 = sshll.u32 %s178_s6, 7  ;;  %s6559_s28 = smov [#allocation4]  }
  0x42   : > { %s165_s7 = sshll.u32 %s6559_s28, 4  ;;  %s5496_s14 = sshll.u32 %s6553_s18, 11  ;;  %s166_s7 = int_to_ptr.vmem [resolvable:$true] %s165_s7 }
  0x43   : > { %s6453_s29 = scalar_lea.hbm %s7451_s1, 512  ;;  %p7468_p0 = pneg %p6645_p12 }
  0x44   : > { %p6454_p1 = scmp.ne.s32.totalorder %s7451_s1, %s6453_s29  ;;  %p6460_p10 = scmp.lt.u32.totalorder %s6453_s29, %s7451_s1 }
  0x46   : > { %p6456_p6 = pnand %p6454_p1, %p7468_p0 }
  0x48   : > { %p6457_p7 = pneg %p6456_p6 }
  0x4a   : > { %p6462_p11 = pnand %p6460_p10, %p6457_p7 }
  0x4c   : > { %6465 = shalt.err (!%p6462_p11)
}
  0x4d   : > { %s6466_s6 = scalar_lea.vmem %s166_s7, 512  ;;  %p7469_p13 = pmov %p7468_p0 }
  0x4e   : > { %p6467_p5 = scmp.ne.s32.totalorder %s166_s7, %s6466_s6  ;;  %p6474_p4 = scmp.lt.s32.totalorder %s166_s7, %s166_s7 }
  0x4f   : > { %p6475_p9 = scmp.lt.s32.totalorder %s6466_s6, %s6466_s6 }
  0x50   : > { %p6469_p2 = pnand %p6467_p5, %p7469_p13 }
  0x51   : > { %p6476_p8 = por %p6475_p9, %p6474_p4 }
  0x52   : > { %p6470_p3 = pneg %p6469_p2 }
  0x54   : > { %p6477_p0 = pnand %p6476_p8, %p6470_p3 }
  0x56   : > { %6480 = shalt.err (!%p6477_p0)
}
  0x57   : > { %5552 = dma.hbm_to_vmem [thread:$0]  (!%p6645_p12), %s7451_s1, 512, %s166_s7, [#allocation5]  }
  0x58   : > { %s6742_s28 = scalar_lea.hbm %s7453_s3, %s5496_s14  ;;  %s201_s15 = scalar_lea.vmem [#allocation7], %s4573_s13 }
  0x59   : > { %s208_s21 = sshll.u32 %s201_s15, 4  ;;  %s6481_s29 = scalar_lea.hbm %s6742_s28, 2048  ;;  %s6744_s21 = int_to_ptr.vmem [resolvable:$true] %s208_s21 }
  0x5a   : > { %p6482_p8 = scmp.ne.s32.totalorder %s6742_s28, %s6481_s29  ;;  %p7470_p9 = scmp.ne.s32.totalorder %s7466_s5, 0 }
  0x5b   : > { %s6486_s22 = scalar_lea.hbm %s7453_s3, 4096  ;;  %p6487_p12 = scmp.lt.u32.totalorder %s6742_s28, %s7453_s3 }
  0x5c   : > { %p7471_p1 = pneg %p7470_p9  ;;  %p6488_p10 = scmp.lt.u32.totalorder %s6486_s22, %s6481_s29 }
  0x5d   : > { %p6490_p5 = scmp.lt.u32.totalorder %s6481_s29, %s6742_s28 }
  0x5e   : > { %p6484_p6 = pnand %p6482_p8, %p7471_p1  ;;  %p6489_p11 = por %p6488_p10, %p6487_p12 }
  0x60   : > { %p6485_p7 = pneg %p6484_p6  ;;  %p6491_p13 = por %p6490_p5, %p6489_p11 }
  0x62   : > { %p6492_p2 = pnand %p6491_p13, %p6485_p7 }
  0x64   : > { %6495 = shalt.err (!%p6492_p2)
}
  0x65   : > { %s6496_s13 = scalar_lea.vmem %s6744_s21, 2048  ;;  %p7472_p4 = pmov %p7471_p1 }
  0x66   : > { %p6497_p3 = scmp.ne.s32.totalorder %s6744_s21, %s6496_s13  ;;  %s6560_s27 = smov [#allocation7]  }
  0x67   : > { %s6501_s8 = sshll.u32 %s6560_s27, 4  ;;  %s6502_s8 = int_to_ptr.vmem [resolvable:$false] %s6501_s8 }
  0x68   : > { %p6499_p0 = pnand %p6497_p3, %p7472_p4  ;;  %s6503_s6 = scalar_lea.vmem %s6502_s8, 4096 }
  0x69   : > { %p6504_p1 = scmp.lt.s32.totalorder %s6744_s21, %s6502_s8  ;;  %p6505_p6 = scmp.lt.s32.totalorder %s6503_s6, %s6496_s13 }
  0x6a   : > { %p6500_p8 = pneg %p6499_p0 }
  0x6b   : > { %p6506_p12 = por %p6505_p6, %p6504_p1 }
  0x6d   : > { %p6507_p10 = pnand %p6506_p12, %p6500_p8 }
  0x6f   : > { %6510 = shalt.err (!%p6507_p10)
}
  0x70   : > { %s6561_s18 = smov 512   ;;  %s6562_s11 = smov 32  }
  0x71   : > { %5559 = dma.hbm_to_vmem [thread:$0]  (!%p7470_p9), %s6742_s28, 2048, %s6744_s21, %s6688_s12, %s6561_s18, %s6561_s18, %s6562_s11  }
  0x72   : > { %p7473_p7 = scmp.ne.s32.totalorder %s7464_s26, 0 }
  0x73   : > { %p7474_p11 = scmp.eq.s32.totalorder (!%p7473_p7), %s6607_s19, 0 }
  0x74   : > { %220 = sbr.rel (%p7473_p7) target bundleno = 1494 (0x5d6), region = 36 }
  0x7b   : > { %6528 = dma.done.wait (%p7474_p11), [#allocation3], 512   ;;  %p7475_p5 = pmov %p7474_p11 }
  0x7d   : > { %6530 = vsyncadd (%p7475_p5), [#allocation3], 4294966784  ;;  %p7476_p13 = pmov %p7475_p5 }
  0x7e   : > { %p7477_p2 = pmov %p7475_p5 }
  0x7f   : > { %6532 = dma.done.wait (%p7476_p13), [#allocation5], 512  }
  0x80   : > { %6534 = vsyncadd (%p7477_p2), [#allocation5], 4294966784  ;;  %s230_s5 = sand.u32 1, %s6607_s19   ;;  %s232_s12 = sand.u32 1, %s6545_s16  }
  0x81   : > { %s4579_s26 = sshll.u32 %s232_s12, 12  ;;  %s231_s9 = scalar_lea.sflag [#allocation3], %s230_s5 }
  0x82   : > { %s6784_s10 = scalar_lea.vmem [#allocation6], %s4579_s26  ;;  %p7478_p9 = scmp.ne.s32.totalorder %s7463_s25, 0 }
  0x84   : > { %6536 = dma.done.wait (%p7478_p9), %s231_s9, 67584  }
  0x85   : > { %6538 = vsyncadd (%p7478_p9), %s231_s9, 4294899712  ;;  %p273_p3 = scmp.lt.s32.totalorder %s6607_s19, 1  ;;  %v5603_v0 = vld [vmem:[%s6784_s10 + $0x4] ss:$16 sps:$4 sm:$0xff]   ;;  %v5605_v1 = vld [vmem:[%s6784_s10 + $0xc] ss:$16 sps:$4 sm:$0xff]  }
  0x86   : > { %1066 = vmatprep.subr.bf16.mxu0 %v5603_v0  ;;  %v5607_v2 = vld [vmem:[%s6784_s10] ss:$16 sps:$4 sm:$0xff]   ;;  %v5608_v3 = vld [vmem:[%s6784_s10 + $0x8] ss:$16 sps:$4 sm:$0xff]   ;;  %1148 = vmatprep.subr.bf16.mxu1 %v5605_v1  ;;  %v5609_v4 = vld [vmem:[%s6784_s10 + $0x24] ss:$16 sps:$4 sm:$0xff]  }
  0x87   : > { %s274_s28 = scalar_select %p273_p3, %s6607_s19, 1  ;;  %1067 = vmatpush1.bf16.msra.mxu0 %v5607_v2  ;;  %1149 = vmatpush1.bf16.msra.mxu1 %v5608_v3  ;;  %v5611_v5 = vld [vmem:[%s6784_s10 + $0x2c] ss:$16 sps:$4 sm:$0xff]   ;;  %v5613_v6 = vld [vmem:[%s6784_s10 + $0x20] ss:$16 sps:$4 sm:$0xff]  }
  0x88   : > { %1068 = vmatprep.subr.bf16.mxu0 %v5609_v4  ;;  %v5614_v7 = vld [vmem:[%s6784_s10 + $0x28] ss:$16 sps:$4 sm:$0xff]   ;;  %1150 = vmatprep.subr.bf16.mxu1 %v5611_v5  ;;  %v5615_v8 = vld [vmem:[%s6784_s10 + $0x44] ss:$16 sps:$4 sm:$0xff]   ;;  %v5617_v9 = vld [vmem:[%s6784_s10 + $0x4c] ss:$16 sps:$4 sm:$0xff]  }
  0x89   : > { %s5497_s15 = sshll.u32 %s274_s28, 5  ;;  %v5619_v10 = vld [vmem:[%s6784_s10 + $0x40] ss:$16 sps:$4 sm:$0xff]   ;;  %v5620_v11 = vld [vmem:[%s6784_s10 + $0x48] ss:$16 sps:$4 sm:$0xff]   ;;  %p278_p4 = scmp.eq.s32.totalorder %s6607_s19, 1 }
  0x8a   : > { %s6795_s30 = scalar_lea.vmem %s7454_s4, %s5497_s15  ;;  %v5621_v12 = vld [vmem:[%s6784_s10 + $0x64] ss:$16 sps:$4 sm:$0xff]   ;;  %v5623_v13 = vld [vmem:[%s6784_s10 + $0x6c] ss:$16 sps:$4 sm:$0xff]   ;;  %v5625_v14 = vld [vmem:[%s6784_s10 + $0x60] ss:$16 sps:$4 sm:$0xff]  }
  0x8b   : > { %1069 = vmatpush1.bf16.msra.mxu0 %v5613_v6  ;;  %1151 = vmatpush1.bf16.msra.mxu1 %v5614_v7  ;;  %v5626_v15 = vld [vmem:[%s6784_s10 + $0x68] ss:$16 sps:$4 sm:$0xff]   ;;  %v5627_v16 = vld [vmem:[%s6784_s10 + $0x84] ss:$16 sps:$4 sm:$0xff]   ;;  %v5629_v17 = vld [vmem:[%s6784_s10 + $0x8c] ss:$16 sps:$4 sm:$0xff]  }
  0x8c   : > { %1070 = vmatprep.subr.bf16.mxu0 %v5615_v8  ;;  %1152 = vmatprep.subr.bf16.mxu1 %v5617_v9  ;;  %v5631_v18 = vld [vmem:[%s6784_s10 + $0x80] ss:$16 sps:$4 sm:$0xff]   ;;  %v5632_v19 = vld [vmem:[%s6784_s10 + $0x88] ss:$16 sps:$4 sm:$0xff]   ;;  %v5633_v20 = vld [vmem:[%s6784_s10 + $0xa4] ss:$16 sps:$4 sm:$0xff]  }
  0x8d   : > { %v5635_v21 = vld [vmem:[%s6784_s10 + $0xac] ss:$16 sps:$4 sm:$0xff]   ;;  %v5637_v22 = vld [vmem:[%s6784_s10 + $0xa0] ss:$16 sps:$4 sm:$0xff]   ;;  %v5638_v23 = vld [vmem:[%s6784_s10 + $0xa8] ss:$16 sps:$4 sm:$0xff]  }
  0x8e   : > { %v5639_v24 = vld [vmem:[%s6784_s10 + $0xc4] ss:$16 sps:$4 sm:$0xff]   ;;  %v5641_v25 = vld [vmem:[%s6784_s10 + $0xcc] ss:$16 sps:$4 sm:$0xff]   ;;  %v5643_v26 = vld [vmem:[%s6784_s10 + $0xc0] ss:$16 sps:$4 sm:$0xff]  }
  0x8f   : > { %1071 = vmatpush1.bf16.msra.mxu0 %v5619_v10  ;;  %1153 = vmatpush1.bf16.msra.mxu1 %v5620_v11  ;;  %v5644_v27 = vld [vmem:[%s6784_s10 + $0xc8] ss:$16 sps:$4 sm:$0xff]   ;;  %v5645_v28 = vld [vmem:[%s6784_s10 + $0xe4] ss:$16 sps:$4 sm:$0xff]   ;;  %v5647_v29 = vld [vmem:[%s6784_s10 + $0xec] ss:$16 sps:$4 sm:$0xff]  }
  0x90   : > { %1072 = vmatprep.subr.bf16.mxu0 %v5621_v12  ;;  %1154 = vmatprep.subr.bf16.mxu1 %v5623_v13  ;;  %v5649_v30 = vld [vmem:[%s6784_s10 + $0xe0] ss:$16 sps:$4 sm:$0xff]   ;;  %v5650_v31 = vld [vmem:[%s6784_s10 + $0xe8] ss:$16 sps:$4 sm:$0xff]   ;;  %v5651_v32 = vld [vmem:[%s6784_s10 + $0x104] ss:$16 sps:$4 sm:$0xff]  }
  0x91   : > { %v5653_v33 = vld [vmem:[%s6784_s10 + $0x10c] ss:$16 sps:$4 sm:$0xff]   ;;  %v5655_v34 = vld [vmem:[%s6784_s10 + $0x100] ss:$16 sps:$4 sm:$0xff]   ;;  %v5656_v35 = vld [vmem:[%s6784_s10 + $0x108] ss:$16 sps:$4 sm:$0xff]  }
  0x92   : > { %v5657_v36 = vld [vmem:[%s6784_s10 + $0x124] ss:$16 sps:$4 sm:$0xff]   ;;  %v5659_v37 = vld [vmem:[%s6784_s10 + $0x12c] ss:$16 sps:$4 sm:$0xff]   ;;  %s287_s25 = scalar_select %p278_p4, 1, 0 }
  0x93   : > { %1073 = vmatpush1.bf16.msra.mxu0 %v5625_v14  ;;  %1155 = vmatpush1.bf16.msra.mxu1 %v5626_v15  ;;  %v5661_v38 = vld [vmem:[%s6784_s10 + $0x120] ss:$16 sps:$4 sm:$0xff]   ;;  %v5662_v39 = vld [vmem:[%s6784_s10 + $0x128] ss:$16 sps:$4 sm:$0xff]   ;;  %v5663_v40 = vld [vmem:[%s6784_s10 + $0x144] ss:$16 sps:$4 sm:$0xff]  }
  0x94   : > { %1074 = vmatprep.subr.bf16.mxu0 %v5627_v16  ;;  %1156 = vmatprep.subr.bf16.mxu1 %v5629_v17  ;;  %v5665_v41 = vld [vmem:[%s6784_s10 + $0x14c] ss:$16 sps:$4 sm:$0xff]   ;;  %v288_v42 = vstv %s287_s25  ;;  %v5667_v43 = vld [vmem:[%s6784_s10 + $0x140] ss:$16 sps:$4 sm:$0xff]   ;;  %v5668_v44 = vld [vmem:[%s6784_s10 + $0x148] ss:$16 sps:$4 sm:$0xff]  }
  0x95   : > { %v5669_v45 = vld [vmem:[%s6784_s10 + $0x164] ss:$16 sps:$4 sm:$0xff]   ;;  %v5671_v46 = vld [vmem:[%s6784_s10 + $0x16c] ss:$16 sps:$4 sm:$0xff]   ;;  %vm6846_vm0 = vcmp.eq.s32.totalorder %v288_v42, 1  ;;  %s4580_s7 = sshll.u32 %s232_s12, 7 }
  0x96   : > { %v280_v48 = vld [vmem:[#allocation4 + $0x8] sm:$0xff]  ;;  %v5673_v50 = vld [vmem:[%s6784_s10 + $0x160] ss:$16 sps:$4 sm:$0xff]   ;;  %v5675_v53 = vld [vmem:[%s6784_s10 + $0x184] ss:$16 sps:$4 sm:$0xff]   ;;  %s7022_s22 = scalar_lea.vmem [#allocation7], %s4580_s7 }
  0x97   : > { %1075 = vmatpush1.bf16.msra.mxu0 %v5631_v18  ;;  %1157 = vmatpush1.bf16.msra.mxu1 %v5632_v19  ;;  %v284_v49 = vld [vmem:[#allocation2 + $0x8] sm:$0xff]  ;;  %v5679_v56 = vld [vmem:[%s6784_s10 + $0x180] ss:$16 sps:$4 sm:$0xff]   ;;  %v5681_v58 = vld [vmem:[%s6784_s10 + $0x1a4] ss:$16 sps:$4 sm:$0xff]  }
  0x98   : > { %1076 = vmatprep.subr.bf16.mxu0 %v5633_v20  ;;  %1158 = vmatprep.subr.bf16.mxu1 %v5635_v21  ;;  %v5674_v51 = vld [vmem:[%s6784_s10 + $0x168] ss:$16 sps:$4 sm:$0xff]   ;;  %v291_v52 = vsel %vm6846_vm0, %v280_v48, %v284_v49  ;;  %v5677_v54 = vld [vmem:[%s6784_s10 + $0x18c] ss:$16 sps:$4 sm:$0xff]   ;;  %v5685_v60 = vld [vmem:[%s6784_s10 + $0x1a0] ss:$16 sps:$4 sm:$0xff]  }
  0x99   : > { %v295_v55 = vpack.c.bf16 %v291_v52, %v291_v52  ;;  %v5680_v57 = vld [vmem:[%s6784_s10 + $0x188] ss:$16 sps:$4 sm:$0xff]   ;;  %v5683_v59 = vld [vmem:[%s6784_s10 + $0x1ac] ss:$16 sps:$4 sm:$0xff]   ;;  %v5687_v62 = vld [vmem:[%s6784_s10 + $0x1c4] ss:$16 sps:$4 sm:$0xff]  }
  0x9a   : > { %v5686_v61 = vld [vmem:[%s6784_s10 + $0x1a8] ss:$16 sps:$4 sm:$0xff]   ;;  %v5689_v63 = vld [vmem:[%s6784_s10 + $0x1cc] ss:$16 sps:$4 sm:$0xff]   ;;  %v5691_v0 = vld [vmem:[%s6784_s10 + $0x1c0] ss:$16 sps:$4 sm:$0xff]  }
  0x9b   : > { %1077 = vmatpush1.bf16.msra.mxu0 %v5637_v22  ;;  %1159 = vmatpush1.bf16.msra.mxu1 %v5638_v23  ;;  %v5692_v1 = vld [vmem:[%s6784_s10 + $0x1c8] ss:$16 sps:$4 sm:$0xff]   ;;  %v5693_v2 = vld [vmem:[%s6784_s10 + $0x1e4] ss:$16 sps:$4 sm:$0xff]   ;;  %v5695_v3 = vld [vmem:[%s6784_s10 + $0x1ec] ss:$16 sps:$4 sm:$0xff]  }
  0x9c   : > { %1078 = vmatprep.subr.bf16.mxu0 %v5639_v24  ;;  %1160 = vmatprep.subr.bf16.mxu1 %v5641_v25  ;;  %v279_v4 = vld [vmem:[#allocation4] sm:$0xff]  ;;  %v5698_v7 = vld [vmem:[%s6784_s10 + $0x1e8] ss:$16 sps:$4 sm:$0xff]   ;;  %v5704_v10 = vld [vmem:[%s6784_s10 + $0x20c] ss:$16 sps:$4 sm:$0xff]  }
  0x9d   : > { %1098 = vmatprep.mubr.bf16.mxu0 %v295_v55  ;;  %1180 = vmatprep.mubr.bf16.mxu1 %v295_v55  ;;  %v283_v5 = vld [vmem:[#allocation2] sm:$0xff]  ;;  %v5702_v12 = vld [vmem:[%s6784_s10 + $0x208] ss:$16 sps:$4 sm:$0xff]   ;;  %v5710_v15 = vld [vmem:[%s6784_s10 + $0x22c] ss:$16 sps:$4 sm:$0xff]  }
  0x9e   : > { %v5697_v6 = vld [vmem:[%s6784_s10 + $0x1e0] ss:$16 sps:$4 sm:$0xff]   ;;  %v5701_v8 = vld [vmem:[%s6784_s10 + $0x204] ss:$16 sps:$4 sm:$0xff]   ;;  %v290_v9 = vsel %vm6846_vm0, %v279_v4, %v283_v5  ;;  %v5708_v17 = vld [vmem:[%s6784_s10 + $0x228] ss:$16 sps:$4 sm:$0xff]  }
  0x9f   : > { %1079 = vmatpush1.bf16.msra.mxu0 %v5643_v26  ;;  %1161 = vmatpush1.bf16.msra.mxu1 %v5644_v27  ;;  %v5699_v11 = vld [vmem:[%s6784_s10 + $0x200] ss:$16 sps:$4 sm:$0xff]   ;;  %v294_v13 = vpack.c.bf16 %v290_v9, %v290_v9  ;;  %v5707_v14 = vld [vmem:[%s6784_s10 + $0x224] ss:$16 sps:$4 sm:$0xff]   ;;  %v5716_v19 = vld [vmem:[%s6784_s10 + $0x24c] ss:$16 sps:$4 sm:$0xff]  }
  0xa0   : > { %1080 = vmatprep.subr.bf16.mxu0 %v5645_v28  ;;  %1162 = vmatprep.subr.bf16.mxu1 %v5647_v29  ;;  %v5705_v16 = vld [vmem:[%s6784_s10 + $0x220] ss:$16 sps:$4 sm:$0xff]   ;;  %v5713_v18 = vld [vmem:[%s6784_s10 + $0x244] ss:$16 sps:$4 sm:$0xff]   ;;  %v5714_v21 = vld [vmem:[%s6784_s10 + $0x248] ss:$16 sps:$4 sm:$0xff]  }
  0xa1   : > { %v5711_v20 = vld [vmem:[%s6784_s10 + $0x240] ss:$16 sps:$4 sm:$0xff]   ;;  %v5719_v22 = vld [vmem:[%s6784_s10 + $0x264] ss:$16 sps:$4 sm:$0xff]   ;;  %v5722_v23 = vld [vmem:[%s6784_s10 + $0x26c] ss:$16 sps:$4 sm:$0xff]  }
  0xa2   : > { %v5717_v24 = vld [vmem:[%s6784_s10 + $0x260] ss:$16 sps:$4 sm:$0xff]   ;;  %v5720_v25 = vld [vmem:[%s6784_s10 + $0x268] ss:$16 sps:$4 sm:$0xff]   ;;  %v5725_v26 = vld [vmem:[%s6784_s10 + $0x284] ss:$16 sps:$4 sm:$0xff]  }
  0xa3   : > { %1081 = vmatpush1.bf16.msra.mxu0 %v5649_v30  ;;  %1163 = vmatpush1.bf16.msra.mxu1 %v5650_v31  ;;  %v5728_v27 = vld [vmem:[%s6784_s10 + $0x28c] ss:$16 sps:$4 sm:$0xff]   ;;  %v5723_v28 = vld [vmem:[%s6784_s10 + $0x280] ss:$16 sps:$4 sm:$0xff]   ;;  %v5726_v29 = vld [vmem:[%s6784_s10 + $0x288] ss:$16 sps:$4 sm:$0xff]  }
  0xa4   : > { %1082 = vmatprep.subr.bf16.mxu0 %v5651_v32  ;;  %1164 = vmatprep.subr.bf16.mxu1 %v5653_v33  ;;  %v5731_v30 = vld [vmem:[%s6784_s10 + $0x2a4] ss:$16 sps:$4 sm:$0xff]   ;;  %v5734_v31 = vld [vmem:[%s6784_s10 + $0x2ac] ss:$16 sps:$4 sm:$0xff]   ;;  %v5729_v32 = vld [vmem:[%s6784_s10 + $0x2a0] ss:$16 sps:$4 sm:$0xff]  }
  0xa5   : > { %v5732_v33 = vld [vmem:[%s6784_s10 + $0x2a8] ss:$16 sps:$4 sm:$0xff]   ;;  %v5746_v42 = vld [vmem:[%s6784_s10 + $0x2ec] ss:$16 sps:$4 sm:$0xff]   ;;  %v5747_v49 = vld [vmem:[%s6784_s10 + $0x300] ss:$16 sps:$4 sm:$0xff]  }
  0xa6   : > { %v5752_v48 = vld [vmem:[%s6784_s10 + $0x30c] ss:$16 sps:$4 sm:$0xff]   ;;  %v5761_v55 = vld [vmem:[%s6784_s10 + $0x344] ss:$16 sps:$4 sm:$0xff]   ;;  %v5777_v5 = vld [vmem:[%s6784_s10 + $0x3a0] ss:$16 sps:$4 sm:$0xff]  }
  0xa7   : > { %1083 = vmatpush1.bf16.msra.mxu0 %v5655_v34  ;;  %1165 = vmatpush1.bf16.msra.mxu1 %v5656_v35  ;;  %v5737_v34 = vld [vmem:[%s6784_s10 + $0x2c4] ss:$16 sps:$4 sm:$0xff]   ;;  %v5740_v35 = vld [vmem:[%s6784_s10 + $0x2cc] ss:$16 sps:$4 sm:$0xff]   ;;  %v5783_v9 = vld [vmem:[%s6784_s10 + $0x3c0] ss:$16 sps:$4 sm:$0xff]  }
  0xa8   : > { %1084 = vmatprep.subr.bf16.mxu0 %v5657_v36  ;;  %1166 = vmatprep.subr.bf16.mxu1 %v5659_v37  ;;  %v282_v36 = vld [vmem:[#allocation4 + $0x18] sm:$0xff]  ;;  %v5735_v37 = vld [vmem:[%s6784_s10 + $0x2c0] ss:$16 sps:$4 sm:$0xff]   ;;  %v5809_v47 = vld [vmem:[%s6784_s10 + $0x444] ss:$16 sps:$4 sm:$0xff]  }
  0xa9   : > { %v5758_v52 = vld [vmem:[%s6784_s10 + $0x32c] ss:$16 sps:$4 sm:$0xff]  }
  0xaa   : > { %v5782_v4 = vld [vmem:[%s6784_s10 + $0x3ac] ss:$16 sps:$4 sm:$0xff]  }
  0xab   : > { %1085 = vmatpush1.bf16.msra.mxu0 %v5661_v38  ;;  %1167 = vmatpush1.bf16.msra.mxu1 %v5662_v39  ;;  %v5738_v38 = vld [vmem:[%s6784_s10 + $0x2c8] ss:$16 sps:$4 sm:$0xff]  }
  0xac   : > { %1086 = vmatprep.subr.bf16.mxu0 %v5663_v40  ;;  %1168 = vmatprep.subr.bf16.mxu1 %v5665_v41  ;;  %v286_v39 = vld [vmem:[#allocation2 + $0x18] sm:$0xff]  ;;  %v5743_v40 = vld [vmem:[%s6784_s10 + $0x2e4] ss:$16 sps:$4 sm:$0xff]  }
  0xad   : > { %v293_v41 = vsel %vm6846_vm0, %v282_v36, %v286_v39  ;;  %v5819_v36 = vld [vmem:[%s6784_s10 + $0x480] ss:$16 sps:$4 sm:$0xff]   ;;  %v5830_v39 = vld [vmem:[%s6784_s10 + $0x4ac] ss:$16 sps:$4 sm:$0xff]  }
  0xaf   : > { %1087 = vmatpush1.bf16.msra.mxu0 %v5667_v43  ;;  %1169 = vmatpush1.bf16.msra.mxu1 %v5668_v44  ;;  %v297_v43 = vpack.c.bf16 %v293_v41, %v293_v41  ;;  %v5741_v44 = vld [vmem:[%s6784_s10 + $0x2e0] ss:$16 sps:$4 sm:$0xff]   ;;  %v5828_v41 = vld [vmem:[%s6784_s10 + $0x4a8] ss:$16 sps:$4 sm:$0xff]  }
  0xb0   : > { %1088 = vmatprep.subr.bf16.mxu0 %v5669_v45  ;;  %1170 = vmatprep.subr.bf16.mxu1 %v5671_v46  ;;  %v5744_v45 = vld [vmem:[%s6784_s10 + $0x2e8] ss:$16 sps:$4 sm:$0xff]   ;;  %v5749_v46 = vld [vmem:[%s6784_s10 + $0x304] ss:$16 sps:$4 sm:$0xff]  }
  0xb3   : > { %1089 = vmatpush1.bf16.msra.mxu0 %v5673_v50  ;;  %1171 = vmatpush1.bf16.msra.mxu1 %v5674_v51  ;;  %v5750_v50 = vld [vmem:[%s6784_s10 + $0x308] ss:$16 sps:$4 sm:$0xff]   ;;  %v5755_v51 = vld [vmem:[%s6784_s10 + $0x324] ss:$16 sps:$4 sm:$0xff]  }
  0xb4   : > { %1090 = vmatprep.subr.bf16.mxu0 %v5675_v53  ;;  %1172 = vmatprep.subr.bf16.mxu1 %v5677_v54  ;;  %v5753_v53 = vld [vmem:[%s6784_s10 + $0x320] ss:$16 sps:$4 sm:$0xff]   ;;  %v5756_v54 = vld [vmem:[%s6784_s10 + $0x328] ss:$16 sps:$4 sm:$0xff]  }
  0xb7   : > { %1091 = vmatpush1.bf16.msra.mxu0 %v5679_v56  ;;  %1173 = vmatpush1.bf16.msra.mxu1 %v5680_v57  ;;  %v5764_v56 = vld [vmem:[%s6784_s10 + $0x34c] ss:$16 sps:$4 sm:$0xff]   ;;  %v5759_v57 = vld [vmem:[%s6784_s10 + $0x340] ss:$16 sps:$4 sm:$0xff]  }
  0xb8   : > { %1092 = vmatprep.subr.bf16.mxu0 %v5681_v58  ;;  %1174 = vmatprep.subr.bf16.mxu1 %v5683_v59  ;;  %v5762_v58 = vld [vmem:[%s6784_s10 + $0x348] ss:$16 sps:$4 sm:$0xff]   ;;  %v5767_v59 = vld [vmem:[%s6784_s10 + $0x364] ss:$16 sps:$4 sm:$0xff]  }
  0xbb   : > { %1093 = vmatpush1.bf16.msra.mxu0 %v5685_v60  ;;  %1175 = vmatpush1.bf16.msra.mxu1 %v5686_v61  ;;  %v5770_v60 = vld [vmem:[%s6784_s10 + $0x36c] ss:$16 sps:$4 sm:$0xff]   ;;  %v5765_v61 = vld [vmem:[%s6784_s10 + $0x360] ss:$16 sps:$4 sm:$0xff]  }
  0xbc   : > { %1094 = vmatprep.subr.bf16.mxu0 %v5687_v62  ;;  %1176 = vmatprep.subr.bf16.mxu1 %v5689_v63  ;;  %v5768_v62 = vld [vmem:[%s6784_s10 + $0x368] ss:$16 sps:$4 sm:$0xff]   ;;  %v5773_v63 = vld [vmem:[%s6784_s10 + $0x384] ss:$16 sps:$4 sm:$0xff]  }
  0xbf   : > { %1095 = vmatpush1.bf16.msra.mxu0 %v5691_v0  ;;  %1177 = vmatpush1.bf16.msra.mxu1 %v5692_v1  ;;  %v5776_v0 = vld [vmem:[%s6784_s10 + $0x38c] ss:$16 sps:$4 sm:$0xff]   ;;  %v5771_v1 = vld [vmem:[%s6784_s10 + $0x380] ss:$16 sps:$4 sm:$0xff]  }
  0xc0   : > { %1096 = vmatprep.subr.bf16.mxu0 %v5693_v2  ;;  %1178 = vmatprep.subr.bf16.mxu1 %v5695_v3  ;;  %v5774_v2 = vld [vmem:[%s6784_s10 + $0x388] ss:$16 sps:$4 sm:$0xff]   ;;  %v5779_v3 = vld [vmem:[%s6784_s10 + $0x3a4] ss:$16 sps:$4 sm:$0xff]  }
  0xc3   : > { %1097 = vmatpush1.bf16.msra.mxu0 %v5697_v6  ;;  %1179 = vmatpush1.bf16.msra.mxu1 %v5698_v7  ;;  %v5780_v6 = vld [vmem:[%s6784_s10 + $0x3a8] ss:$16 sps:$4 sm:$0xff]   ;;  %v5785_v7 = vld [vmem:[%s6784_s10 + $0x3c4] ss:$16 sps:$4 sm:$0xff]  }
  0xc4   : > { %1107 = vmatprep.subr.bf16.mxu0 %v5701_v8  ;;  %1189 = vmatprep.subr.bf16.mxu1 %v5704_v10  ;;  %v5788_v8 = vld [vmem:[%s6784_s10 + $0x3cc] ss:$16 sps:$4 sm:$0xff]   ;;  %v5786_v10 = vld [vmem:[%s6784_s10 + $0x3c8] ss:$16 sps:$4 sm:$0xff]  }
  0xc6   : > { %1099 = vmatmul.mubr.bf16.vlgmr.msra.gmra.mrb[0].mxu0 %v294_v13  ;;  %1181 = vmatmul.mubr.bf16.vlgmr.msra.gmra.mrb[0].mxu1 %v294_v13  ;;  %v281_v13 = vld [vmem:[#allocation4 + $0x10] sm:$0xff] }
  0xc7   : > { %1108 = vmatpush1.bf16.msra.mxu0 %v5699_v11  ;;  %1190 = vmatpush1.bf16.msra.mxu1 %v5702_v12  ;;  %v5791_v11 = vld [vmem:[%s6784_s10 + $0x3e4] ss:$16 sps:$4 sm:$0xff]   ;;  %v5794_v12 = vld [vmem:[%s6784_s10 + $0x3ec] ss:$16 sps:$4 sm:$0xff]  }
  0xc8   : > { %1109 = vmatprep.subr.bf16.mxu0 %v5707_v14  ;;  %1191 = vmatprep.subr.bf16.mxu1 %v5710_v15  ;;  %v285_v14 = vld [vmem:[#allocation2 + $0x10] sm:$0xff] }
  0xc9   : > { %1139 = vmatprep.mubr.bf16.mxu0 %v297_v43  ;;  %1221 = vmatprep.mubr.bf16.mxu1 %v297_v43  ;;  %v5789_v15 = vld [vmem:[%s6784_s10 + $0x3e0] ss:$16 sps:$4 sm:$0xff]   ;;  %v5836_v43 = vld [vmem:[%s6784_s10 + $0x4cc] ss:$16 sps:$4 sm:$0xff]  }
  0xcb   : > { %1110 = vmatpush1.bf16.msra.mxu0 %v5705_v16  ;;  %1192 = vmatpush1.bf16.msra.mxu1 %v5708_v17  ;;  %v5792_v16 = vld [vmem:[%s6784_s10 + $0x3e8] ss:$16 sps:$4 sm:$0xff]   ;;  %v5797_v17 = vld [vmem:[%s6784_s10 + $0x404] ss:$16 sps:$4 sm:$0xff]  }
  0xcc   : > { %1111 = vmatprep.subr.bf16.mxu0 %v5713_v18  ;;  %1193 = vmatprep.subr.bf16.mxu1 %v5716_v19  ;;  %v5800_v18 = vld [vmem:[%s6784_s10 + $0x40c] ss:$16 sps:$4 sm:$0xff]   ;;  %v292_v19 = vsel %vm6846_vm0, %v281_v13, %v285_v14  ;;  %v5879_v13 = vld [vmem:[%s6784_s10 + $0x5c0] ss:$16 sps:$4 sm:$0xff]   ;;  %v5882_v14 = vld [vmem:[%s6784_s10 + $0x5c8] ss:$16 sps:$4 sm:$0xff]  }
  0xcf   : > { %1112 = vmatpush1.bf16.msra.mxu0 %v5711_v20  ;;  %1194 = vmatpush1.bf16.msra.mxu1 %v5714_v21  ;;  %v5795_v20 = vld [vmem:[%s6784_s10 + $0x400] ss:$16 sps:$4 sm:$0xff]   ;;  %v5798_v21 = vld [vmem:[%s6784_s10 + $0x408] ss:$16 sps:$4 sm:$0xff]  }
  0xd0   : > { %1113 = vmatprep.subr.bf16.mxu0 %v5719_v22  ;;  %1195 = vmatprep.subr.bf16.mxu1 %v5722_v23  ;;  %v296_v22 = vpack.c.bf16 %v292_v19, %v292_v19  ;;  %v5803_v23 = vld [vmem:[%s6784_s10 + $0x424] ss:$16 sps:$4 sm:$0xff]  }
  0xd1   : > { %v5893_v19 = vld [vmem:[%s6784_s10 + $0x604] ss:$16 sps:$4 sm:$0xff]  }
  0xd3   : > { %1114 = vmatpush1.bf16.msra.mxu0 %v5717_v24  ;;  %1196 = vmatpush1.bf16.msra.mxu1 %v5720_v25  ;;  %v5806_v24 = vld [vmem:[%s6784_s10 + $0x42c] ss:$16 sps:$4 sm:$0xff]   ;;  %v5801_v25 = vld [vmem:[%s6784_s10 + $0x420] ss:$16 sps:$4 sm:$0xff]  }
  0xd4   : > { %1115 = vmatprep.subr.bf16.mxu0 %v5725_v26  ;;  %1197 = vmatprep.subr.bf16.mxu1 %v5728_v27  ;;  %v5804_v26 = vld [vmem:[%s6784_s10 + $0x428] ss:$16 sps:$4 sm:$0xff]   ;;  %v5812_v27 = vld [vmem:[%s6784_s10 + $0x44c] ss:$16 sps:$4 sm:$0xff]  }
  0xd7   : > { %1116 = vmatpush1.bf16.msra.mxu0 %v5723_v28  ;;  %1198 = vmatpush1.bf16.msra.mxu1 %v5726_v29  ;;  %v5807_v28 = vld [vmem:[%s6784_s10 + $0x440] ss:$16 sps:$4 sm:$0xff]   ;;  %v5810_v29 = vld [vmem:[%s6784_s10 + $0x448] ss:$16 sps:$4 sm:$0xff]  }
  0xd8   : > { %1117 = vmatprep.subr.bf16.mxu0 %v5731_v30  ;;  %1199 = vmatprep.subr.bf16.mxu1 %v5734_v31  ;;  %v5815_v30 = vld [vmem:[%s6784_s10 + $0x464] ss:$16 sps:$4 sm:$0xff]   ;;  %v5818_v31 = vld [vmem:[%s6784_s10 + $0x46c] ss:$16 sps:$4 sm:$0xff]  }
  0xdb   : > { %1118 = vmatpush1.bf16.msra.mxu0 %v5729_v32  ;;  %1200 = vmatpush1.bf16.msra.mxu1 %v5732_v33  ;;  %v5813_v32 = vld [vmem:[%s6784_s10 + $0x460] ss:$16 sps:$4 sm:$0xff]   ;;  %v5816_v33 = vld [vmem:[%s6784_s10 + $0x468] ss:$16 sps:$4 sm:$0xff]  }
  0xdc   : > { %1119 = vmatprep.subr.bf16.mxu0 %v5737_v34  ;;  %1201 = vmatprep.subr.bf16.mxu1 %v5740_v35  ;;  %v5821_v34 = vld [vmem:[%s6784_s10 + $0x484] ss:$16 sps:$4 sm:$0xff]   ;;  %v5824_v35 = vld [vmem:[%s6784_s10 + $0x48c] ss:$16 sps:$4 sm:$0xff]  }
  0xdf   : > { %1120 = vmatpush1.bf16.msra.mxu0 %v5735_v37  ;;  %1202 = vmatpush1.bf16.msra.mxu1 %v5738_v38  ;;  %v5822_v37 = vld [vmem:[%s6784_s10 + $0x488] ss:$16 sps:$4 sm:$0xff]   ;;  %v5827_v38 = vld [vmem:[%s6784_s10 + $0x4a4] ss:$16 sps:$4 sm:$0xff]  }
  0xe0   : > { %1121 = vmatprep.subr.bf16.mxu0 %v5743_v40  ;;  %1203 = vmatprep.subr.bf16.mxu1 %v5746_v42  ;;  %v5825_v40 = vld [vmem:[%s6784_s10 + $0x4a0] ss:$16 sps:$4 sm:$0xff]   ;;  %v5833_v42 = vld [vmem:[%s6784_s10 + $0x4c4] ss:$16 sps:$4 sm:$0xff]  }
  0xe3   : > { %1122 = vmatpush1.bf16.msra.mxu0 %v5741_v44  ;;  %1204 = vmatpush1.bf16.msra.mxu1 %v5744_v45  ;;  %v5831_v44 = vld [vmem:[%s6784_s10 + $0x4c0] ss:$16 sps:$4 sm:$0xff]   ;;  %v5834_v45 = vld [vmem:[%s6784_s10 + $0x4c8] ss:$16 sps:$4 sm:$0xff]  }
  0xe4   : > { %1123 = vmatprep.subr.bf16.mxu0 %v5749_v46  ;;  %1205 = vmatprep.subr.bf16.mxu1 %v5752_v48  ;;  %v5839_v46 = vld [vmem:[%s6784_s10 + $0x4e4] ss:$16 sps:$4 sm:$0xff]   ;;  %v5842_v48 = vld [vmem:[%s6784_s10 + $0x4ec] ss:$16 sps:$4 sm:$0xff]  }
  0xe7   : > { %1124 = vmatpush1.bf16.msra.mxu0 %v5747_v49  ;;  %1206 = vmatpush1.bf16.msra.mxu1 %v5750_v50  ;;  %v5837_v49 = vld [vmem:[%s6784_s10 + $0x4e0] ss:$16 sps:$4 sm:$0xff]   ;;  %v5840_v50 = vld [vmem:[%s6784_s10 + $0x4e8] ss:$16 sps:$4 sm:$0xff]  }
  0xe8   : > { %1125 = vmatprep.subr.bf16.mxu0 %v5755_v51  ;;  %1207 = vmatprep.subr.bf16.mxu1 %v5758_v52  ;;  %v5845_v51 = vld [vmem:[%s6784_s10 + $0x504] ss:$16 sps:$4 sm:$0xff]   ;;  %v5848_v52 = vld [vmem:[%s6784_s10 + $0x50c] ss:$16 sps:$4 sm:$0xff]  }
  0xeb   : > { %1126 = vmatpush1.bf16.msra.mxu0 %v5753_v53  ;;  %1208 = vmatpush1.bf16.msra.mxu1 %v5756_v54  ;;  %v5843_v53 = vld [vmem:[%s6784_s10 + $0x500] ss:$16 sps:$4 sm:$0xff]   ;;  %v5846_v54 = vld [vmem:[%s6784_s10 + $0x508] ss:$16 sps:$4 sm:$0xff]  }
  0xec   : > { %1127 = vmatprep.subr.bf16.mxu0 %v5761_v55  ;;  %1209 = vmatprep.subr.bf16.mxu1 %v5764_v56  ;;  %v5851_v55 = vld [vmem:[%s6784_s10 + $0x524] ss:$16 sps:$4 sm:$0xff]   ;;  %v5854_v56 = vld [vmem:[%s6784_s10 + $0x52c] ss:$16 sps:$4 sm:$0xff]  }
  0xef   : > { %1128 = vmatpush1.bf16.msra.mxu0 %v5759_v57  ;;  %1210 = vmatpush1.bf16.msra.mxu1 %v5762_v58  ;;  %v5849_v57 = vld [vmem:[%s6784_s10 + $0x520] ss:$16 sps:$4 sm:$0xff]   ;;  %v5852_v58 = vld [vmem:[%s6784_s10 + $0x528] ss:$16 sps:$4 sm:$0xff]  }
  0xf0   : > { %1129 = vmatprep.subr.bf16.mxu0 %v5767_v59  ;;  %1211 = vmatprep.subr.bf16.mxu1 %v5770_v60  ;;  %v5857_v59 = vld [vmem:[%s6784_s10 + $0x544] ss:$16 sps:$4 sm:$0xff]   ;;  %v5860_v60 = vld [vmem:[%s6784_s10 + $0x54c] ss:$16 sps:$4 sm:$0xff]  }
  0xf3   : > { %1130 = vmatpush1.bf16.msra.mxu0 %v5765_v61  ;;  %1212 = vmatpush1.bf16.msra.mxu1 %v5768_v62  ;;  %v5855_v61 = vld [vmem:[%s6784_s10 + $0x540] ss:$16 sps:$4 sm:$0xff]   ;;  %v5858_v62 = vld [vmem:[%s6784_s10 + $0x548] ss:$16 sps:$4 sm:$0xff]  }
  0xf4   : > { %1131 = vmatprep.subr.bf16.mxu0 %v5773_v63  ;;  %1213 = vmatprep.subr.bf16.mxu1 %v5776_v0  ;;  %v5863_v63 = vld [vmem:[%s6784_s10 + $0x564] ss:$16 sps:$4 sm:$0xff]   ;;  %v5866_v0 = vld [vmem:[%s6784_s10 + $0x56c] ss:$16 sps:$4 sm:$0xff]  }
  0xf7   : > { %1132 = vmatpush1.bf16.msra.mxu0 %v5771_v1  ;;  %1214 = vmatpush1.bf16.msra.mxu1 %v5774_v2  ;;  %v5861_v1 = vld [vmem:[%s6784_s10 + $0x560] ss:$16 sps:$4 sm:$0xff]   ;;  %v5864_v2 = vld [vmem:[%s6784_s10 + $0x568] ss:$16 sps:$4 sm:$0xff]  }
  0xf8   : > { %1133 = vmatprep.subr.bf16.mxu0 %v5779_v3  ;;  %1215 = vmatprep.subr.bf16.mxu1 %v5782_v4  ;;  %v5869_v3 = vld [vmem:[%s6784_s10 + $0x584] ss:$16 sps:$4 sm:$0xff]   ;;  %v5872_v4 = vld [vmem:[%s6784_s10 + $0x58c] ss:$16 sps:$4 sm:$0xff]  }
  0xfb   : > { %1134 = vmatpush1.bf16.msra.mxu0 %v5777_v5  ;;  %1216 = vmatpush1.bf16.msra.mxu1 %v5780_v6  ;;  %v5867_v5 = vld [vmem:[%s6784_s10 + $0x580] ss:$16 sps:$4 sm:$0xff]   ;;  %v5870_v6 = vld [vmem:[%s6784_s10 + $0x588] ss:$16 sps:$4 sm:$0xff]  }
  0xfc   : > { %1135 = vmatprep.subr.bf16.mxu0 %v5785_v7  ;;  %1217 = vmatprep.subr.bf16.mxu1 %v5788_v8  ;;  %v5875_v7 = vld [vmem:[%s6784_s10 + $0x5a4] ss:$16 sps:$4 sm:$0xff]   ;;  %v5873_v8 = vld [vmem:[%s6784_s10 + $0x5a0] ss:$16 sps:$4 sm:$0xff]  }
  0xff   : > { %1136 = vmatpush1.bf16.msra.mxu0 %v5783_v9  ;;  %1218 = vmatpush1.bf16.msra.mxu1 %v5786_v10  ;;  %v5876_v9 = vld [vmem:[%s6784_s10 + $0x5a8] ss:$16 sps:$4 sm:$0xff]   ;;  %v5878_v10 = vld [vmem:[%s6784_s10 + $0x5ac] ss:$16 sps:$4 sm:$0xff]  }
 0x100   : > { %1137 = vmatprep.subr.bf16.mxu0 %v5791_v11  ;;  %1219 = vmatprep.subr.bf16.mxu1 %v5794_v12  ;;  %v5881_v11 = vld [vmem:[%s6784_s10 + $0x5c4] ss:$16 sps:$4 sm:$0xff]   ;;  %v5884_v12 = vld [vmem:[%s6784_s10 + $0x5cc] ss:$16 sps:$4 sm:$0xff]  }
 0x103   : > { %1138 = vmatpush1.bf16.msra.mxu0 %v5789_v15  ;;  %1220 = vmatpush1.bf16.msra.mxu1 %v5792_v16  ;;  %v5887_v15 = vld [vmem:[%s6784_s10 + $0x5e4] ss:$16 sps:$4 sm:$0xff]   ;;  %v5885_v16 = vld [vmem:[%s6784_s10 + $0x5e0] ss:$16 sps:$4 sm:$0xff]  }
 0x104   : > { %2127 = vmatprep.subr.bf16.mxu0 %v5797_v17  ;;  %2209 = vmatprep.subr.bf16.mxu1 %v5800_v18  ;;  %v5890_v17 = vld [vmem:[%s6784_s10 + $0x5ec] ss:$16 sps:$4 sm:$0xff]   ;;  %v5888_v18 = vld [vmem:[%s6784_s10 + $0x5e8] ss:$16 sps:$4 sm:$0xff]  }
 0x106   : > { %1140 = vmatmul.mubr.bf16.vlgmr.msra.gmra.mrb[0].mxu0 %v296_v22  ;;  %1222 = vmatmul.mubr.bf16.vlgmr.msra.gmra.mrb[0].mxu1 %v296_v22 }
 0x107   : > { %2128 = vmatpush1.bf16.msra.mxu0 %v5795_v20  ;;  %2210 = vmatpush1.bf16.msra.mxu1 %v5798_v21  ;;  %v5896_v20 = vld [vmem:[%s6784_s10 + $0x60c] ss:$16 sps:$4 sm:$0xff]  }
 0x108   : > { %2129 = vmatprep.subr.bf16.mxu0 %v5803_v23  ;;  %2211 = vmatprep.subr.bf16.mxu1 %v5806_v24 }
 0x10b   : > { %2130 = vmatpush1.bf16.msra.mxu0 %v5801_v25  ;;  %2212 = vmatpush1.bf16.msra.mxu1 %v5804_v26 }
 0x10c   : > { %2131 = vmatprep.subr.bf16.mxu0 %v5809_v47  ;;  %2213 = vmatprep.subr.bf16.mxu1 %v5812_v27 }
 0x10f   : > { %2132 = vmatpush1.bf16.msra.mxu0 %v5807_v28  ;;  %2214 = vmatpush1.bf16.msra.mxu1 %v5810_v29 }
 0x110   : > { %2133 = vmatprep.subr.bf16.mxu0 %v5815_v30  ;;  %2215 = vmatprep.subr.bf16.mxu1 %v5818_v31 }
 0x113   : > { %2134 = vmatpush1.bf16.msra.mxu0 %v5813_v32  ;;  %2216 = vmatpush1.bf16.msra.mxu1 %v5816_v33 }
 0x114   : > { %2135 = vmatprep.subr.bf16.mxu0 %v5821_v34  ;;  %2217 = vmatprep.subr.bf16.mxu1 %v5824_v35 }
 0x117   : > { %2136 = vmatpush1.bf16.msra.mxu0 %v5819_v36  ;;  %2218 = vmatpush1.bf16.msra.mxu1 %v5822_v37 }
 0x118   : > { %2137 = vmatprep.subr.bf16.mxu0 %v5827_v38  ;;  %2219 = vmatprep.subr.bf16.mxu1 %v5830_v39 }
 0x11b   : > { %2138 = vmatpush1.bf16.msra.mxu0 %v5825_v40  ;;  %2220 = vmatpush1.bf16.msra.mxu1 %v5828_v41 }
 0x11c   : > { %2139 = vmatprep.subr.bf16.mxu0 %v5833_v42  ;;  %2221 = vmatprep.subr.bf16.mxu1 %v5836_v43 }
 0x11f   : > { %2140 = vmatpush1.bf16.msra.mxu0 %v5831_v44  ;;  %2222 = vmatpush1.bf16.msra.mxu1 %v5834_v45 }
 0x120   : > { %2141 = vmatprep.subr.bf16.mxu0 %v5839_v46  ;;  %2223 = vmatprep.subr.bf16.mxu1 %v5842_v48 }
 0x123   : > { %2142 = vmatpush1.bf16.msra.mxu0 %v5837_v49  ;;  %2224 = vmatpush1.bf16.msra.mxu1 %v5840_v50 }
 0x124   : > { %2143 = vmatprep.subr.bf16.mxu0 %v5845_v51  ;;  %2225 = vmatprep.subr.bf16.mxu1 %v5848_v52 }
 0x127   : > { %2144 = vmatpush1.bf16.msra.mxu0 %v5843_v53  ;;  %2226 = vmatpush1.bf16.msra.mxu1 %v5846_v54 }
 0x128   : > { %2145 = vmatprep.subr.bf16.mxu0 %v5851_v55  ;;  %2227 = vmatprep.subr.bf16.mxu1 %v5854_v56 }
 0x12b   : > { %2146 = vmatpush1.bf16.msra.mxu0 %v5849_v57  ;;  %2228 = vmatpush1.bf16.msra.mxu1 %v5852_v58 }
 0x12c   : > { %2147 = vmatprep.subr.bf16.mxu0 %v5857_v59  ;;  %2229 = vmatprep.subr.bf16.mxu1 %v5860_v60 }
 0x12f   : > { %2148 = vmatpush1.bf16.msra.mxu0 %v5855_v61  ;;  %2230 = vmatpush1.bf16.msra.mxu1 %v5858_v62 }
 0x130   : > { %2149 = vmatprep.subr.bf16.mxu0 %v5863_v63  ;;  %2231 = vmatprep.subr.bf16.mxu1 %v5866_v0 }
 0x133   : > { %2150 = vmatpush1.bf16.msra.mxu0 %v5861_v1  ;;  %2232 = vmatpush1.bf16.msra.mxu1 %v5864_v2 }
 0x134   : > { %2151 = vmatprep.subr.bf16.mxu0 %v5869_v3  ;;  %2233 = vmatprep.subr.bf16.mxu1 %v5872_v4 }
 0x137   : > { %2152 = vmatpush1.bf16.msra.mxu0 %v5867_v5  ;;  %2234 = vmatpush1.bf16.msra.mxu1 %v5870_v6 }
 0x138   : > { %2153 = vmatprep.subr.bf16.mxu0 %v5875_v7  ;;  %2235 = vmatprep.subr.bf16.mxu1 %v5878_v10 }
 0x13b   : > { %2154 = vmatpush1.bf16.msra.mxu0 %v5873_v8  ;;  %2236 = vmatpush1.bf16.msra.mxu1 %v5876_v9 }
 0x13c   : > { %2155 = vmatprep.subr.bf16.mxu0 %v5881_v11  ;;  %2237 = vmatprep.subr.bf16.mxu1 %v5884_v12 }
 0x13f   : > { %2156 = vmatpush1.bf16.msra.mxu0 %v5879_v13  ;;  %2238 = vmatpush1.bf16.msra.mxu1 %v5882_v14 }
 0x140   : > { %2157 = vmatprep.subr.bf16.mxu0 %v5887_v15  ;;  %2239 = vmatprep.subr.bf16.mxu1 %v5890_v17 }
 0x143   : > { %2158 = vmatpush1.bf16.msra.mxu0 %v5885_v16  ;;  %2240 = vmatpush1.bf16.msra.mxu1 %v5888_v18 }
 0x144   : > { %2168 = vmatprep.subr.bf16.mxu0 %v5893_v19  ;;  %2250 = vmatprep.subr.bf16.mxu1 %v5896_v20  ;;  %v1310_v20 = vlaneseq }
 0x1d9   : > { %v1141_v21 = vpop.f32.mrb[0].mxu0  ;;  %v7006_v22 = vpop.f32.mrb[0].mxu1 }
 0x1da   : > { %v1234_v23 = vrot.slane %v1141_v21, 4  ;;  %v1143_v24 = vpop.f32.mrb[1].mxu0  ;;  %v1225_v25 = vpop.f32.mrb[1].mxu1  ;;  %v1246_v60 = vrot.slane %v7006_v22, 4 }
 0x1db   : > { %v1240_v26 = vrot.slane %v1143_v24, 4  ;;  %v1252_v47 = vrot.slane %v1225_v25, 4  ;;  %v1145_v27 = vpop.f32.mrb[2].mxu0  ;;  %v1227_v28 = vpop.f32.mrb[2].mxu1 }
 0x1dc   : > { %v1235_v29 = vadd.f32 %v1234_v23, %v1141_v21  ;;  %v1146_v30 = vpop.f32.mrb[3].mxu0  ;;  %v1228_v31 = vpop.f32.mrb[3].mxu1  ;;  %v1247_v3 = vadd.f32 %v1246_v60, %v7006_v22  ;;  %v7020_v23 = vshrl.u32 %v1310_v20, 7  ;;  %v1231_v28 = vld [vmem:[%s7022_s22 + $0x8] sm:$0xff]  ;;  %v5929_v20 = vld [vmem:[%s6784_s10 + $0x6c4] ss:$16 sps:$4 sm:$0xff]  }
 0x1dd   : > { %v1241_v32 = vadd.f32 %v1240_v26, %v1143_v24  ;;  %v1253_v33 = vadd.f32 %v1252_v47, %v1225_v25  ;;  %v1233_v31 = vld [vmem:[%s7022_s22 + $0x18] sm:$0xff] }
 0x1de   : > { %v1236_v34 = vrot.slane %v1235_v29, 2  ;;  %v1248_v10 = vrot.slane %v1247_v3, 2  ;;  %v7026_v26 = vsub.s32 1, %v7020_v23  ;;  %v7029_v47 = vsub.s32 2, %v7020_v23 }
 0x1df   : > { %v1242_v35 = vrot.slane %v1241_v32, 2  ;;  %v1254_v36 = vrot.slane %v1253_v33, 2 }
 0x1e0   : > { %v1237_v37 = vadd.f32 %v1236_v34, %v1235_v29  ;;  %v1249_v17 = vadd.f32 %v1248_v10, %v1247_v3  ;;  %v5903_v3 = vld [vmem:[%s6784_s10 + $0x640] ss:$16 sps:$4 sm:$0xff]   ;;  %v5917_v10 = vld [vmem:[%s6784_s10 + $0x684] ss:$16 sps:$4 sm:$0xff]  }
 0x1e1   : > { %v1243_v38 = vadd.f32 %v1242_v35, %v1241_v32  ;;  %v1255_v39 = vadd.f32 %v1254_v36, %v1253_v33 }
 0x1e2   : > { %v1238_v40 = vrot.slane %v1237_v37, 1 }
 0x1e3   : > { %v1244_v41 = vrot.slane %v1243_v38, 1  ;;  %v1256_v42 = vrot.slane %v1255_v39, 1 }
 0x1e4   : > { %v1239_v43 = vadd.f32 %v1238_v40, %v1237_v37 }
 0x1e5   : > { %v1245_v44 = vadd.f32 %v1244_v41, %v1243_v38  ;;  %v1257_v45 = vadd.f32 %v1256_v42, %v1255_v39  ;;  %v1337_v41 = vrot.slane %v1231_v28, %v7029_v47 }
 0x1e6   : > { %v1258_v46 = vmul.f32 0.125, %v1239_v43  ;;  %v1345_v43 = vrot.slane %v1233_v31, %v7029_v47 }
 0x1e7   : > { %v1259_v48 = vmul.f32 0.125, %v1245_v44  ;;  %v1261_v49 = vmul.f32 0.125, %v1257_v45 }
 0x1e8   : > { %v1262_v50 = vsub.f32 %v1141_v21, %v1258_v46  ;;  %v1250_v21 = vrot.slane %v1249_v17, 1 }
 0x1e9   : > { %v7008_v51 = vsub.f32 %v1143_v24, %v1259_v48  ;;  %v7010_v52 = vsub.f32 %v1225_v25, %v1261_v49  ;;  %v1230_v25 = vld [vmem:[%s7022_s22] sm:$0xff] }
 0x1ea   : > { %v1266_v53 = vmul.f32 %v1262_v50, %v1262_v50  ;;  %v1251_v24 = vadd.f32 %v1250_v21, %v1249_v17  ;;  %v1333_v35 = vrot.slane %v1230_v25, %v7029_v47  ;;  %v5932_v21 = vld [vmem:[%s6784_s10 + $0x6cc] ss:$16 sps:$4 sm:$0xff]  }
 0x1eb   : > { %v1267_v54 = vmul.f32 %v7008_v51, %v7008_v51  ;;  %v1269_v55 = vmul.f32 %v7010_v52, %v7010_v52 }
 0x1ec   : > { %v1270_v56 = vrot.slane %v1266_v53, 4  ;;  %v1260_v30 = vmul.f32 0.125, %v1251_v24 }
 0x1ed   : > { %v1276_v57 = vrot.slane %v1267_v54, 4  ;;  %v1288_v58 = vrot.slane %v1269_v55, 4 }
 0x1ee   : > { %v1271_v59 = vadd.f32 %v1270_v56, %v1266_v53  ;;  %v7036_v39 = vsub.f32 %v7006_v22, %v1260_v30 }
 0x1ef   : > { %v1277_v61 = vadd.f32 %v1276_v57, %v1267_v54  ;;  %v1289_v62 = vadd.f32 %v1288_v58, %v1269_v55  ;;  %v5891_v57 = vld [vmem:[%s6784_s10 + $0x600] ss:$16 sps:$4 sm:$0xff]   ;;  %v5894_v58 = vld [vmem:[%s6784_s10 + $0x608] ss:$16 sps:$4 sm:$0xff]  }
 0x1f0   : > { %v1272_v63 = vrot.slane %v1271_v59, 2  ;;  %v1268_v22 = vmul.f32 %v7036_v39, %v7036_v39 }
 0x1f1   : > { %v1278_v0 = vrot.slane %v1277_v61, 2  ;;  %v1290_v1 = vrot.slane %v1289_v62, 2 }
 0x1f2   : > { %v1273_v2 = vadd.f32 %v1272_v63, %v1271_v59  ;;  %v1282_v55 = vrot.slane %v1268_v22, 4  ;;  %v5900_v63 = vld [vmem:[%s6784_s10 + $0x628] ss:$16 sps:$4 sm:$0xff]  }
 0x1f3   : > { %v1279_v4 = vadd.f32 %v1278_v0, %v1277_v61  ;;  %v1291_v5 = vadd.f32 %v1290_v1, %v1289_v62  ;;  %v5897_v62 = vld [vmem:[%s6784_s10 + $0x620] ss:$16 sps:$4 sm:$0xff]   ;;  %v5905_v0 = vld [vmem:[%s6784_s10 + $0x644] ss:$16 sps:$4 sm:$0xff]   ;;  %v5908_v1 = vld [vmem:[%s6784_s10 + $0x64c] ss:$16 sps:$4 sm:$0xff]  }
 0x1f4   : > { %v1274_v6 = vrot.slane %v1273_v2, 1  ;;  %v1283_v61 = vadd.f32 %v1282_v55, %v1268_v22  ;;  %v5962_v22 = vld [vmem:[%s6784_s10 + $0x76c] ss:$16 sps:$4 sm:$0xff]   ;;  %v5965_v55 = vld [vmem:[%s6784_s10 + $0x784] ss:$16 sps:$4 sm:$0xff]  }
 0x1f5   : > { %v1280_v7 = vrot.slane %v1279_v4, 1  ;;  %v1292_v8 = vrot.slane %v1291_v5, 1 }
 0x1f6   : > { %v1275_v9 = vadd.f32 %v1274_v6, %v1273_v2  ;;  %v1284_v2 = vrot.slane %v1283_v61, 2  ;;  %v5914_v6 = vld [vmem:[%s6784_s10 + $0x66c] ss:$16 sps:$4 sm:$0xff]  }
 0x1f7   : > { %v1281_v11 = vadd.f32 %v1280_v7, %v1279_v4  ;;  %v1293_v12 = vadd.f32 %v1292_v8, %v1291_v5  ;;  %v5906_v4 = vld [vmem:[%s6784_s10 + $0x648] ss:$16 sps:$4 sm:$0xff]   ;;  %v5911_v5 = vld [vmem:[%s6784_s10 + $0x664] ss:$16 sps:$4 sm:$0xff]   ;;  %v5909_v8 = vld [vmem:[%s6784_s10 + $0x660] ss:$16 sps:$4 sm:$0xff]  }
 0x1f8   : > { %v1294_v13 = vmul.f32 0.125, %v1275_v9  ;;  %v1285_v7 = vadd.f32 %v1284_v2, %v1283_v61  ;;  %v5912_v9 = vld [vmem:[%s6784_s10 + $0x668] ss:$16 sps:$4 sm:$0xff]   ;;  %v5975_v2 = vld [vmem:[%s6784_s10 + $0x7c0] ss:$16 sps:$4 sm:$0xff]  }
 0x1f9   : > { %v1295_v14 = vmul.f32 0.125, %v1281_v11  ;;  %v1297_v15 = vmul.f32 0.125, %v1293_v12  ;;  %v5920_v11 = vld [vmem:[%s6784_s10 + $0x68c] ss:$16 sps:$4 sm:$0xff]   ;;  %v5972_v61 = vld [vmem:[%s6784_s10 + $0x7a8] ss:$16 sps:$4 sm:$0xff]  }
 0x1fa   : > { %v1298_v16 = vadd.f32 1e-05, %v1294_v13  ;;  %v1286_v12 = vrot.slane %v1285_v7, 1  ;;  %v5915_v13 = vld [vmem:[%s6784_s10 + $0x680] ss:$16 sps:$4 sm:$0xff]  }
 0x1fb   : > { %v1299_v18 = vadd.f32 1e-05, %v1295_v14  ;;  %v1301_v19 = vadd.f32 1e-05, %v1297_v15  ;;  %v5918_v14 = vld [vmem:[%s6784_s10 + $0x688] ss:$16 sps:$4 sm:$0xff]  }
 0x1fc   : > { %6371 = vrsqrt.f32 %v1298_v16  ;;  %v5923_v15 = vld [vmem:[%s6784_s10 + $0x6a4] ss:$16 sps:$4 sm:$0xff]   ;;  %v5926_v16 = vld [vmem:[%s6784_s10 + $0x6ac] ss:$16 sps:$4 sm:$0xff]   ;;  %v1287_v17 = vadd.f32 %v1286_v12, %v1285_v7  ;;  %v5984_v7 = vld [vmem:[%s6784_s10 + $0x7e8] ss:$16 sps:$4 sm:$0xff]  }
 0x1fd   : > { %6373 = vrsqrt.f32 %v1299_v18  ;;  %v5921_v18 = vld [vmem:[%s6784_s10 + $0x6a0] ss:$16 sps:$4 sm:$0xff]   ;;  %v5990_v12 = vld [vmem:[%s6784_s10 + $0x808] ss:$16 sps:$4 sm:$0xff]  }
 0x1fe   : > { %6375 = vrsqrt.f32 %v1301_v19  ;;  %v5924_v19 = vld [vmem:[%s6784_s10 + $0x6a8] ss:$16 sps:$4 sm:$0xff]   ;;  %v1296_v24 = vmul.f32 0.125, %v1287_v17 }
 0x1ff   : > { %v5996_v17 = vld [vmem:[%s6784_s10 + $0x828] ss:$16 sps:$4 sm:$0xff]  }
 0x200   : > { %v1300_v30 = vadd.f32 1e-05, %v1296_v24  ;;  %v6007_v24 = vld [vmem:[%s6784_s10 + $0x864] ss:$16 sps:$4 sm:$0xff]  }
 0x202   : > { %6377 = vrsqrt.f32 %v1300_v30  ;;  %v6016_v30 = vld [vmem:[%s6784_s10 + $0x88c] ss:$16 sps:$4 sm:$0xff]  }
 0x206   : > { %v6372_v27 = vpop.eup %6371 }
 0x207   : > { %v1306_v29 = vmul.f32 %v6372_v27, %v1230_v25  ;;  %v6374_v32 = vpop.eup %6373  ;;  %v5927_v25 = vld [vmem:[%s6784_s10 + $0x6c0] ss:$16 sps:$4 sm:$0xff]   ;;  %v5930_v27 = vld [vmem:[%s6784_s10 + $0x6c8] ss:$16 sps:$4 sm:$0xff]  }
 0x208   : > { %v6376_v33 = vpop.eup %6375  ;;  %v1307_v36 = vmul.f32 %v6374_v32, %v1231_v28  ;;  %v5935_v28 = vld [vmem:[%s6784_s10 + $0x6e4] ss:$16 sps:$4 sm:$0xff]   ;;  %v5936_v32 = vld [vmem:[%s6784_s10 + $0x6e8] ss:$16 sps:$4 sm:$0xff]  }
 0x209   : > { %v1313_v34 = vrot.slane %v1306_v29, %v7026_v26  ;;  %v1309_v37 = vmul.f32 %v6376_v33, %v1233_v31  ;;  %v5938_v29 = vld [vmem:[%s6784_s10 + $0x6ec] ss:$16 sps:$4 sm:$0xff]   ;;  %v5933_v31 = vld [vmem:[%s6784_s10 + $0x6e0] ss:$16 sps:$4 sm:$0xff]   ;;  %v5941_v33 = vld [vmem:[%s6784_s10 + $0x704] ss:$16 sps:$4 sm:$0xff]  }
 0x20a   : > { %v1317_v40 = vrot.slane %v1307_v36, %v7026_v26  ;;  %v5942_v36 = vld [vmem:[%s6784_s10 + $0x708] ss:$16 sps:$4 sm:$0xff]  }
 0x20b   : > { %v1326_v38 = vmul.f32 %v1313_v34, %v1262_v50  ;;  %v1325_v42 = vrot.slane %v1309_v37, %v7026_v26  ;;  %v5944_v34 = vld [vmem:[%s6784_s10 + $0x70c] ss:$16 sps:$4 sm:$0xff]   ;;  %v5947_v37 = vld [vmem:[%s6784_s10 + $0x724] ss:$16 sps:$4 sm:$0xff]  }
 0x20c   : > { %v1327_v45 = vmul.f32 %v1317_v40, %v7008_v51  ;;  %v5899_v51 = vld [vmem:[%s6784_s10 + $0x624] ss:$16 sps:$4 sm:$0xff]   ;;  %v5945_v40 = vld [vmem:[%s6784_s10 + $0x720] ss:$16 sps:$4 sm:$0xff]  }
 0x20d   : > { %v1346_v44 = vadd.f32 %v1333_v35, %v1326_v38  ;;  %v1329_v46 = vmul.f32 %v1325_v42, %v7010_v52  ;;  %v5902_v52 = vld [vmem:[%s6784_s10 + $0x62c] ss:$16 sps:$4 sm:$0xff]   ;;  %v5939_v35 = vld [vmem:[%s6784_s10 + $0x700] ss:$16 sps:$4 sm:$0xff]   ;;  %v5953_v42 = vld [vmem:[%s6784_s10 + $0x744] ss:$16 sps:$4 sm:$0xff]  }
 0x20e   : > { %v1347_v48 = vadd.f32 %v1337_v41, %v1327_v45  ;;  %v5950_v38 = vld [vmem:[%s6784_s10 + $0x72c] ss:$16 sps:$4 sm:$0xff]   ;;  %v5948_v41 = vld [vmem:[%s6784_s10 + $0x728] ss:$16 sps:$4 sm:$0xff]  }
 0x20f   : > { %v1350_v49 = vmax.f32 %v1346_v44, 0.0  ;;  %v1349_v50 = vadd.f32 %v1345_v43, %v1329_v46  ;;  %v5956_v43 = vld [vmem:[%s6784_s10 + $0x74c] ss:$16 sps:$4 sm:$0xff]   ;;  %v5951_v44 = vld [vmem:[%s6784_s10 + $0x740] ss:$16 sps:$4 sm:$0xff]  }
 0x210   : > { %v1351_v53 = vmax.f32 %v1347_v48, 0.0  ;;  %v5954_v45 = vld [vmem:[%s6784_s10 + $0x748] ss:$16 sps:$4 sm:$0xff]   ;;  %v5959_v46 = vld [vmem:[%s6784_s10 + $0x764] ss:$16 sps:$4 sm:$0xff]   ;;  %v6378_v48 = vpop.eup %6377 }
 0x211   : > { %v1353_v54 = vmax.f32 %v1349_v50, 0.0  ;;  %v1354_v59 = vpack.c.bf16 %v1350_v49, %v1350_v49  ;;  %v1232_v49 = vld [vmem:[%s7022_s22 + $0x10] sm:$0xff] }
 0x212   : > { %v1355_v56 = vpack.c.bf16 %v1351_v53, %v1351_v53  ;;  %v5957_v50 = vld [vmem:[%s6784_s10 + $0x760] ss:$16 sps:$4 sm:$0xff]   ;;  %v5960_v53 = vld [vmem:[%s6784_s10 + $0x768] ss:$16 sps:$4 sm:$0xff]  }
 0x213   : > { %v1357_v60 = vpack.c.bf16 %v1353_v54, %v1353_v54  ;;  %v1308_v54 = vmul.f32 %v6378_v48, %v1232_v49  ;;  %v6035_v48 = vld [vmem:[%s6784_s10 + $0x900] ss:$16 sps:$4 sm:$0xff]  }
 0x214   : > { %2159 = vmatprep.mubr.bf16.mxu0 %v1355_v56  ;;  %2241 = vmatprep.mubr.bf16.mxu1 %v1355_v56  ;;  %v5968_v56 = vld [vmem:[%s6784_s10 + $0x78c] ss:$16 sps:$4 sm:$0xff]  }
 0x215   : > { %2160 = vmatmul.mubr.bf16.vlgmr.msra.gmra.mrb[4].mxu0 %v1354_v59  ;;  %2242 = vmatmul.mubr.bf16.vlgmr.msra.gmra.mrb[4].mxu1 %v1354_v59  ;;  %v1321_v59 = vrot.slane %v1308_v54, %v7026_v26  ;;  %v6041_v54 = vld [vmem:[%s6784_s10 + $0x920] ss:$16 sps:$4 sm:$0xff]  }
 0x216   : > { %2169 = vmatpush1.bf16.msra.mxu0 %v5891_v57  ;;  %2251 = vmatpush1.bf16.msra.mxu1 %v5894_v58  ;;  %v5963_v57 = vld [vmem:[%s6784_s10 + $0x780] ss:$16 sps:$4 sm:$0xff]   ;;  %v5966_v58 = vld [vmem:[%s6784_s10 + $0x788] ss:$16 sps:$4 sm:$0xff]  }
 0x217   : > { %2200 = vmatprep.mubr.bf16.mxu0 %v1357_v60  ;;  %2282 = vmatprep.mubr.bf16.mxu1 %v1357_v60  ;;  %v5969_v60 = vld [vmem:[%s6784_s10 + $0x7a0] ss:$16 sps:$4 sm:$0xff]  }
 0x218   : > { %2170 = vmatprep.subr.bf16.mxu0 %v5899_v51  ;;  %2252 = vmatprep.subr.bf16.mxu1 %v5902_v52  ;;  %v5971_v51 = vld [vmem:[%s6784_s10 + $0x7a4] ss:$16 sps:$4 sm:$0xff]   ;;  %v5974_v52 = vld [vmem:[%s6784_s10 + $0x7ac] ss:$16 sps:$4 sm:$0xff]  }
 0x21a   : > { %2171 = vmatpush1.bf16.msra.mxu0 %v5897_v62  ;;  %2253 = vmatpush1.bf16.msra.mxu1 %v5900_v63  ;;  %v1328_v62 = vmul.f32 %v1321_v59, %v7036_v39  ;;  %v1341_v63 = vrot.slane %v1232_v49, %v7029_v47  ;;  %v5983_v39 = vld [vmem:[%s6784_s10 + $0x7e4] ss:$16 sps:$4 sm:$0xff]   ;;  %v6038_v49 = vld [vmem:[%s6784_s10 + $0x908] ss:$16 sps:$4 sm:$0xff]  }
 0x21b   : > { %2172 = vmatprep.subr.bf16.mxu0 %v5905_v0  ;;  %2254 = vmatprep.subr.bf16.mxu1 %v5908_v1  ;;  %v5977_v0 = vld [vmem:[%s6784_s10 + $0x7c4] ss:$16 sps:$4 sm:$0xff]   ;;  %v5980_v1 = vld [vmem:[%s6784_s10 + $0x7cc] ss:$16 sps:$4 sm:$0xff]   ;;  %v6050_v59 = vld [vmem:[%s6784_s10 + $0x948] ss:$16 sps:$4 sm:$0xff]  }
 0x21e   : > { %2173 = vmatpush1.bf16.msra.mxu0 %v5903_v3  ;;  %2255 = vmatpush1.bf16.msra.mxu1 %v5906_v4  ;;  %v5978_v3 = vld [vmem:[%s6784_s10 + $0x7c8] ss:$16 sps:$4 sm:$0xff]   ;;  %v1348_v4 = vadd.f32 %v1341_v63, %v1328_v62  ;;  %v6061_v62 = vld [vmem:[%s6784_s10 + $0x984] ss:$16 sps:$4 sm:$0xff]   ;;  %v6064_v63 = vld [vmem:[%s6784_s10 + $0x98c] ss:$16 sps:$4 sm:$0xff]  }
 0x21f   : > { %2174 = vmatprep.subr.bf16.mxu0 %v5911_v5  ;;  %2256 = vmatprep.subr.bf16.mxu1 %v5914_v6  ;;  %v5986_v5 = vld [vmem:[%s6784_s10 + $0x7ec] ss:$16 sps:$4 sm:$0xff]   ;;  %v5981_v6 = vld [vmem:[%s6784_s10 + $0x7e0] ss:$16 sps:$4 sm:$0xff]  }
 0x222   : > { %2175 = vmatpush1.bf16.msra.mxu0 %v5909_v8  ;;  %2257 = vmatpush1.bf16.msra.mxu1 %v5912_v9  ;;  %v1352_v8 = vmax.f32 %v1348_v4, 0.0  ;;  %v5989_v9 = vld [vmem:[%s6784_s10 + $0x804] ss:$16 sps:$4 sm:$0xff]   ;;  %v6068_v4 = vld [vmem:[%s6784_s10 + $0x9a8] ss:$16 sps:$4 sm:$0xff]  }
 0x223   : > { %2176 = vmatprep.subr.bf16.mxu0 %v5917_v10  ;;  %2258 = vmatprep.subr.bf16.mxu1 %v5920_v11  ;;  %v5992_v10 = vld [vmem:[%s6784_s10 + $0x80c] ss:$16 sps:$4 sm:$0xff]   ;;  %v5987_v11 = vld [vmem:[%s6784_s10 + $0x800] ss:$16 sps:$4 sm:$0xff]  }
 0x226   : > { %2177 = vmatpush1.bf16.msra.mxu0 %v5915_v13  ;;  %2259 = vmatpush1.bf16.msra.mxu1 %v5918_v14  ;;  %v1356_v13 = vpack.c.bf16 %v1352_v8, %v1352_v8  ;;  %v5995_v14 = vld [vmem:[%s6784_s10 + $0x824] ss:$16 sps:$4 sm:$0xff]   ;;  %v6074_v8 = vld [vmem:[%s6784_s10 + $0x9c8] ss:$16 sps:$4 sm:$0xff]  }
 0x227   : > { %2178 = vmatprep.subr.bf16.mxu0 %v5923_v15  ;;  %2260 = vmatprep.subr.bf16.mxu1 %v5926_v16  ;;  %v5998_v15 = vld [vmem:[%s6784_s10 + $0x82c] ss:$16 sps:$4 sm:$0xff]   ;;  %v5993_v16 = vld [vmem:[%s6784_s10 + $0x820] ss:$16 sps:$4 sm:$0xff]  }
 0x22a   : > { %2179 = vmatpush1.bf16.msra.mxu0 %v5921_v18  ;;  %2261 = vmatpush1.bf16.msra.mxu1 %v5924_v19  ;;  %v6001_v18 = vld [vmem:[%s6784_s10 + $0x844] ss:$16 sps:$4 sm:$0xff]   ;;  %v6004_v19 = vld [vmem:[%s6784_s10 + $0x84c] ss:$16 sps:$4 sm:$0xff]  }
 0x22b   : > { %2180 = vmatprep.subr.bf16.mxu0 %v5929_v20  ;;  %2262 = vmatprep.subr.bf16.mxu1 %v5932_v21  ;;  %v5999_v20 = vld [vmem:[%s6784_s10 + $0x840] ss:$16 sps:$4 sm:$0xff]   ;;  %v6002_v21 = vld [vmem:[%s6784_s10 + $0x848] ss:$16 sps:$4 sm:$0xff]  }
 0x22e   : > { %2181 = vmatpush1.bf16.msra.mxu0 %v5927_v25  ;;  %2263 = vmatpush1.bf16.msra.mxu1 %v5930_v27  ;;  %v6010_v25 = vld [vmem:[%s6784_s10 + $0x86c] ss:$16 sps:$4 sm:$0xff]   ;;  %v6005_v27 = vld [vmem:[%s6784_s10 + $0x860] ss:$16 sps:$4 sm:$0xff]  }
 0x22f   : > { %2182 = vmatprep.subr.bf16.mxu0 %v5935_v28  ;;  %2264 = vmatprep.subr.bf16.mxu1 %v5938_v29  ;;  %v6008_v28 = vld [vmem:[%s6784_s10 + $0x868] ss:$16 sps:$4 sm:$0xff]   ;;  %v6013_v29 = vld [vmem:[%s6784_s10 + $0x884] ss:$16 sps:$4 sm:$0xff]  }
 0x232   : > { %2183 = vmatpush1.bf16.msra.mxu0 %v5933_v31  ;;  %2265 = vmatpush1.bf16.msra.mxu1 %v5936_v32  ;;  %v6011_v31 = vld [vmem:[%s6784_s10 + $0x880] ss:$16 sps:$4 sm:$0xff]   ;;  %v6014_v32 = vld [vmem:[%s6784_s10 + $0x888] ss:$16 sps:$4 sm:$0xff]  }
 0x233   : > { %2184 = vmatprep.subr.bf16.mxu0 %v5941_v33  ;;  %2266 = vmatprep.subr.bf16.mxu1 %v5944_v34  ;;  %v6019_v33 = vld [vmem:[%s6784_s10 + $0x8a4] ss:$16 sps:$4 sm:$0xff]   ;;  %v6022_v34 = vld [vmem:[%s6784_s10 + $0x8ac] ss:$16 sps:$4 sm:$0xff]  }
 0x236   : > { %2185 = vmatpush1.bf16.msra.mxu0 %v5939_v35  ;;  %2267 = vmatpush1.bf16.msra.mxu1 %v5942_v36  ;;  %v6017_v35 = vld [vmem:[%s6784_s10 + $0x8a0] ss:$16 sps:$4 sm:$0xff]   ;;  %v6020_v36 = vld [vmem:[%s6784_s10 + $0x8a8] ss:$16 sps:$4 sm:$0xff]  }
 0x237   : > { %2186 = vmatprep.subr.bf16.mxu0 %v5947_v37  ;;  %2268 = vmatprep.subr.bf16.mxu1 %v5950_v38  ;;  %v6025_v37 = vld [vmem:[%s6784_s10 + $0x8c4] ss:$16 sps:$4 sm:$0xff]   ;;  %v6028_v38 = vld [vmem:[%s6784_s10 + $0x8cc] ss:$16 sps:$4 sm:$0xff]  }
 0x23a   : > { %2187 = vmatpush1.bf16.msra.mxu0 %v5945_v40  ;;  %2269 = vmatpush1.bf16.msra.mxu1 %v5948_v41  ;;  %v6023_v40 = vld [vmem:[%s6784_s10 + $0x8c0] ss:$16 sps:$4 sm:$0xff]   ;;  %v6026_v41 = vld [vmem:[%s6784_s10 + $0x8c8] ss:$16 sps:$4 sm:$0xff]  }
 0x23b   : > { %2188 = vmatprep.subr.bf16.mxu0 %v5953_v42  ;;  %2270 = vmatprep.subr.bf16.mxu1 %v5956_v43  ;;  %v6031_v42 = vld [vmem:[%s6784_s10 + $0x8e4] ss:$16 sps:$4 sm:$0xff]   ;;  %v6034_v43 = vld [vmem:[%s6784_s10 + $0x8ec] ss:$16 sps:$4 sm:$0xff]  }
 0x23e   : > { %2189 = vmatpush1.bf16.msra.mxu0 %v5951_v44  ;;  %2271 = vmatpush1.bf16.msra.mxu1 %v5954_v45  ;;  %v6029_v44 = vld [vmem:[%s6784_s10 + $0x8e0] ss:$16 sps:$4 sm:$0xff]   ;;  %v6032_v45 = vld [vmem:[%s6784_s10 + $0x8e8] ss:$16 sps:$4 sm:$0xff]  }
 0x23f   : > { %2190 = vmatprep.subr.bf16.mxu0 %v5959_v46  ;;  %2272 = vmatprep.subr.bf16.mxu1 %v5962_v22  ;;  %v6037_v46 = vld [vmem:[%s6784_s10 + $0x904] ss:$16 sps:$4 sm:$0xff]   ;;  %v6040_v22 = vld [vmem:[%s6784_s10 + $0x90c] ss:$16 sps:$4 sm:$0xff]  }
 0x242   : > { %2191 = vmatpush1.bf16.msra.mxu0 %v5957_v50  ;;  %2273 = vmatpush1.bf16.msra.mxu1 %v5960_v53  ;;  %v6043_v50 = vld [vmem:[%s6784_s10 + $0x924] ss:$16 sps:$4 sm:$0xff]   ;;  %v6046_v53 = vld [vmem:[%s6784_s10 + $0x92c] ss:$16 sps:$4 sm:$0xff]  }
 0x243   : > { %2192 = vmatprep.subr.bf16.mxu0 %v5965_v55  ;;  %2274 = vmatprep.subr.bf16.mxu1 %v5968_v56  ;;  %v6044_v55 = vld [vmem:[%s6784_s10 + $0x928] ss:$16 sps:$4 sm:$0xff]   ;;  %v6049_v56 = vld [vmem:[%s6784_s10 + $0x944] ss:$16 sps:$4 sm:$0xff]  }
 0x246   : > { %2193 = vmatpush1.bf16.msra.mxu0 %v5963_v57  ;;  %2275 = vmatpush1.bf16.msra.mxu1 %v5966_v58  ;;  %v6052_v57 = vld [vmem:[%s6784_s10 + $0x94c] ss:$16 sps:$4 sm:$0xff]   ;;  %v6047_v58 = vld [vmem:[%s6784_s10 + $0x940] ss:$16 sps:$4 sm:$0xff]  }
 0x247   : > { %2194 = vmatprep.subr.bf16.mxu0 %v5971_v51  ;;  %2276 = vmatprep.subr.bf16.mxu1 %v5974_v52  ;;  %v6055_v51 = vld [vmem:[%s6784_s10 + $0x964] ss:$16 sps:$4 sm:$0xff]   ;;  %v6058_v52 = vld [vmem:[%s6784_s10 + $0x96c] ss:$16 sps:$4 sm:$0xff]  }
 0x24a   : > { %2195 = vmatpush1.bf16.msra.mxu0 %v5969_v60  ;;  %2277 = vmatpush1.bf16.msra.mxu1 %v5972_v61  ;;  %v6053_v60 = vld [vmem:[%s6784_s10 + $0x960] ss:$16 sps:$4 sm:$0xff]   ;;  %v6056_v61 = vld [vmem:[%s6784_s10 + $0x968] ss:$16 sps:$4 sm:$0xff]  }
 0x24b   : > { %2196 = vmatprep.subr.bf16.mxu0 %v5977_v0  ;;  %2278 = vmatprep.subr.bf16.mxu1 %v5980_v1  ;;  %v6059_v0 = vld [vmem:[%s6784_s10 + $0x980] ss:$16 sps:$4 sm:$0xff]   ;;  %v6062_v1 = vld [vmem:[%s6784_s10 + $0x988] ss:$16 sps:$4 sm:$0xff]  }
 0x24e   : > { %2197 = vmatpush1.bf16.msra.mxu0 %v5975_v2  ;;  %2279 = vmatpush1.bf16.msra.mxu1 %v5978_v3  ;;  %v6067_v2 = vld [vmem:[%s6784_s10 + $0x9a4] ss:$16 sps:$4 sm:$0xff]   ;;  %v6065_v3 = vld [vmem:[%s6784_s10 + $0x9a0] ss:$16 sps:$4 sm:$0xff]  }
 0x24f   : > { %2198 = vmatprep.subr.bf16.mxu0 %v5983_v39  ;;  %2280 = vmatprep.subr.bf16.mxu1 %v5986_v5  ;;  %v6070_v39 = vld [vmem:[%s6784_s10 + $0x9ac] ss:$16 sps:$4 sm:$0xff]   ;;  %v6073_v5 = vld [vmem:[%s6784_s10 + $0x9c4] ss:$16 sps:$4 sm:$0xff]  }
 0x252   : > { %2199 = vmatpush1.bf16.msra.mxu0 %v5981_v6  ;;  %2281 = vmatpush1.bf16.msra.mxu1 %v5984_v7  ;;  %v6076_v6 = vld [vmem:[%s6784_s10 + $0x9cc] ss:$16 sps:$4 sm:$0xff]   ;;  %v6071_v7 = vld [vmem:[%s6784_s10 + $0x9c0] ss:$16 sps:$4 sm:$0xff]  }
 0x253   : > { %3210 = vmatprep.subr.bf16.mxu0 %v5989_v9  ;;  %3292 = vmatprep.subr.bf16.mxu1 %v5992_v10  ;;  %v6079_v9 = vld [vmem:[%s6784_s10 + $0x9e4] ss:$16 sps:$4 sm:$0xff]   ;;  %v6077_v10 = vld [vmem:[%s6784_s10 + $0x9e0] ss:$16 sps:$4 sm:$0xff]  }
 0x255   : > { %2201 = vmatmul.mubr.bf16.vlgmr.msra.gmra.mrb[4].mxu0 %v1356_v13  ;;  %2283 = vmatmul.mubr.bf16.vlgmr.msra.gmra.mrb[4].mxu1 %v1356_v13  ;;  %v6085_v13 = vld [vmem:[%s6784_s10 + $0xa04] ss:$16 sps:$4 sm:$0xff]  }
 0x256   : > { %3211 = vmatpush1.bf16.msra.mxu0 %v5987_v11  ;;  %3293 = vmatpush1.bf16.msra.mxu1 %v5990_v12  ;;  %v6082_v11 = vld [vmem:[%s6784_s10 + $0x9ec] ss:$16 sps:$4 sm:$0xff]   ;;  %v6080_v12 = vld [vmem:[%s6784_s10 + $0x9e8] ss:$16 sps:$4 sm:$0xff]  }
 0x257   : > { %3212 = vmatprep.subr.bf16.mxu0 %v5995_v14  ;;  %3294 = vmatprep.subr.bf16.mxu1 %v5998_v15  ;;  %v6088_v14 = vld [vmem:[%s6784_s10 + $0xa0c] ss:$16 sps:$4 sm:$0xff]  }
 0x25a   : > { %3213 = vmatpush1.bf16.msra.mxu0 %v5993_v16  ;;  %3295 = vmatpush1.bf16.msra.mxu1 %v5996_v17 }
 0x25b   : > { %3214 = vmatprep.subr.bf16.mxu0 %v6001_v18  ;;  %3296 = vmatprep.subr.bf16.mxu1 %v6004_v19 }
 0x25e   : > { %3215 = vmatpush1.bf16.msra.mxu0 %v5999_v20  ;;  %3297 = vmatpush1.bf16.msra.mxu1 %v6002_v21 }
 0x25f   : > { %3216 = vmatprep.subr.bf16.mxu0 %v6007_v24  ;;  %3298 = vmatprep.subr.bf16.mxu1 %v6010_v25 }
 0x262   : > { %3217 = vmatpush1.bf16.msra.mxu0 %v6005_v27  ;;  %3299 = vmatpush1.bf16.msra.mxu1 %v6008_v28 }
 0x263   : > { %3218 = vmatprep.subr.bf16.mxu0 %v6013_v29  ;;  %3300 = vmatprep.subr.bf16.mxu1 %v6016_v30 }
 0x266   : > { %3219 = vmatpush1.bf16.msra.mxu0 %v6011_v31  ;;  %3301 = vmatpush1.bf16.msra.mxu1 %v6014_v32 }
 0x267   : > { %3220 = vmatprep.subr.bf16.mxu0 %v6019_v33  ;;  %3302 = vmatprep.subr.bf16.mxu1 %v6022_v34 }
 0x26a   : > { %3221 = vmatpush1.bf16.msra.mxu0 %v6017_v35  ;;  %3303 = vmatpush1.bf16.msra.mxu1 %v6020_v36 }
 0x26b   : > { %3222 = vmatprep.subr.bf16.mxu0 %v6025_v37  ;;  %3304 = vmatprep.subr.bf16.mxu1 %v6028_v38 }
 0x26e   : > { %3223 = vmatpush1.bf16.msra.mxu0 %v6023_v40  ;;  %3305 = vmatpush1.bf16.msra.mxu1 %v6026_v41 }
 0x26f   : > { %3224 = vmatprep.subr.bf16.mxu0 %v6031_v42  ;;  %3306 = vmatprep.subr.bf16.mxu1 %v6034_v43 }
 0x272   : > { %3225 = vmatpush1.bf16.msra.mxu0 %v6029_v44  ;;  %3307 = vmatpush1.bf16.msra.mxu1 %v6032_v45 }
 0x273   : > { %3226 = vmatprep.subr.bf16.mxu0 %v6037_v46  ;;  %3308 = vmatprep.subr.bf16.mxu1 %v6040_v22 }
 0x276   : > { %3227 = vmatpush1.bf16.msra.mxu0 %v6035_v48  ;;  %3309 = vmatpush1.bf16.msra.mxu1 %v6038_v49 }
 0x277   : > { %3228 = vmatprep.subr.bf16.mxu0 %v6043_v50  ;;  %3310 = vmatprep.subr.bf16.mxu1 %v6046_v53 }
 0x27a   : > { %3229 = vmatpush1.bf16.msra.mxu0 %v6041_v54  ;;  %3311 = vmatpush1.bf16.msra.mxu1 %v6044_v55 }
 0x27b   : > { %3230 = vmatprep.subr.bf16.mxu0 %v6049_v56  ;;  %3312 = vmatprep.subr.bf16.mxu1 %v6052_v57 }
 0x27e   : > { %3231 = vmatpush1.bf16.msra.mxu0 %v6047_v58  ;;  %3313 = vmatpush1.bf16.msra.mxu1 %v6050_v59 }
 0x27f   : > { %3232 = vmatprep.subr.bf16.mxu0 %v6055_v51  ;;  %3314 = vmatprep.subr.bf16.mxu1 %v6058_v52 }
 0x282   : > { %3233 = vmatpush1.bf16.msra.mxu0 %v6053_v60  ;;  %3315 = vmatpush1.bf16.msra.mxu1 %v6056_v61 }
 0x283   : > { %3234 = vmatprep.subr.bf16.mxu0 %v6061_v62  ;;  %3316 = vmatprep.subr.bf16.mxu1 %v6064_v63 }
 0x286   : > { %3235 = vmatpush1.bf16.msra.mxu0 %v6059_v0  ;;  %3317 = vmatpush1.bf16.msra.mxu1 %v6062_v1 }
 0x287   : > { %3236 = vmatprep.subr.bf16.mxu0 %v6067_v2  ;;  %3318 = vmatprep.subr.bf16.mxu1 %v6070_v39 }
 0x28a   : > { %3237 = vmatpush1.bf16.msra.mxu0 %v6065_v3  ;;  %3319 = vmatpush1.bf16.msra.mxu1 %v6068_v4 }
 0x28b   : > { %3238 = vmatprep.subr.bf16.mxu0 %v6073_v5  ;;  %3320 = vmatprep.subr.bf16.mxu1 %v6076_v6 }
 0x28e   : > { %3239 = vmatpush1.bf16.msra.mxu0 %v6071_v7  ;;  %3321 = vmatpush1.bf16.msra.mxu1 %v6074_v8 }
 0x28f   : > { %3240 = vmatprep.subr.bf16.mxu0 %v6079_v9  ;;  %3322 = vmatprep.subr.bf16.mxu1 %v6082_v11 }
 0x292   : > { %3241 = vmatpush1.bf16.msra.mxu0 %v6077_v10  ;;  %3323 = vmatpush1.bf16.msra.mxu1 %v6080_v12 }
 0x293   : > { %3251 = vmatprep.subr.bf16.mxu0 %v6085_v13  ;;  %3333 = vmatprep.subr.bf16.mxu1 %v6088_v14 }
 0x328   : > { %v2202_v15 = vpop.f32.mrb[4].mxu0  ;;  %v7178_v16 = vpop.f32.mrb[4].mxu1 }
 0x329   : > { %v2296_v17 = vrot.slane %v2202_v15, 4  ;;  %v2204_v18 = vpop.f32.mrb[5].mxu0  ;;  %v2286_v19 = vpop.f32.mrb[5].mxu1  ;;  %v2308_v51 = vrot.slane %v7178_v16, 4 }
 0x32a   : > { %v2302_v20 = vrot.slane %v2204_v18, 4  ;;  %v2314_v21 = vrot.slane %v2286_v19, 4  ;;  %v2206_v24 = vpop.f32.mrb[6].mxu0  ;;  %v2288_v25 = vpop.f32.mrb[6].mxu1 }
 0x32b   : > { %v2297_v27 = vadd.f32 %v2296_v17, %v2202_v15  ;;  %v2207_v28 = vpop.f32.mrb[7].mxu0  ;;  %v2289_v29 = vpop.f32.mrb[7].mxu1  ;;  %v2309_v1 = vadd.f32 %v2308_v51, %v7178_v16  ;;  %v4968_v24 = vld [vmem:[%s7022_s22 + $0x28] sm:$0xff] }
 0x32c   : > { %v2303_v30 = vadd.f32 %v2302_v20, %v2204_v18  ;;  %v2315_v31 = vadd.f32 %v2314_v21, %v2286_v19  ;;  %v4967_v20 = vld [vmem:[%s7022_s22 + $0x20] sm:$0xff]  ;;  %v4970_v28 = vld [vmem:[%s7022_s22 + $0x38] sm:$0xff] }
 0x32d   : > { %v2298_v32 = vrot.slane %v2297_v27, 2  ;;  %v2310_v7 = vrot.slane %v2309_v1, 2 }
 0x32e   : > { %v2304_v33 = vrot.slane %v2303_v30, 2  ;;  %v2316_v34 = vrot.slane %v2315_v31, 2 }
 0x32f   : > { %v2299_v35 = vadd.f32 %v2298_v32, %v2297_v27  ;;  %v2311_v14 = vadd.f32 %v2310_v7, %v2309_v1  ;;  %v2395_v32 = vrot.slane %v4967_v20, %v7029_v47  ;;  %v6098_v1 = vld [vmem:[%s6784_s10 + $0xa48] ss:$16 sps:$4 sm:$0xff]   ;;  %v6112_v7 = vld [vmem:[%s6784_s10 + $0xa8c] ss:$16 sps:$4 sm:$0xff]  }
 0x330   : > { %v2305_v36 = vadd.f32 %v2304_v33, %v2303_v30  ;;  %v2317_v37 = vadd.f32 %v2316_v34, %v2315_v31 }
 0x331   : > { %v2300_v38 = vrot.slane %v2299_v35, 1 }
 0x332   : > { %v2306_v40 = vrot.slane %v2305_v36, 1  ;;  %v2318_v41 = vrot.slane %v2317_v37, 1 }
 0x333   : > { %v2301_v42 = vadd.f32 %v2300_v38, %v2299_v35  ;;  %v2399_v38 = vrot.slane %v4968_v24, %v7029_v47 }
 0x334   : > { %v2307_v43 = vadd.f32 %v2306_v40, %v2305_v36  ;;  %v2319_v44 = vadd.f32 %v2318_v41, %v2317_v37  ;;  %v2407_v41 = vrot.slane %v4970_v28, %v7029_v47 }
 0x335   : > { %v2320_v45 = vmul.f32 0.125, %v2301_v42 }
 0x336   : > { %v2321_v46 = vmul.f32 0.125, %v2307_v43  ;;  %v2323_v22 = vmul.f32 0.125, %v2319_v44 }
 0x337   : > { %v2324_v48 = vsub.f32 %v2202_v15, %v2320_v45 }
 0x338   : > { %v2325_v49 = vsub.f32 %v2204_v18, %v2321_v46  ;;  %v2327_v50 = vsub.f32 %v2286_v19, %v2323_v22  ;;  %v2312_v18 = vrot.slane %v2311_v14, 1 }
 0x339   : > { %v2328_v53 = vmul.f32 %v2324_v48, %v2324_v48 }
 0x33a   : > { %v2329_v54 = vmul.f32 %v2325_v49, %v2325_v49  ;;  %v2331_v55 = vmul.f32 %v2327_v50, %v2327_v50  ;;  %v2313_v19 = vadd.f32 %v2312_v18, %v2311_v14  ;;  %v6113_v14 = vld [vmem:[%s6784_s10 + $0xaa0] ss:$16 sps:$4 sm:$0xff]   ;;  %v6124_v18 = vld [vmem:[%s6784_s10 + $0xacc] ss:$16 sps:$4 sm:$0xff]  }
 0x33b   : > { %v2332_v56 = vrot.slane %v2328_v53, 4 }
 0x33c   : > { %v2338_v57 = vrot.slane %v2329_v54, 4  ;;  %v2350_v58 = vrot.slane %v2331_v55, 4  ;;  %v2322_v27 = vmul.f32 0.125, %v2313_v19 }
 0x33d   : > { %v2333_v59 = vadd.f32 %v2332_v56, %v2328_v53  ;;  %v6083_v56 = vld [vmem:[%s6784_s10 + $0xa00] ss:$16 sps:$4 sm:$0xff]  }
 0x33e   : > { %v2339_v52 = vadd.f32 %v2338_v57, %v2329_v54  ;;  %v2351_v60 = vadd.f32 %v2350_v58, %v2331_v55  ;;  %v7188_v36 = vsub.f32 %v7178_v16, %v2322_v27  ;;  %v6086_v57 = vld [vmem:[%s6784_s10 + $0xa08] ss:$16 sps:$4 sm:$0xff]  }
 0x33f   : > { %v2334_v61 = vrot.slane %v2333_v59, 2 }
 0x340   : > { %v2340_v62 = vrot.slane %v2339_v52, 2  ;;  %v2352_v63 = vrot.slane %v2351_v60, 2  ;;  %v2330_v45 = vmul.f32 %v7188_v36, %v7188_v36 }
 0x341   : > { %v2335_v0 = vadd.f32 %v2334_v61, %v2333_v59  ;;  %v6097_v61 = vld [vmem:[%s6784_s10 + $0xa44] ss:$16 sps:$4 sm:$0xff]  }
 0x342   : > { %v2341_v2 = vadd.f32 %v2340_v62, %v2339_v52  ;;  %v2353_v3 = vadd.f32 %v2352_v63, %v2351_v60  ;;  %v2344_v54 = vrot.slane %v2330_v45, 4  ;;  %v6089_v52 = vld [vmem:[%s6784_s10 + $0xa20] ss:$16 sps:$4 sm:$0xff]   ;;  %v6092_v60 = vld [vmem:[%s6784_s10 + $0xa28] ss:$16 sps:$4 sm:$0xff]  }
 0x343   : > { %v2336_v4 = vrot.slane %v2335_v0, 1  ;;  %v6100_v62 = vld [vmem:[%s6784_s10 + $0xa4c] ss:$16 sps:$4 sm:$0xff]  }
 0x344   : > { %v2342_v39 = vrot.slane %v2341_v2, 1  ;;  %v2354_v5 = vrot.slane %v2353_v3, 1  ;;  %v2345_v51 = vadd.f32 %v2344_v54, %v2330_v45  ;;  %v6154_v45 = vld [vmem:[%s6784_s10 + $0xb6c] ss:$16 sps:$4 sm:$0xff]   ;;  %v6157_v54 = vld [vmem:[%s6784_s10 + $0xb84] ss:$16 sps:$4 sm:$0xff]  }
 0x345   : > { %v2337_v6 = vadd.f32 %v2336_v4, %v2335_v0  ;;  %v6095_v0 = vld [vmem:[%s6784_s10 + $0xa40] ss:$16 sps:$4 sm:$0xff]  }
 0x346   : > { %v2343_v8 = vadd.f32 %v2342_v39, %v2341_v2  ;;  %v2355_v9 = vadd.f32 %v2354_v5, %v2353_v3  ;;  %v2346_v63 = vrot.slane %v2345_v51, 2  ;;  %v6103_v2 = vld [vmem:[%s6784_s10 + $0xa64] ss:$16 sps:$4 sm:$0xff]   ;;  %v6106_v3 = vld [vmem:[%s6784_s10 + $0xa6c] ss:$16 sps:$4 sm:$0xff]  }
 0x347   : > { %v2356_v10 = vmul.f32 0.125, %v2337_v6  ;;  %v6101_v39 = vld [vmem:[%s6784_s10 + $0xa60] ss:$16 sps:$4 sm:$0xff]   ;;  %v6104_v5 = vld [vmem:[%s6784_s10 + $0xa68] ss:$16 sps:$4 sm:$0xff]  }
 0x348   : > { %v2357_v11 = vmul.f32 0.125, %v2343_v8  ;;  %v2359_v12 = vmul.f32 0.125, %v2355_v9  ;;  %v2347_v4 = vadd.f32 %v2346_v63, %v2345_v51  ;;  %v6109_v6 = vld [vmem:[%s6784_s10 + $0xa84] ss:$16 sps:$4 sm:$0xff]   ;;  %v6107_v9 = vld [vmem:[%s6784_s10 + $0xa80] ss:$16 sps:$4 sm:$0xff]  }
 0x349   : > { %v2360_v13 = vadd.f32 1e-05, %v2356_v10  ;;  %v6110_v10 = vld [vmem:[%s6784_s10 + $0xa88] ss:$16 sps:$4 sm:$0xff]   ;;  %v6167_v63 = vld [vmem:[%s6784_s10 + $0xbc0] ss:$16 sps:$4 sm:$0xff]  }
 0x34a   : > { %v2361_v15 = vadd.f32 1e-05, %v2357_v11  ;;  %v2363_v17 = vadd.f32 1e-05, %v2359_v12  ;;  %v2348_v8 = vrot.slane %v2347_v4, 1 }
 0x34b   : > { %6379 = vrsqrt.f32 %v2360_v13  ;;  %v6115_v11 = vld [vmem:[%s6784_s10 + $0xaa4] ss:$16 sps:$4 sm:$0xff]   ;;  %v6118_v12 = vld [vmem:[%s6784_s10 + $0xaac] ss:$16 sps:$4 sm:$0xff]   ;;  %v6164_v51 = vld [vmem:[%s6784_s10 + $0xba8] ss:$16 sps:$4 sm:$0xff]  }
 0x34c   : > { %6381 = vrsqrt.f32 %v2361_v15  ;;  %v2349_v13 = vadd.f32 %v2348_v8, %v2347_v4  ;;  %v6116_v15 = vld [vmem:[%s6784_s10 + $0xaa8] ss:$16 sps:$4 sm:$0xff]  }
 0x34d   : > { %6383 = vrsqrt.f32 %v2363_v17  ;;  %v6121_v17 = vld [vmem:[%s6784_s10 + $0xac4] ss:$16 sps:$4 sm:$0xff]   ;;  %v6176_v4 = vld [vmem:[%s6784_s10 + $0xbe8] ss:$16 sps:$4 sm:$0xff]  }
 0x34e   : > { %v2358_v19 = vmul.f32 0.125, %v2349_v13  ;;  %v6182_v8 = vld [vmem:[%s6784_s10 + $0xc08] ss:$16 sps:$4 sm:$0xff]  }
 0x34f   : > { %v6188_v13 = vld [vmem:[%s6784_s10 + $0xc28] ss:$16 sps:$4 sm:$0xff]  }
 0x350   : > { %v2362_v27 = vadd.f32 1e-05, %v2358_v19  ;;  %v6199_v19 = vld [vmem:[%s6784_s10 + $0xc64] ss:$16 sps:$4 sm:$0xff]  }
 0x352   : > { %6385 = vrsqrt.f32 %v2362_v27  ;;  %v6208_v27 = vld [vmem:[%s6784_s10 + $0xc8c] ss:$16 sps:$4 sm:$0xff]  }
 0x355   : > { %v6380_v21 = vpop.eup %6379 }
 0x356   : > { %v2368_v25 = vmul.f32 %v6380_v21, %v4967_v20  ;;  %v6382_v29 = vpop.eup %6381  ;;  %v6119_v20 = vld [vmem:[%s6784_s10 + $0xac0] ss:$16 sps:$4 sm:$0xff]   ;;  %v6122_v21 = vld [vmem:[%s6784_s10 + $0xac8] ss:$16 sps:$4 sm:$0xff]  }
 0x357   : > { %v6384_v30 = vpop.eup %6383  ;;  %v2369_v33 = vmul.f32 %v6382_v29, %v4968_v24  ;;  %v6127_v24 = vld [vmem:[%s6784_s10 + $0xae4] ss:$16 sps:$4 sm:$0xff]   ;;  %v6128_v29 = vld [vmem:[%s6784_s10 + $0xae8] ss:$16 sps:$4 sm:$0xff]  }
 0x358   : > { %v2375_v31 = vrot.slane %v2368_v25, %v7026_v26  ;;  %v2371_v34 = vmul.f32 %v6384_v30, %v4970_v28  ;;  %v6130_v25 = vld [vmem:[%s6784_s10 + $0xaec] ss:$16 sps:$4 sm:$0xff]   ;;  %v6125_v28 = vld [vmem:[%s6784_s10 + $0xae0] ss:$16 sps:$4 sm:$0xff]   ;;  %v6133_v30 = vld [vmem:[%s6784_s10 + $0xb04] ss:$16 sps:$4 sm:$0xff]  }
 0x359   : > { %v2379_v37 = vrot.slane %v2369_v33, %v7026_v26  ;;  %v6134_v33 = vld [vmem:[%s6784_s10 + $0xb08] ss:$16 sps:$4 sm:$0xff]  }
 0x35a   : > { %v2388_v35 = vmul.f32 %v2375_v31, %v2324_v48  ;;  %v2387_v40 = vrot.slane %v2371_v34, %v7026_v26  ;;  %v6136_v31 = vld [vmem:[%s6784_s10 + $0xb0c] ss:$16 sps:$4 sm:$0xff]   ;;  %v6139_v34 = vld [vmem:[%s6784_s10 + $0xb24] ss:$16 sps:$4 sm:$0xff]  }
 0x35b   : > { %v2389_v43 = vmul.f32 %v2379_v37, %v2325_v49  ;;  %v6091_v49 = vld [vmem:[%s6784_s10 + $0xa24] ss:$16 sps:$4 sm:$0xff]   ;;  %v6137_v37 = vld [vmem:[%s6784_s10 + $0xb20] ss:$16 sps:$4 sm:$0xff]  }
 0x35c   : > { %v2408_v42 = vadd.f32 %v2395_v32, %v2388_v35  ;;  %v2391_v44 = vmul.f32 %v2387_v40, %v2327_v50  ;;  %v6094_v50 = vld [vmem:[%s6784_s10 + $0xa2c] ss:$16 sps:$4 sm:$0xff]   ;;  %v6131_v32 = vld [vmem:[%s6784_s10 + $0xb00] ss:$16 sps:$4 sm:$0xff]   ;;  %v6145_v40 = vld [vmem:[%s6784_s10 + $0xb44] ss:$16 sps:$4 sm:$0xff]  }
 0x35d   : > { %v2409_v16 = vadd.f32 %v2399_v38, %v2389_v43  ;;  %v6142_v35 = vld [vmem:[%s6784_s10 + $0xb2c] ss:$16 sps:$4 sm:$0xff]   ;;  %v6140_v38 = vld [vmem:[%s6784_s10 + $0xb28] ss:$16 sps:$4 sm:$0xff]  }
 0x35e   : > { %v2412_v46 = vmax.f32 %v2408_v42, 0.0  ;;  %v2411_v22 = vadd.f32 %v2407_v41, %v2391_v44  ;;  %v6148_v41 = vld [vmem:[%s6784_s10 + $0xb4c] ss:$16 sps:$4 sm:$0xff]   ;;  %v6143_v42 = vld [vmem:[%s6784_s10 + $0xb40] ss:$16 sps:$4 sm:$0xff]  }
 0x35f   : > { %v2413_v48 = vmax.f32 %v2409_v16, 0.0  ;;  %v6146_v43 = vld [vmem:[%s6784_s10 + $0xb48] ss:$16 sps:$4 sm:$0xff]   ;;  %v6151_v44 = vld [vmem:[%s6784_s10 + $0xb64] ss:$16 sps:$4 sm:$0xff]   ;;  %v6386_v16 = vpop.eup %6385 }
 0x360   : > { %v2415_v53 = vmax.f32 %v2411_v22, 0.0  ;;  %v2416_v58 = vpack.c.bf16 %v2412_v46, %v2412_v46  ;;  %v4969_v46 = vld [vmem:[%s7022_s22 + $0x30] sm:$0xff] }
 0x361   : > { %v2417_v55 = vpack.c.bf16 %v2413_v48, %v2413_v48  ;;  %v6149_v22 = vld [vmem:[%s6784_s10 + $0xb60] ss:$16 sps:$4 sm:$0xff]   ;;  %v6152_v48 = vld [vmem:[%s6784_s10 + $0xb68] ss:$16 sps:$4 sm:$0xff]  }
 0x362   : > { %v2419_v59 = vpack.c.bf16 %v2415_v53, %v2415_v53  ;;  %v2370_v53 = vmul.f32 %v6386_v16, %v4969_v46  ;;  %v6227_v16 = vld [vmem:[%s6784_s10 + $0xd00] ss:$16 sps:$4 sm:$0xff]  }
 0x363   : > { %3242 = vmatprep.mubr.bf16.mxu0 %v2417_v55  ;;  %3324 = vmatprep.mubr.bf16.mxu1 %v2417_v55  ;;  %v6160_v55 = vld [vmem:[%s6784_s10 + $0xb8c] ss:$16 sps:$4 sm:$0xff]  }
 0x364   : > { %3243 = vmatmul.mubr.bf16.vlgmr.msra.gmra.mrb[8].mxu0 %v2416_v58  ;;  %3325 = vmatmul.mubr.bf16.vlgmr.msra.gmra.mrb[8].mxu1 %v2416_v58  ;;  %v2383_v58 = vrot.slane %v2370_v53, %v7026_v26  ;;  %v6233_v53 = vld [vmem:[%s6784_s10 + $0xd20] ss:$16 sps:$4 sm:$0xff]  }
 0x365   : > { %3252 = vmatpush1.bf16.msra.mxu0 %v6083_v56  ;;  %3334 = vmatpush1.bf16.msra.mxu1 %v6086_v57  ;;  %v6155_v56 = vld [vmem:[%s6784_s10 + $0xb80] ss:$16 sps:$4 sm:$0xff]   ;;  %v6158_v57 = vld [vmem:[%s6784_s10 + $0xb88] ss:$16 sps:$4 sm:$0xff]  }
 0x366   : > { %3283 = vmatprep.mubr.bf16.mxu0 %v2419_v59  ;;  %3365 = vmatprep.mubr.bf16.mxu1 %v2419_v59  ;;  %v6161_v59 = vld [vmem:[%s6784_s10 + $0xba0] ss:$16 sps:$4 sm:$0xff]  }
 0x367   : > { %3253 = vmatprep.subr.bf16.mxu0 %v6091_v49  ;;  %3335 = vmatprep.subr.bf16.mxu1 %v6094_v50  ;;  %v6163_v49 = vld [vmem:[%s6784_s10 + $0xba4] ss:$16 sps:$4 sm:$0xff]   ;;  %v6166_v50 = vld [vmem:[%s6784_s10 + $0xbac] ss:$16 sps:$4 sm:$0xff]  }
 0x369   : > { %3254 = vmatpush1.bf16.msra.mxu0 %v6089_v52  ;;  %3336 = vmatpush1.bf16.msra.mxu1 %v6092_v60  ;;  %v2390_v52 = vmul.f32 %v2383_v58, %v7188_v36  ;;  %v2403_v60 = vrot.slane %v4969_v46, %v7029_v47  ;;  %v6175_v36 = vld [vmem:[%s6784_s10 + $0xbe4] ss:$16 sps:$4 sm:$0xff]   ;;  %v6230_v46 = vld [vmem:[%s6784_s10 + $0xd08] ss:$16 sps:$4 sm:$0xff]  }
 0x36a   : > { %3255 = vmatprep.subr.bf16.mxu0 %v6097_v61  ;;  %3337 = vmatprep.subr.bf16.mxu1 %v6100_v62  ;;  %v6169_v61 = vld [vmem:[%s6784_s10 + $0xbc4] ss:$16 sps:$4 sm:$0xff]   ;;  %v6172_v62 = vld [vmem:[%s6784_s10 + $0xbcc] ss:$16 sps:$4 sm:$0xff]   ;;  %v6242_v58 = vld [vmem:[%s6784_s10 + $0xd48] ss:$16 sps:$4 sm:$0xff]  }
 0x36d   : > { %3256 = vmatpush1.bf16.msra.mxu0 %v6095_v0  ;;  %3338 = vmatpush1.bf16.msra.mxu1 %v6098_v1  ;;  %v6170_v0 = vld [vmem:[%s6784_s10 + $0xbc8] ss:$16 sps:$4 sm:$0xff]   ;;  %v2410_v1 = vadd.f32 %v2403_v60, %v2390_v52  ;;  %v6253_v52 = vld [vmem:[%s6784_s10 + $0xd84] ss:$16 sps:$4 sm:$0xff]   ;;  %v6256_v60 = vld [vmem:[%s6784_s10 + $0xd8c] ss:$16 sps:$4 sm:$0xff]  }
 0x36e   : > { %3257 = vmatprep.subr.bf16.mxu0 %v6103_v2  ;;  %3339 = vmatprep.subr.bf16.mxu1 %v6106_v3  ;;  %v6178_v2 = vld [vmem:[%s6784_s10 + $0xbec] ss:$16 sps:$4 sm:$0xff]   ;;  %v6173_v3 = vld [vmem:[%s6784_s10 + $0xbe0] ss:$16 sps:$4 sm:$0xff]  }
 0x371   : > { %3258 = vmatpush1.bf16.msra.mxu0 %v6101_v39  ;;  %3340 = vmatpush1.bf16.msra.mxu1 %v6104_v5  ;;  %v2414_v39 = vmax.f32 %v2410_v1, 0.0  ;;  %v6181_v5 = vld [vmem:[%s6784_s10 + $0xc04] ss:$16 sps:$4 sm:$0xff]   ;;  %v6257_v1 = vld [vmem:[%s6784_s10 + $0xda0] ss:$16 sps:$4 sm:$0xff]  }
 0x372   : > { %3259 = vmatprep.subr.bf16.mxu0 %v6109_v6  ;;  %3341 = vmatprep.subr.bf16.mxu1 %v6112_v7  ;;  %v6184_v6 = vld [vmem:[%s6784_s10 + $0xc0c] ss:$16 sps:$4 sm:$0xff]   ;;  %v6179_v7 = vld [vmem:[%s6784_s10 + $0xc00] ss:$16 sps:$4 sm:$0xff]  }
 0x375   : > { %3260 = vmatpush1.bf16.msra.mxu0 %v6107_v9  ;;  %3342 = vmatpush1.bf16.msra.mxu1 %v6110_v10  ;;  %v2418_v9 = vpack.c.bf16 %v2414_v39, %v2414_v39  ;;  %v6187_v10 = vld [vmem:[%s6784_s10 + $0xc24] ss:$16 sps:$4 sm:$0xff]   ;;  %v6266_v39 = vld [vmem:[%s6784_s10 + $0xdc8] ss:$16 sps:$4 sm:$0xff]  }
 0x376   : > { %3261 = vmatprep.subr.bf16.mxu0 %v6115_v11  ;;  %3343 = vmatprep.subr.bf16.mxu1 %v6118_v12  ;;  %v6190_v11 = vld [vmem:[%s6784_s10 + $0xc2c] ss:$16 sps:$4 sm:$0xff]   ;;  %v6185_v12 = vld [vmem:[%s6784_s10 + $0xc20] ss:$16 sps:$4 sm:$0xff]  }
 0x379   : > { %3262 = vmatpush1.bf16.msra.mxu0 %v6113_v14  ;;  %3344 = vmatpush1.bf16.msra.mxu1 %v6116_v15  ;;  %v6193_v14 = vld [vmem:[%s6784_s10 + $0xc44] ss:$16 sps:$4 sm:$0xff]   ;;  %v6196_v15 = vld [vmem:[%s6784_s10 + $0xc4c] ss:$16 sps:$4 sm:$0xff]  }
 0x37a   : > { %3263 = vmatprep.subr.bf16.mxu0 %v6121_v17  ;;  %3345 = vmatprep.subr.bf16.mxu1 %v6124_v18  ;;  %v6191_v17 = vld [vmem:[%s6784_s10 + $0xc40] ss:$16 sps:$4 sm:$0xff]   ;;  %v6194_v18 = vld [vmem:[%s6784_s10 + $0xc48] ss:$16 sps:$4 sm:$0xff]  }
 0x37d   : > { %3264 = vmatpush1.bf16.msra.mxu0 %v6119_v20  ;;  %3346 = vmatpush1.bf16.msra.mxu1 %v6122_v21  ;;  %v6202_v20 = vld [vmem:[%s6784_s10 + $0xc6c] ss:$16 sps:$4 sm:$0xff]   ;;  %v6197_v21 = vld [vmem:[%s6784_s10 + $0xc60] ss:$16 sps:$4 sm:$0xff]  }
 0x37e   : > { %3265 = vmatprep.subr.bf16.mxu0 %v6127_v24  ;;  %3347 = vmatprep.subr.bf16.mxu1 %v6130_v25  ;;  %v6200_v24 = vld [vmem:[%s6784_s10 + $0xc68] ss:$16 sps:$4 sm:$0xff]   ;;  %v6205_v25 = vld [vmem:[%s6784_s10 + $0xc84] ss:$16 sps:$4 sm:$0xff]  }
 0x381   : > { %3266 = vmatpush1.bf16.msra.mxu0 %v6125_v28  ;;  %3348 = vmatpush1.bf16.msra.mxu1 %v6128_v29  ;;  %v6203_v28 = vld [vmem:[%s6784_s10 + $0xc80] ss:$16 sps:$4 sm:$0xff]   ;;  %v6206_v29 = vld [vmem:[%s6784_s10 + $0xc88] ss:$16 sps:$4 sm:$0xff]  }
 0x382   : > { %3267 = vmatprep.subr.bf16.mxu0 %v6133_v30  ;;  %3349 = vmatprep.subr.bf16.mxu1 %v6136_v31  ;;  %v6211_v30 = vld [vmem:[%s6784_s10 + $0xca4] ss:$16 sps:$4 sm:$0xff]   ;;  %v6214_v31 = vld [vmem:[%s6784_s10 + $0xcac] ss:$16 sps:$4 sm:$0xff]  }
 0x385   : > { %3268 = vmatpush1.bf16.msra.mxu0 %v6131_v32  ;;  %3350 = vmatpush1.bf16.msra.mxu1 %v6134_v33  ;;  %v6209_v32 = vld [vmem:[%s6784_s10 + $0xca0] ss:$16 sps:$4 sm:$0xff]   ;;  %v6212_v33 = vld [vmem:[%s6784_s10 + $0xca8] ss:$16 sps:$4 sm:$0xff]  }
 0x386   : > { %3269 = vmatprep.subr.bf16.mxu0 %v6139_v34  ;;  %3351 = vmatprep.subr.bf16.mxu1 %v6142_v35  ;;  %v6217_v34 = vld [vmem:[%s6784_s10 + $0xcc4] ss:$16 sps:$4 sm:$0xff]   ;;  %v6220_v35 = vld [vmem:[%s6784_s10 + $0xccc] ss:$16 sps:$4 sm:$0xff]  }
 0x389   : > { %3270 = vmatpush1.bf16.msra.mxu0 %v6137_v37  ;;  %3352 = vmatpush1.bf16.msra.mxu1 %v6140_v38  ;;  %v6215_v37 = vld [vmem:[%s6784_s10 + $0xcc0] ss:$16 sps:$4 sm:$0xff]   ;;  %v6218_v38 = vld [vmem:[%s6784_s10 + $0xcc8] ss:$16 sps:$4 sm:$0xff]  }
 0x38a   : > { %3271 = vmatprep.subr.bf16.mxu0 %v6145_v40  ;;  %3353 = vmatprep.subr.bf16.mxu1 %v6148_v41  ;;  %v6223_v40 = vld [vmem:[%s6784_s10 + $0xce4] ss:$16 sps:$4 sm:$0xff]   ;;  %v6226_v41 = vld [vmem:[%s6784_s10 + $0xcec] ss:$16 sps:$4 sm:$0xff]  }
 0x38d   : > { %3272 = vmatpush1.bf16.msra.mxu0 %v6143_v42  ;;  %3354 = vmatpush1.bf16.msra.mxu1 %v6146_v43  ;;  %v6221_v42 = vld [vmem:[%s6784_s10 + $0xce0] ss:$16 sps:$4 sm:$0xff]   ;;  %v6224_v43 = vld [vmem:[%s6784_s10 + $0xce8] ss:$16 sps:$4 sm:$0xff]  }
 0x38e   : > { %3273 = vmatprep.subr.bf16.mxu0 %v6151_v44  ;;  %3355 = vmatprep.subr.bf16.mxu1 %v6154_v45  ;;  %v6229_v44 = vld [vmem:[%s6784_s10 + $0xd04] ss:$16 sps:$4 sm:$0xff]   ;;  %v6232_v45 = vld [vmem:[%s6784_s10 + $0xd0c] ss:$16 sps:$4 sm:$0xff]  }
 0x391   : > { %3274 = vmatpush1.bf16.msra.mxu0 %v6149_v22  ;;  %3356 = vmatpush1.bf16.msra.mxu1 %v6152_v48  ;;  %v6235_v22 = vld [vmem:[%s6784_s10 + $0xd24] ss:$16 sps:$4 sm:$0xff]   ;;  %v6238_v48 = vld [vmem:[%s6784_s10 + $0xd2c] ss:$16 sps:$4 sm:$0xff]  }
 0x392   : > { %3275 = vmatprep.subr.bf16.mxu0 %v6157_v54  ;;  %3357 = vmatprep.subr.bf16.mxu1 %v6160_v55  ;;  %v6236_v54 = vld [vmem:[%s6784_s10 + $0xd28] ss:$16 sps:$4 sm:$0xff]   ;;  %v6241_v55 = vld [vmem:[%s6784_s10 + $0xd44] ss:$16 sps:$4 sm:$0xff]  }
 0x395   : > { %3276 = vmatpush1.bf16.msra.mxu0 %v6155_v56  ;;  %3358 = vmatpush1.bf16.msra.mxu1 %v6158_v57  ;;  %v6244_v56 = vld [vmem:[%s6784_s10 + $0xd4c] ss:$16 sps:$4 sm:$0xff]   ;;  %v6239_v57 = vld [vmem:[%s6784_s10 + $0xd40] ss:$16 sps:$4 sm:$0xff]  }
 0x396   : > { %3277 = vmatprep.subr.bf16.mxu0 %v6163_v49  ;;  %3359 = vmatprep.subr.bf16.mxu1 %v6166_v50  ;;  %v6247_v49 = vld [vmem:[%s6784_s10 + $0xd64] ss:$16 sps:$4 sm:$0xff]   ;;  %v6250_v50 = vld [vmem:[%s6784_s10 + $0xd6c] ss:$16 sps:$4 sm:$0xff]  }
 0x399   : > { %3278 = vmatpush1.bf16.msra.mxu0 %v6161_v59  ;;  %3360 = vmatpush1.bf16.msra.mxu1 %v6164_v51  ;;  %v6245_v59 = vld [vmem:[%s6784_s10 + $0xd60] ss:$16 sps:$4 sm:$0xff]   ;;  %v6248_v51 = vld [vmem:[%s6784_s10 + $0xd68] ss:$16 sps:$4 sm:$0xff]  }
 0x39a   : > { %3279 = vmatprep.subr.bf16.mxu0 %v6169_v61  ;;  %3361 = vmatprep.subr.bf16.mxu1 %v6172_v62  ;;  %v6251_v61 = vld [vmem:[%s6784_s10 + $0xd80] ss:$16 sps:$4 sm:$0xff]   ;;  %v6254_v62 = vld [vmem:[%s6784_s10 + $0xd88] ss:$16 sps:$4 sm:$0xff]  }
 0x39d   : > { %3280 = vmatpush1.bf16.msra.mxu0 %v6167_v63  ;;  %3362 = vmatpush1.bf16.msra.mxu1 %v6170_v0  ;;  %v6259_v63 = vld [vmem:[%s6784_s10 + $0xda4] ss:$16 sps:$4 sm:$0xff]   ;;  %v6262_v0 = vld [vmem:[%s6784_s10 + $0xdac] ss:$16 sps:$4 sm:$0xff]  }
 0x39e   : > { %3281 = vmatprep.subr.bf16.mxu0 %v6175_v36  ;;  %3363 = vmatprep.subr.bf16.mxu1 %v6178_v2  ;;  %v6260_v36 = vld [vmem:[%s6784_s10 + $0xda8] ss:$16 sps:$4 sm:$0xff]   ;;  %v6265_v2 = vld [vmem:[%s6784_s10 + $0xdc4] ss:$16 sps:$4 sm:$0xff]  }
 0x3a1   : > { %3282 = vmatpush1.bf16.msra.mxu0 %v6173_v3  ;;  %3364 = vmatpush1.bf16.msra.mxu1 %v6176_v4  ;;  %v6268_v3 = vld [vmem:[%s6784_s10 + $0xdcc] ss:$16 sps:$4 sm:$0xff]   ;;  %v6263_v4 = vld [vmem:[%s6784_s10 + $0xdc0] ss:$16 sps:$4 sm:$0xff]  }
 0x3a2   : > { %4147 = vmatprep.subr.bf16.mxu0 %v6181_v5  ;;  %4229 = vmatprep.subr.bf16.mxu1 %v6184_v6  ;;  %v6271_v5 = vld [vmem:[%s6784_s10 + $0xde4] ss:$16 sps:$4 sm:$0xff]   ;;  %v6274_v6 = vld [vmem:[%s6784_s10 + $0xdec] ss:$16 sps:$4 sm:$0xff]  }
 0x3a4   : > { %3284 = vmatmul.mubr.bf16.vlgmr.msra.gmra.mrb[8].mxu0 %v2418_v9  ;;  %3366 = vmatmul.mubr.bf16.vlgmr.msra.gmra.mrb[8].mxu1 %v2418_v9  ;;  %v6277_v9 = vld [vmem:[%s6784_s10 + $0xe04] ss:$16 sps:$4 sm:$0xff]  }
 0x3a5   : > { %4148 = vmatpush1.bf16.msra.mxu0 %v6179_v7  ;;  %4230 = vmatpush1.bf16.msra.mxu1 %v6182_v8  ;;  %v6269_v7 = vld [vmem:[%s6784_s10 + $0xde0] ss:$16 sps:$4 sm:$0xff]   ;;  %v6272_v8 = vld [vmem:[%s6784_s10 + $0xde8] ss:$16 sps:$4 sm:$0xff]  }
 0x3a6   : > { %4149 = vmatprep.subr.bf16.mxu0 %v6187_v10  ;;  %4231 = vmatprep.subr.bf16.mxu1 %v6190_v11  ;;  %v6280_v10 = vld [vmem:[%s6784_s10 + $0xe0c] ss:$16 sps:$4 sm:$0xff]   ;;  %v7329_v11 = vsub.s32 0, %v7020_v23 }
 0x3a9   : > { %4150 = vmatpush1.bf16.msra.mxu0 %v6185_v12  ;;  %4232 = vmatpush1.bf16.msra.mxu1 %v6188_v13  ;;  %v5099_v12 = vld [vmem:[%s7022_s22 + $0x40] sm:$0xff]  ;;  %v5100_v13 = vld [vmem:[%s7022_s22 + $0x48] sm:$0xff] }
 0x3aa   : > { %4151 = vmatprep.subr.bf16.mxu0 %v6193_v14  ;;  %4233 = vmatprep.subr.bf16.mxu1 %v6196_v15  ;;  %v5102_v14 = vld [vmem:[%s7022_s22 + $0x58] sm:$0xff]  ;;  %v2557_v15 = vrot.slane %v5099_v12, %v7329_v11 }
 0x3ab   : > { %v6338_v12 = vld [vmem:[%s6784_s10 + $0xf48] ss:$16 sps:$4 sm:$0xff]  }
 0x3ad   : > { %4152 = vmatpush1.bf16.msra.mxu0 %v6191_v17  ;;  %4234 = vmatpush1.bf16.msra.mxu1 %v6194_v18  ;;  %v2561_v17 = vrot.slane %v5100_v13, %v7329_v11  ;;  %v2569_v18 = vrot.slane %v5102_v14, %v7329_v11  ;;  %v6343_v13 = vld [vmem:[%s6784_s10 + $0xf64] ss:$16 sps:$4 sm:$0xff]   ;;  %v6346_v14 = vld [vmem:[%s6784_s10 + $0xf6c] ss:$16 sps:$4 sm:$0xff]  }
 0x3ae   : > { %4153 = vmatprep.subr.bf16.mxu0 %v6199_v19  ;;  %4235 = vmatprep.subr.bf16.mxu1 %v6202_v20 }
 0x3b1   : > { %4154 = vmatpush1.bf16.msra.mxu0 %v6197_v21  ;;  %4236 = vmatpush1.bf16.msra.mxu1 %v6200_v24 }
 0x3b2   : > { %4155 = vmatprep.subr.bf16.mxu0 %v6205_v25  ;;  %4237 = vmatprep.subr.bf16.mxu1 %v6208_v27 }
 0x3b5   : > { %4156 = vmatpush1.bf16.msra.mxu0 %v6203_v28  ;;  %4238 = vmatpush1.bf16.msra.mxu1 %v6206_v29 }
 0x3b6   : > { %4157 = vmatprep.subr.bf16.mxu0 %v6211_v30  ;;  %4239 = vmatprep.subr.bf16.mxu1 %v6214_v31 }
 0x3b9   : > { %4158 = vmatpush1.bf16.msra.mxu0 %v6209_v32  ;;  %4240 = vmatpush1.bf16.msra.mxu1 %v6212_v33  ;;  %v6275_v33 = vld [vmem:[%s6784_s10 + $0xe00] ss:$16 sps:$4 sm:$0xff]  }
 0x3ba   : > { %4159 = vmatprep.subr.bf16.mxu0 %v6217_v34  ;;  %4241 = vmatprep.subr.bf16.mxu1 %v6220_v35  ;;  %v6278_v34 = vld [vmem:[%s6784_s10 + $0xe08] ss:$16 sps:$4 sm:$0xff]  }
 0x3bd   : > { %4160 = vmatpush1.bf16.msra.mxu0 %v6215_v37  ;;  %4242 = vmatpush1.bf16.msra.mxu1 %v6218_v38  ;;  %v6283_v37 = vld [vmem:[%s6784_s10 + $0xe24] ss:$16 sps:$4 sm:$0xff]   ;;  %v6286_v38 = vld [vmem:[%s6784_s10 + $0xe2c] ss:$16 sps:$4 sm:$0xff]  }
 0x3be   : > { %4161 = vmatprep.subr.bf16.mxu0 %v6223_v40  ;;  %4243 = vmatprep.subr.bf16.mxu1 %v6226_v41  ;;  %v6281_v41 = vld [vmem:[%s6784_s10 + $0xe20] ss:$16 sps:$4 sm:$0xff]  }
 0x3c1   : > { %4162 = vmatpush1.bf16.msra.mxu0 %v6221_v42  ;;  %4244 = vmatpush1.bf16.msra.mxu1 %v6224_v43  ;;  %v6284_v42 = vld [vmem:[%s6784_s10 + $0xe28] ss:$16 sps:$4 sm:$0xff]   ;;  %v6289_v43 = vld [vmem:[%s6784_s10 + $0xe44] ss:$16 sps:$4 sm:$0xff]  }
 0x3c2   : > { %4163 = vmatprep.subr.bf16.mxu0 %v6229_v44  ;;  %4245 = vmatprep.subr.bf16.mxu1 %v6232_v45  ;;  %v6292_v44 = vld [vmem:[%s6784_s10 + $0xe4c] ss:$16 sps:$4 sm:$0xff]   ;;  %v6287_v45 = vld [vmem:[%s6784_s10 + $0xe40] ss:$16 sps:$4 sm:$0xff]  }
 0x3c5   : > { %4164 = vmatpush1.bf16.msra.mxu0 %v6227_v16  ;;  %4246 = vmatpush1.bf16.msra.mxu1 %v6230_v46  ;;  %v6290_v16 = vld [vmem:[%s6784_s10 + $0xe48] ss:$16 sps:$4 sm:$0xff]   ;;  %v6295_v46 = vld [vmem:[%s6784_s10 + $0xe64] ss:$16 sps:$4 sm:$0xff]  }
 0x3c6   : > { %4165 = vmatprep.subr.bf16.mxu0 %v6235_v22  ;;  %4247 = vmatprep.subr.bf16.mxu1 %v6238_v48  ;;  %v6298_v22 = vld [vmem:[%s6784_s10 + $0xe6c] ss:$16 sps:$4 sm:$0xff]   ;;  %v6293_v48 = vld [vmem:[%s6784_s10 + $0xe60] ss:$16 sps:$4 sm:$0xff]  }
 0x3c9   : > { %4166 = vmatpush1.bf16.msra.mxu0 %v6233_v53  ;;  %4248 = vmatpush1.bf16.msra.mxu1 %v6236_v54  ;;  %v6296_v53 = vld [vmem:[%s6784_s10 + $0xe68] ss:$16 sps:$4 sm:$0xff]   ;;  %v6301_v54 = vld [vmem:[%s6784_s10 + $0xe84] ss:$16 sps:$4 sm:$0xff]  }
 0x3ca   : > { %4167 = vmatprep.subr.bf16.mxu0 %v6241_v55  ;;  %4249 = vmatprep.subr.bf16.mxu1 %v6244_v56  ;;  %v6304_v55 = vld [vmem:[%s6784_s10 + $0xe8c] ss:$16 sps:$4 sm:$0xff]   ;;  %v6299_v56 = vld [vmem:[%s6784_s10 + $0xe80] ss:$16 sps:$4 sm:$0xff]  }
 0x3cd   : > { %4168 = vmatpush1.bf16.msra.mxu0 %v6239_v57  ;;  %4250 = vmatpush1.bf16.msra.mxu1 %v6242_v58  ;;  %v6302_v57 = vld [vmem:[%s6784_s10 + $0xe88] ss:$16 sps:$4 sm:$0xff]   ;;  %v6307_v58 = vld [vmem:[%s6784_s10 + $0xea4] ss:$16 sps:$4 sm:$0xff]  }
 0x3ce   : > { %4169 = vmatprep.subr.bf16.mxu0 %v6247_v49  ;;  %4251 = vmatprep.subr.bf16.mxu1 %v6250_v50  ;;  %v6310_v49 = vld [vmem:[%s6784_s10 + $0xeac] ss:$16 sps:$4 sm:$0xff]   ;;  %v6305_v50 = vld [vmem:[%s6784_s10 + $0xea0] ss:$16 sps:$4 sm:$0xff]  }
 0x3d1   : > { %4170 = vmatpush1.bf16.msra.mxu0 %v6245_v59  ;;  %4252 = vmatpush1.bf16.msra.mxu1 %v6248_v51  ;;  %v6308_v59 = vld [vmem:[%s6784_s10 + $0xea8] ss:$16 sps:$4 sm:$0xff]   ;;  %v6313_v51 = vld [vmem:[%s6784_s10 + $0xec4] ss:$16 sps:$4 sm:$0xff]  }
 0x3d2   : > { %4171 = vmatprep.subr.bf16.mxu0 %v6253_v52  ;;  %4253 = vmatprep.subr.bf16.mxu1 %v6256_v60  ;;  %v6316_v52 = vld [vmem:[%s6784_s10 + $0xecc] ss:$16 sps:$4 sm:$0xff]   ;;  %v6311_v60 = vld [vmem:[%s6784_s10 + $0xec0] ss:$16 sps:$4 sm:$0xff]  }
 0x3d5   : > { %4172 = vmatpush1.bf16.msra.mxu0 %v6251_v61  ;;  %4254 = vmatpush1.bf16.msra.mxu1 %v6254_v62  ;;  %v6314_v61 = vld [vmem:[%s6784_s10 + $0xec8] ss:$16 sps:$4 sm:$0xff]   ;;  %v6319_v62 = vld [vmem:[%s6784_s10 + $0xee4] ss:$16 sps:$4 sm:$0xff]  }
 0x3d6   : > { %4173 = vmatprep.subr.bf16.mxu0 %v6259_v63  ;;  %4255 = vmatprep.subr.bf16.mxu1 %v6262_v0  ;;  %v6322_v63 = vld [vmem:[%s6784_s10 + $0xeec] ss:$16 sps:$4 sm:$0xff]   ;;  %v6317_v0 = vld [vmem:[%s6784_s10 + $0xee0] ss:$16 sps:$4 sm:$0xff]  }
 0x3d9   : > { %4174 = vmatpush1.bf16.msra.mxu0 %v6257_v1  ;;  %4256 = vmatpush1.bf16.msra.mxu1 %v6260_v36  ;;  %v6320_v1 = vld [vmem:[%s6784_s10 + $0xee8] ss:$16 sps:$4 sm:$0xff]   ;;  %v6325_v36 = vld [vmem:[%s6784_s10 + $0xf04] ss:$16 sps:$4 sm:$0xff]  }
 0x3da   : > { %4175 = vmatprep.subr.bf16.mxu0 %v6265_v2  ;;  %4257 = vmatprep.subr.bf16.mxu1 %v6268_v3  ;;  %v6328_v2 = vld [vmem:[%s6784_s10 + $0xf0c] ss:$16 sps:$4 sm:$0xff]   ;;  %v6323_v3 = vld [vmem:[%s6784_s10 + $0xf00] ss:$16 sps:$4 sm:$0xff]  }
 0x3dd   : > { %4176 = vmatpush1.bf16.msra.mxu0 %v6263_v4  ;;  %4258 = vmatpush1.bf16.msra.mxu1 %v6266_v39  ;;  %v6326_v4 = vld [vmem:[%s6784_s10 + $0xf08] ss:$16 sps:$4 sm:$0xff]   ;;  %v6331_v39 = vld [vmem:[%s6784_s10 + $0xf24] ss:$16 sps:$4 sm:$0xff]  }
 0x3de   : > { %4177 = vmatprep.subr.bf16.mxu0 %v6271_v5  ;;  %4259 = vmatprep.subr.bf16.mxu1 %v6274_v6  ;;  %v6334_v5 = vld [vmem:[%s6784_s10 + $0xf2c] ss:$16 sps:$4 sm:$0xff]   ;;  %v6329_v6 = vld [vmem:[%s6784_s10 + $0xf20] ss:$16 sps:$4 sm:$0xff]  }
 0x3e1   : > { %4178 = vmatpush1.bf16.msra.mxu0 %v6269_v7  ;;  %4260 = vmatpush1.bf16.msra.mxu1 %v6272_v8  ;;  %v6332_v7 = vld [vmem:[%s6784_s10 + $0xf28] ss:$16 sps:$4 sm:$0xff]   ;;  %v6337_v8 = vld [vmem:[%s6784_s10 + $0xf44] ss:$16 sps:$4 sm:$0xff]  }
 0x3e2   : > { %4188 = vmatprep.subr.bf16.mxu0 %v6277_v9  ;;  %4270 = vmatprep.subr.bf16.mxu1 %v6280_v10  ;;  %v6340_v9 = vld [vmem:[%s6784_s10 + $0xf4c] ss:$16 sps:$4 sm:$0xff]   ;;  %v6335_v10 = vld [vmem:[%s6784_s10 + $0xf40] ss:$16 sps:$4 sm:$0xff]  }
 0x477   : > { %v3285_v19 = vpop.f32.mrb[8].mxu0  ;;  %v7337_v20 = vpop.f32.mrb[8].mxu1 }
 0x478   : > { %v5498_v21 = vadd.f32 %v3285_v19, %v2557_v15  ;;  %v3287_v24 = vpop.f32.mrb[9].mxu0  ;;  %v3369_v23 = vpop.f32.mrb[9].mxu1  ;;  %v6341_v15 = vld [vmem:[%s6784_s10 + $0xf60] ss:$16 sps:$4 sm:$0xff]   ;;  %v6352_v19 = vld [vmem:[%s6784_s10 + $0xf8c] ss:$16 sps:$4 sm:$0xff]  }
 0x479   : > { %v5499_v25 = vadd.f32 %v3287_v24, %v2561_v17  ;;  %v3289_v27 = vpop.f32.mrb[10].mxu0  ;;  %v3371_v28 = vpop.f32.mrb[10].mxu1  ;;  %v5501_v29 = vadd.f32 %v3369_v23, %v2569_v18  ;;  %v6344_v17 = vld [vmem:[%s6784_s10 + $0xf68] ss:$16 sps:$4 sm:$0xff]   ;;  %v6349_v18 = vld [vmem:[%s6784_s10 + $0xf84] ss:$16 sps:$4 sm:$0xff]  }
 0x47a   : > { %v3290_v30 = vpop.f32.mrb[11].mxu0  ;;  %v3372_v31 = vpop.f32.mrb[11].mxu1  ;;  %v3374_v35 = vpack.c.bf16 %v5498_v21, %v5498_v21  ;;  %v6347_v21 = vld [vmem:[%s6784_s10 + $0xf80] ss:$16 sps:$4 sm:$0xff]   ;;  %v6350_v24 = vld [vmem:[%s6784_s10 + $0xf88] ss:$16 sps:$4 sm:$0xff]  }
 0x47b   : > { %v3375_v32 = vpack.c.bf16 %v5499_v25, %v5499_v25  ;;  %v3377_v40 = vpack.c.bf16 %v5501_v29, %v5501_v29  ;;  %v6355_v23 = vld [vmem:[%s6784_s10 + $0xfa4] ss:$16 sps:$4 sm:$0xff]   ;;  %v6358_v25 = vld [vmem:[%s6784_s10 + $0xfac] ss:$16 sps:$4 sm:$0xff]   ;;  %v6353_v27 = vld [vmem:[%s6784_s10 + $0xfa0] ss:$16 sps:$4 sm:$0xff]  }
 0x47c   : > { %v6356_v28 = vld [vmem:[%s6784_s10 + $0xfa8] ss:$16 sps:$4 sm:$0xff]   ;;  %v6361_v29 = vld [vmem:[%s6784_s10 + $0xfc4] ss:$16 sps:$4 sm:$0xff]   ;;  %v6364_v30 = vld [vmem:[%s6784_s10 + $0xfcc] ss:$16 sps:$4 sm:$0xff]  }
 0x47d   : > { %4179 = vmatprep.mubr.bf16.mxu0 %v3375_v32  ;;  %4261 = vmatprep.mubr.bf16.mxu1 %v3375_v32  ;;  %v5101_v31 = vld [vmem:[%s7022_s22 + $0x50] sm:$0xff] }
 0x47e   : > { %4180 = vmatmul.mubr.bf16.vlgmr.msra.gmra.mrb[12].mxu0 %v3374_v35  ;;  %4262 = vmatmul.mubr.bf16.vlgmr.msra.gmra.mrb[12].mxu1 %v3374_v35  ;;  %v6359_v32 = vld [vmem:[%s6784_s10 + $0xfc0] ss:$16 sps:$4 sm:$0xff]   ;;  %v6367_v35 = vld [vmem:[%s6784_s10 + $0xfe4] ss:$16 sps:$4 sm:$0xff]  }
 0x47f   : > { %4189 = vmatpush1.bf16.msra.mxu0 %v6275_v33  ;;  %4271 = vmatpush1.bf16.msra.mxu1 %v6278_v34  ;;  %v6362_v33 = vld [vmem:[%s6784_s10 + $0xfc8] ss:$16 sps:$4 sm:$0xff]   ;;  %v2565_v34 = vrot.slane %v5101_v31, %v7329_v11 }
 0x480   : > { %4220 = vmatprep.mubr.bf16.mxu0 %v3377_v40  ;;  %4302 = vmatprep.mubr.bf16.mxu1 %v3377_v40  ;;  %v6368_v40 = vld [vmem:[%s6784_s10 + $0xfe8] ss:$16 sps:$4 sm:$0xff]  }
 0x481   : > { %4190 = vmatprep.subr.bf16.mxu0 %v6283_v37  ;;  %4272 = vmatprep.subr.bf16.mxu1 %v6286_v38  ;;  %v6370_v37 = vld [vmem:[%s6784_s10 + $0xfec] ss:$16 sps:$4 sm:$0xff]   ;;  %v6365_v38 = vld [vmem:[%s6784_s10 + $0xfe0] ss:$16 sps:$4 sm:$0xff]  }
 0x483   : > { %4191 = vmatpush1.bf16.msra.mxu0 %v6281_v41  ;;  %4273 = vmatpush1.bf16.msra.mxu1 %v6284_v42  ;;  %v5500_v41 = vadd.f32 %v7337_v20, %v2565_v34 }
 0x484   : > { %4192 = vmatprep.subr.bf16.mxu0 %v6289_v43  ;;  %4274 = vmatprep.subr.bf16.mxu1 %v6292_v44 }
 0x485   : > { %v3376_v42 = vpack.c.bf16 %v5500_v41, %v5500_v41 }
 0x487   : > { %4193 = vmatpush1.bf16.msra.mxu0 %v6287_v45  ;;  %4275 = vmatpush1.bf16.msra.mxu1 %v6290_v16 }
 0x488   : > { %4194 = vmatprep.subr.bf16.mxu0 %v6295_v46  ;;  %4276 = vmatprep.subr.bf16.mxu1 %v6298_v22 }
 0x48b   : > { %4195 = vmatpush1.bf16.msra.mxu0 %v6293_v48  ;;  %4277 = vmatpush1.bf16.msra.mxu1 %v6296_v53 }
 0x48c   : > { %4196 = vmatprep.subr.bf16.mxu0 %v6301_v54  ;;  %4278 = vmatprep.subr.bf16.mxu1 %v6304_v55 }
 0x48f   : > { %4197 = vmatpush1.bf16.msra.mxu0 %v6299_v56  ;;  %4279 = vmatpush1.bf16.msra.mxu1 %v6302_v57 }
 0x490   : > { %4198 = vmatprep.subr.bf16.mxu0 %v6307_v58  ;;  %4280 = vmatprep.subr.bf16.mxu1 %v6310_v49 }
 0x493   : > { %4199 = vmatpush1.bf16.msra.mxu0 %v6305_v50  ;;  %4281 = vmatpush1.bf16.msra.mxu1 %v6308_v59 }
 0x494   : > { %4200 = vmatprep.subr.bf16.mxu0 %v6313_v51  ;;  %4282 = vmatprep.subr.bf16.mxu1 %v6316_v52 }
 0x497   : > { %4201 = vmatpush1.bf16.msra.mxu0 %v6311_v60  ;;  %4283 = vmatpush1.bf16.msra.mxu1 %v6314_v61 }
 0x498   : > { %4202 = vmatprep.subr.bf16.mxu0 %v6319_v62  ;;  %4284 = vmatprep.subr.bf16.mxu1 %v6322_v63 }
 0x49b   : > { %4203 = vmatpush1.bf16.msra.mxu0 %v6317_v0  ;;  %4285 = vmatpush1.bf16.msra.mxu1 %v6320_v1 }
 0x49c   : > { %4204 = vmatprep.subr.bf16.mxu0 %v6325_v36  ;;  %4286 = vmatprep.subr.bf16.mxu1 %v6328_v2 }
 0x49f   : > { %4205 = vmatpush1.bf16.msra.mxu0 %v6323_v3  ;;  %4287 = vmatpush1.bf16.msra.mxu1 %v6326_v4 }
 0x4a0   : > { %4206 = vmatprep.subr.bf16.mxu0 %v6331_v39  ;;  %4288 = vmatprep.subr.bf16.mxu1 %v6334_v5 }
 0x4a3   : > { %4207 = vmatpush1.bf16.msra.mxu0 %v6329_v6  ;;  %4289 = vmatpush1.bf16.msra.mxu1 %v6332_v7 }
 0x4a4   : > { %4208 = vmatprep.subr.bf16.mxu0 %v6337_v8  ;;  %4290 = vmatprep.subr.bf16.mxu1 %v6340_v9 }
 0x4a7   : > { %4209 = vmatpush1.bf16.msra.mxu0 %v6335_v10  ;;  %4291 = vmatpush1.bf16.msra.mxu1 %v6338_v12 }
 0x4a8   : > { %4210 = vmatprep.subr.bf16.mxu0 %v6343_v13  ;;  %4292 = vmatprep.subr.bf16.mxu1 %v6346_v14 }
 0x4ab   : > { %4211 = vmatpush1.bf16.msra.mxu0 %v6341_v15  ;;  %4293 = vmatpush1.bf16.msra.mxu1 %v6344_v17 }
 0x4ac   : > { %4212 = vmatprep.subr.bf16.mxu0 %v6349_v18  ;;  %4294 = vmatprep.subr.bf16.mxu1 %v6352_v19 }
 0x4af   : > { %4213 = vmatpush1.bf16.msra.mxu0 %v6347_v21  ;;  %4295 = vmatpush1.bf16.msra.mxu1 %v6350_v24 }
 0x4b0   : > { %4214 = vmatprep.subr.bf16.mxu0 %v6355_v23  ;;  %4296 = vmatprep.subr.bf16.mxu1 %v6358_v25 }
 0x4b3   : > { %4215 = vmatpush1.bf16.msra.mxu0 %v6353_v27  ;;  %4297 = vmatpush1.bf16.msra.mxu1 %v6356_v28 }
 0x4b4   : > { %4216 = vmatprep.subr.bf16.mxu0 %v6361_v29  ;;  %4298 = vmatprep.subr.bf16.mxu1 %v6364_v30 }
 0x4b7   : > { %4217 = vmatpush1.bf16.msra.mxu0 %v6359_v32  ;;  %4299 = vmatpush1.bf16.msra.mxu1 %v6362_v33 }
 0x4b8   : > { %4218 = vmatprep.subr.bf16.mxu0 %v6367_v35  ;;  %4300 = vmatprep.subr.bf16.mxu1 %v6370_v37 }
 0x4bb   : > { %4219 = vmatpush1.bf16.msra.mxu0 %v6365_v38  ;;  %4301 = vmatpush1.bf16.msra.mxu1 %v6368_v40 }
 0x4be   : > { %4221 = vmatmul.mubr.bf16.vlgmr.msra.gmra.mrb[12].mxu0 %v3376_v42  ;;  %4303 = vmatmul.mubr.bf16.vlgmr.msra.gmra.mrb[12].mxu1 %v3376_v42 }
 0x591   : > { %v4222_v43 = vpop.f32.mrb[12].mxu0  ;;  %v4304_v44 = vpop.f32.mrb[12].mxu1 }
 0x592   : > { %v4316_v11 = vrot.slane %v4222_v43, 4  ;;  %v4328_v45 = vrot.slane %v4304_v44, 4  ;;  %v4224_v16 = vpop.f32.mrb[13].mxu0  ;;  %v4306_v46 = vpop.f32.mrb[13].mxu1 }
 0x593   : > { %v4322_v22 = vrot.slane %v4224_v16, 4  ;;  %v4334_v48 = vrot.slane %v4306_v46, 4  ;;  %v4226_v53 = vpop.f32.mrb[14].mxu0  ;;  %v4308_v54 = vpop.f32.mrb[14].mxu1 }
 0x594   : > { %v4317_v55 = vadd.f32 %v4316_v11, %v4222_v43  ;;  %v4329_v56 = vadd.f32 %v4328_v45, %v4304_v44  ;;  %v4227_v20 = vpop.f32.mrb[15].mxu0  ;;  %v4309_v57 = vpop.f32.mrb[15].mxu1 }
 0x595   : > { %v4323_v58 = vadd.f32 %v4322_v22, %v4224_v16  ;;  %v4335_v49 = vadd.f32 %v4334_v48, %v4306_v46 }
 0x596   : > { %v4318_v50 = vrot.slane %v4317_v55, 2  ;;  %v4330_v59 = vrot.slane %v4329_v56, 2 }
 0x597   : > { %v4324_v51 = vrot.slane %v4323_v58, 2  ;;  %v4336_v52 = vrot.slane %v4335_v49, 2 }
 0x598   : > { %v4319_v60 = vadd.f32 %v4318_v50, %v4317_v55  ;;  %v4331_v61 = vadd.f32 %v4330_v59, %v4329_v56  ;;  %v5488_v59 = vld [vmem:[%s7022_s22 + $0x68] sm:$0xff] }
 0x599   : > { %v4325_v62 = vadd.f32 %v4324_v51, %v4323_v58  ;;  %v4337_v63 = vadd.f32 %v4336_v52, %v4335_v49  ;;  %v5487_v58 = vld [vmem:[%s7022_s22 + $0x60] sm:$0xff]  ;;  %v5489_v49 = vld [vmem:[%s7022_s22 + $0x70] sm:$0xff] }
 0x59a   : > { %v4320_v0 = vrot.slane %v4319_v60, 1  ;;  %v4332_v1 = vrot.slane %v4331_v61, 1 }
 0x59b   : > { %v4326_v36 = vrot.slane %v4325_v62, 1  ;;  %v4338_v2 = vrot.slane %v4337_v63, 1 }
 0x59c   : > { %v4321_v3 = vadd.f32 %v4320_v0, %v4319_v60  ;;  %v4333_v4 = vadd.f32 %v4332_v1, %v4331_v61  ;;  %v5490_v60 = vld [vmem:[%s7022_s22 + $0x78] sm:$0xff]  ;;  %v4415_v1 = vrot.slane %v5487_v58, %v7029_v47 }
 0x59d   : > { %v4327_v39 = vadd.f32 %v4326_v36, %v4325_v62  ;;  %v4339_v5 = vadd.f32 %v4338_v2, %v4337_v63 }
 0x59e   : > { %v4340_v6 = vmul.f32 0.125, %v4321_v3  ;;  %v4342_v7 = vmul.f32 0.125, %v4333_v4  ;;  %v4423_v3 = vrot.slane %v5489_v49, %v7029_v47 }
 0x59f   : > { %v4341_v8 = vmul.f32 0.125, %v4327_v39  ;;  %v4343_v9 = vmul.f32 0.125, %v4339_v5 }
 0x5a0   : > { %v4344_v10 = vsub.f32 %v4222_v43, %v4340_v6  ;;  %v4346_v12 = vsub.f32 %v4304_v44, %v4342_v7  ;;  %v4419_v6 = vrot.slane %v5488_v59, %v7029_v47 }
 0x5a1   : > { %v7404_v13 = vsub.f32 %v4224_v16, %v4341_v8  ;;  %v7406_v14 = vsub.f32 %v4306_v46, %v4343_v9  ;;  %v4427_v9 = vrot.slane %v5490_v60, %v7029_v47 }
 0x5a2   : > { %v4348_v15 = vmul.f32 %v4344_v10, %v4344_v10  ;;  %v4350_v17 = vmul.f32 %v4346_v12, %v4346_v12 }
 0x5a3   : > { %v4349_v18 = vmul.f32 %v7404_v13, %v7404_v13  ;;  %v4351_v19 = vmul.f32 %v7406_v14, %v7406_v14 }
 0x5a4   : > { %v4352_v21 = vrot.slane %v4348_v15, 4  ;;  %v4364_v24 = vrot.slane %v4350_v17, 4 }
 0x5a5   : > { %v4358_v23 = vrot.slane %v4349_v18, 4  ;;  %v4370_v25 = vrot.slane %v4351_v19, 4 }
 0x5a6   : > { %v4353_v27 = vadd.f32 %v4352_v21, %v4348_v15  ;;  %v4365_v28 = vadd.f32 %v4364_v24, %v4350_v17 }
 0x5a7   : > { %v4359_v29 = vadd.f32 %v4358_v23, %v4349_v18  ;;  %v4371_v30 = vadd.f32 %v4370_v25, %v4351_v19 }
 0x5a8   : > { %v4354_v31 = vrot.slane %v4353_v27, 2  ;;  %v4366_v32 = vrot.slane %v4365_v28, 2 }
 0x5a9   : > { %v4360_v33 = vrot.slane %v4359_v29, 2  ;;  %v4372_v34 = vrot.slane %v4371_v30, 2 }
 0x5aa   : > { %v4355_v35 = vadd.f32 %v4354_v31, %v4353_v27  ;;  %v4367_v37 = vadd.f32 %v4366_v32, %v4365_v28 }
 0x5ab   : > { %v4361_v38 = vadd.f32 %v4360_v33, %v4359_v29  ;;  %v4373_v40 = vadd.f32 %v4372_v34, %v4371_v30 }
 0x5ac   : > { %v4356_v41 = vrot.slane %v4355_v35, 1  ;;  %v4368_v42 = vrot.slane %v4367_v37, 1 }
 0x5ad   : > { %v4362_v43 = vrot.slane %v4361_v38, 1  ;;  %v4374_v44 = vrot.slane %v4373_v40, 1 }
 0x5ae   : > { %v4357_v11 = vadd.f32 %v4356_v41, %v4355_v35  ;;  %v4369_v45 = vadd.f32 %v4368_v42, %v4367_v37 }
 0x5af   : > { %v4363_v16 = vadd.f32 %v4362_v43, %v4361_v38  ;;  %v4375_v46 = vadd.f32 %v4374_v44, %v4373_v40 }
 0x5b0   : > { %v4376_v22 = vmul.f32 0.125, %v4357_v11  ;;  %v4378_v48 = vmul.f32 0.125, %v4369_v45 }
 0x5b1   : > { %v4377_v53 = vmul.f32 0.125, %v4363_v16  ;;  %v4379_v54 = vmul.f32 0.125, %v4375_v46 }
 0x5b2   : > { %v4380_v55 = vadd.f32 1e-05, %v4376_v22  ;;  %v4382_v56 = vadd.f32 1e-05, %v4378_v48 }
 0x5b3   : > { %v4381_v20 = vadd.f32 1e-05, %v4377_v53  ;;  %v4383_v57 = vadd.f32 1e-05, %v4379_v54 }
 0x5b4   : > { %6387 = vrsqrt.f32 %v4380_v55 }
 0x5b5   : > { %6389 = vrsqrt.f32 %v4382_v56 }
 0x5b6   : > { %6391 = vrsqrt.f32 %v4381_v20 }
 0x5b7   : > { %6393 = vrsqrt.f32 %v4383_v57 }
 0x5be   : > { %v6388_v50 = vpop.eup %6387 }
 0x5bf   : > { %v6390_v51 = vpop.eup %6389  ;;  %v4388_v52 = vmul.f32 %v6388_v50, %v5487_v58 }
 0x5c0   : > { %v6392_v61 = vpop.eup %6391  ;;  %v4390_v62 = vmul.f32 %v6390_v51, %v5489_v49 }
 0x5c1   : > { %v6394_v63 = vpop.eup %6393  ;;  %v4395_v0 = vrot.slane %v4388_v52, %v7026_v26  ;;  %v4389_v36 = vmul.f32 %v6392_v61, %v5488_v59 }
 0x5c2   : > { %v4403_v2 = vrot.slane %v4390_v62, %v7026_v26  ;;  %v4391_v4 = vmul.f32 %v6394_v63, %v5490_v60 }
 0x5c3   : > { %v4408_v39 = vmul.f32 %v4395_v0, %v4344_v10  ;;  %v4399_v5 = vrot.slane %v4389_v36, %v7026_v26 }
 0x5c4   : > { %v4410_v7 = vmul.f32 %v4403_v2, %v4346_v12  ;;  %v4407_v8 = vrot.slane %v4391_v4, %v7026_v26  ;;  %4439 = sbr.rel (%p278_p4) target bundleno = 1485 (0x5cd), region = 56 }
 0x5c5   : > { %v4428_v15 = vadd.f32 %v4415_v1, %v4408_v39  ;;  %v4409_v17 = vmul.f32 %v4399_v5, %v7404_v13 }
 0x5c6   : > { %v4430_v18 = vadd.f32 %v4423_v3, %v4410_v7  ;;  %v4411_v19 = vmul.f32 %v4407_v8, %v7406_v14 }
 0x5c7   : > { %v4432_v21 = vmax.f32 %v4428_v15, 0.0  ;;  %v4429_v24 = vadd.f32 %v4419_v6, %v4409_v17 }
 0x5c8   : > { %v4434_v23 = vmax.f32 %v4430_v18, 0.0  ;;  %v4431_v25 = vadd.f32 %v4427_v9, %v4411_v19 }
 0x5c9   : > { %v4433_v10 = vmax.f32 %v4429_v24, 0.0  ;;  %4440 = vst [vmem:[%s6795_s30] sm:$0xff] (!%p278_p4), %v4432_v21 }
 0x5ca   : > { %v4435_v27 = vmax.f32 %v4431_v25, 0.0  ;;  %4442 = vst [vmem:[%s6795_s30 + $0x10] sm:$0xff] (!%p278_p4), %v4434_v23 }
 0x5cb   : > { %4441 = vst [vmem:[%s6795_s30 + $0x8] sm:$0xff] %v4433_v10 }
 0x5cc   : > { %4443 = vst [vmem:[%s6795_s30 + $0x18] sm:$0xff] %v4435_v27 }
 0x5cd PF: > { %p5492_p0 = scmp.ne.s32.totalorder %s6607_s19, 1 }
 0x5ce   : > { %v4447_v26 = vld [vmem:[#allocation4] sm:$0xff] (!%p5492_p0)  ;;  %v4448_v47 = vld [vmem:[#allocation4 + $0x8] sm:$0xff] (!%p5492_p0)  ;;  %v4449_v12 = vld [vmem:[#allocation4 + $0x10] sm:$0xff] (!%p5492_p0) }
 0x5cf   : > { %4446 = sbr.rel (%p5492_p0) target bundleno = 1494 (0x5d6), region = 60  ;;  %v4451_v13 = vadd.f32 (!%p5492_p0), %v4447_v26, %v4432_v21  ;;  %v4452_v14 = vadd.f32 (!%p5492_p0), %v4448_v47, %v4433_v10  ;;  %v4453_v28 = vadd.f32 (!%p5492_p0), %v4449_v12, %v4434_v23  ;;  %v4450_v29 = vld [vmem:[#allocation4 + $0x18] sm:$0xff] (!%p5492_p0) }
 0x5d0   : > { %v4454_v30 = vadd.f32 (!%p5492_p0), %v4450_v29, %v4435_v27 }
 0x5d1   : > { %4455 = vst [vmem:[%s6795_s30] sm:$0xff] (!%p5492_p0), %v4451_v13  ;;  %4456 = vst [vmem:[%s6795_s30 + $0x8] sm:$0xff] (!%p5492_p0), %v4452_v14 }
 0x5d2   : > { %4457 = vst [vmem:[%s6795_s30 + $0x10] sm:$0xff] (!%p5492_p0), %v4453_v28  ;;  %4458 = vst [vmem:[%s6795_s30 + $0x18] sm:$0xff] (!%p5492_p0), %v4454_v30 }
 0x5d6 PF: > { %p13_p8 = scmp.ge.s32.totalorder %s6610_s20, 4   ;;  %s7481_s15 = smov %s6545_s16 }
 0x5d7   : > { %s7482_s16 = smov %s6549_s17  ;;  %s7483_s17 = smov %s6620_s23 }
 0x5d8   : > { %s7484_s18 = smov %s6610_s20  ;;  %15 = sbr.rel (!%p13_p8) target bundleno = 3 (0x3), region = 108 }
 0x5df   :  { %4480 = vsyncpa [#allocation3], 1 }
 0x5e0   :  { %4482 = vsyncpa [#allocation3 + $0x1], 1 }
 0x5e1   :  { %4483 = vsyncpa [#allocation5], 1 }

</bundles_post_ra>
